<compile_context>
chip_gen: v7x
topology: tpu7x:2x2x1
jax: 0.10.0
libtpu: 0.0.40
codegen_flags: <defaults>
</compile_context>

<pallas_src>
import functools
import math

import jax
import jax.numpy as jnp
from jax.experimental import pallas as pl
from jax.experimental.pallas import tpu as pltpu


def _vmem_limit_bytes():
    """Generation-aware VMEM budget: ~75% of physical VMEM, capped at 100 MiB."""
    try:
        cap = pltpu.get_tpu_info().vmem_capacity_bytes
    except Exception:  # pragma: no cover - fall back to the smallest (v7x) budget
        cap = 64 * 1024 * 1024
    return int(min(cap * 3 // 4, 100 * 1024 * 1024))


def _layer_norm_f32(z, gamma, beta, eps=1e-6):
    # PyTorch nn.LayerNorm(d_model, eps=1e-06) — eps matches the original module.
    mean = jnp.mean(z, axis=-1, keepdims=True)
    var = jnp.mean((z - mean) * (z - mean), axis=-1, keepdims=True)
    norm = (z - mean) * jax.lax.rsqrt(var + eps)
    return norm * gamma.astype(jnp.float32) + beta.astype(jnp.float32)


# ------------------------------------------------------------------ kernel ----
def kadapter_kernel(hidden_ref,
                    down_wt_ref, down_b_ref,
                    wq_ref, wk_ref, wv_ref, wf_ref, ln1_g_ref, ln1_b_ref,
                    w1_ref, b1_ref, w2_ref, b2_ref, ln2_g_ref, ln2_b_ref,
                    up_wt_ref, up_b_ref,
                    out_ref, *, n_heads, n_blocks):
    x_in = hidden_ref[0]                                   # (S, D_in), native dtype
    cdt = x_in.dtype

    # ---- down projection (bias); activation stays resident from here on -----
    x = jnp.dot(x_in, down_wt_ref[...], preferred_element_type=jnp.float32)
    x = (x + down_b_ref[...].astype(jnp.float32)).astype(cdt)
    S, D = x.shape
    d_k = D // n_heads
    scale = 1.0 / math.sqrt(d_k)

    for blk in range(n_blocks):                            # static unroll (2 blocks)
        # ---------------- multi-head self-attention + residual + LayerNorm ----
        # KAdapterBlock builds attention_mask = ones(...), so the extended mask
        # (1 - 1) * -1e4 is identically zero; the mask add is a no-op and omitted.
        q = jnp.dot(x, wq_ref[blk], preferred_element_type=jnp.float32).astype(cdt)
        k = jnp.dot(x, wk_ref[blk], preferred_element_type=jnp.float32).astype(cdt)
        v = jnp.dot(x, wv_ref[blk], preferred_element_type=jnp.float32).astype(cdt)

        # head-batched (H, S, d_k) layout: lane slices stacked along a new,
        # cheap major axis (no lane-axis concatenate anywhere in this block).
        def split_heads(t):
            return jnp.stack([t[:, h * d_k:(h + 1) * d_k] for h in range(n_heads)],
                             axis=0)
        qh, kh, vh = split_heads(q), split_heads(k), split_heads(v)

        s = jnp.einsum('hqd,hkd->hqk', qh, kh,
                       preferred_element_type=jnp.float32) * scale
        s = s - jnp.max(s, axis=-1, keepdims=True)          # stable softmax in f32
        p = jnp.exp(s)
        p = p * pl.reciprocal(jnp.sum(p, axis=-1, keepdims=True), approx=True)

        ctx = jnp.einsum('hqk,hkd->hqd', p.astype(cdt), vh,
                         preferred_element_type=jnp.float32).astype(cdt)

        # output projection accumulated per head: replaces concat + (S,D)x(D,D).
        wf = wf_ref[blk]                                    # (D, D)
        y = jnp.zeros((S, D), jnp.float32)
        for h in range(n_heads):
            y = y + jnp.dot(ctx[h], wf[h * d_k:(h + 1) * d_k, :],
                            preferred_element_type=jnp.float32)

        z = x.astype(jnp.float32) + y                       # residual + LN in f32
        x = _layer_norm_f32(z, ln1_g_ref[blk], ln1_b_ref[blk]).astype(cdt)

        # ---------------- position-wise FFN + residual + LayerNorm ------------
        h1 = jnp.dot(x, w1_ref[blk], preferred_element_type=jnp.float32)
        h1 = jnp.maximum(h1 + b1_ref[blk].astype(jnp.float32), 0.0)
        y = jnp.dot(h1.astype(cdt), w2_ref[blk], preferred_element_type=jnp.float32)
        y = y + b2_ref[blk].astype(jnp.float32)
        z = x.astype(jnp.float32) + y
        x = _layer_norm_f32(z, ln2_g_ref[blk], ln2_b_ref[blk]).astype(cdt)

    # ---- up projection (bias) + outer residual -------------------------------
    up = jnp.dot(x, up_wt_ref[...], preferred_element_type=jnp.float32)
    up = up + up_b_ref[...].astype(jnp.float32)
    out_ref[0] = (x_in.astype(jnp.float32) + up).astype(out_ref.dtype)


# ----------------------------------------------------------------- wrapper ----
def _kadapter_call(hidden, params, *, n_heads, single_buffer_weights):
    B, S, D_in = hidden.shape
    D = params["down_wt"].shape[1]
    d_inner = params["w1_t"].shape[2]
    n_blocks = params["wq_t"].shape[0]

    def const_spec(shape):
        ndim = len(shape)
        imap = lambda b, _n=ndim: (0,) * _n                 # block index never changes
        if single_buffer_weights:
            return pl.BlockSpec(shape, imap, pipeline_mode=pl.Buffered(1))
        return pl.BlockSpec(shape, imap)

    kern = functools.partial(kadapter_kernel, n_heads=n_heads, n_blocks=n_blocks)
    return pl.pallas_call(
        kern,
        out_shape=jax.ShapeDtypeStruct((B, S, D_in), hidden.dtype),
        grid_spec=pltpu.PrefetchScalarGridSpec(
            num_scalar_prefetch=0,
            grid=(B,),
            in_specs=[
                pl.BlockSpec((1, S, D_in), lambda b: (b, 0, 0)),
                const_spec((D_in, D)), const_spec((1, D)),
                const_spec((n_blocks, D, D)), const_spec((n_blocks, D, D)),
                const_spec((n_blocks, D, D)), const_spec((n_blocks, D, D)),
                const_spec((n_blocks, 1, D)), const_spec((n_blocks, 1, D)),
                const_spec((n_blocks, D, d_inner)), const_spec((n_blocks, 1, d_inner)),
                const_spec((n_blocks, d_inner, D)), const_spec((n_blocks, 1, D)),
                const_spec((n_blocks, 1, D)), const_spec((n_blocks, 1, D)),
                const_spec((D, D_in)), const_spec((1, D_in)),
            ],
            out_specs=pl.BlockSpec((1, S, D_in), lambda b: (b, 0, 0)),
        ),
        compiler_params=pltpu.CompilerParams(
            dimension_semantics=("parallel",),
            vmem_limit_bytes=_vmem_limit_bytes(),
        ),
    )(hidden, params["down_wt"], params["down_b"],
      params["wq_t"], params["wk_t"], params["wv_t"], params["wf_t"],
      params["ln1_g"], params["ln1_b"],
      params["w1_t"], params["b1"], params["w2_t"], params["b2"],
      params["ln2_g"], params["ln2_b"],
      params["up_wt"], params["up_b"])


def kadapter_forward(hidden, params, *, n_heads):
    try:
        return _kadapter_call(hidden, params, n_heads=n_heads,
                              single_buffer_weights=True)
    except Exception:
        # Fall back to default double-buffered weight blocks if this jax build does not
        # accept pipeline_mode=pl.Buffered(1); only doubles the small weight VMEM footprint.
        return _kadapter_call(hidden, params, n_heads=n_heads,
                              single_buffer_weights=False)


# --------------------------------------------------------------- param prep ----
def prepare_params(raw):
    """One-time layout prep: W^T (in, out), 2-D biases/affines, per-block weights stacked
    along a leading (n_blocks,) axis so the kernel indexes them statically."""
    def stack(fn):
        return jnp.stack([fn(blk) for blk in raw["blocks"]], axis=0)

    return {
        "down_wt": raw["down_w"].T, "down_b": raw["down_b"].reshape(1, -1),
        "up_wt": raw["up_w"].T, "up_b": raw["up_b"].reshape(1, -1),
        "wq_t": stack(lambda b: b["wq"].T),
        "wk_t": stack(lambda b: b["wk"].T),
        "wv_t": stack(lambda b: b["wv"].T),
        "wf_t": stack(lambda b: b["wf"].T),
        "ln1_g": stack(lambda b: b["ln1_g"].reshape(1, -1)),
        "ln1_b": stack(lambda b: b["ln1_b"].reshape(1, -1)),
        "w1_t": stack(lambda b: b["w1"].T),
        "b1": stack(lambda b: b["b1"].reshape(1, -1)),
        "w2_t": stack(lambda b: b["w2"].T),
        "b2": stack(lambda b: b["b2"].reshape(1, -1)),
        "ln2_g": stack(lambda b: b["ln2_g"].reshape(1, -1)),
        "ln2_b": stack(lambda b: b["ln2_b"].reshape(1, -1)),
    }


# ---------------------------------------------------------------- reference ----
def reference_kadapter(hidden, raw, *, n_heads):
    def layer_norm(z, g, b, eps=1e-6):
        mean = jnp.mean(z, axis=-1, keepdims=True)
        var = jnp.mean((z - mean) ** 2, axis=-1, keepdims=True)
        return (z - mean) / jnp.sqrt(var + eps) * g + b

    x = jnp.einsum("bsd,od->bso", hidden, raw["down_w"]) + raw["down_b"]
    for blk in raw["blocks"]:
        B, S, D = x.shape
        d_k = D // n_heads
        q = jnp.einsum("bsd,od->bso", x, blk["wq"]).reshape(B, S, n_heads, d_k).transpose(0, 2, 1, 3)
        k = jnp.einsum("bsd,od->bso", x, blk["wk"]).reshape(B, S, n_heads, d_k).transpose(0, 2, 1, 3)
        v = jnp.einsum("bsd,od->bso", x, blk["wv"]).reshape(B, S, n_heads, d_k).transpose(0, 2, 1, 3)
        attn = jnp.einsum("bhqd,bhkd->bhqk", q, k) / math.sqrt(d_k)
        p_attn = jax.nn.softmax(attn, axis=-1)              # extended mask is identically zero
        ctx = jnp.einsum("bhqk,bhkd->bhqd", p_attn, v).transpose(0, 2, 1, 3).reshape(B, S, D)
        y = jnp.einsum("bsd,od->bso", ctx, blk["wf"])
        x = layer_norm(x + y, blk["ln1_g"], blk["ln1_b"])
        h = jnp.maximum(jnp.einsum("bsd,id->bsi", x, blk["w1"]) + blk["b1"], 0.0)
        y = jnp.einsum("bsi,di->bsd", h, blk["w2"]) + blk["b2"]
        x = layer_norm(x + y, blk["ln2_g"], blk["ln2_b"])
    up = jnp.einsum("bsd,od->bso", x, raw["up_w"]) + raw["up_b"]
    return hidden + up


def init_params(key, input_size, down_size, n_heads, dtype=jnp.float32):
    assert down_size % n_heads == 0
    d_inner = down_size * 4
    keys = iter(jax.random.split(key, 32))

    def w(shape, std=0.1):
        return jax.random.normal(next(keys), shape, dtype) * std

    raw = {
        "down_w": w((down_size, input_size)), "down_b": w((down_size,)),
        "up_w": w((input_size, down_size)), "up_b": w((input_size,)),
        "blocks": [],
    }
    for _ in range(2):
        raw["blocks"].append({
            "wq": w((down_size, down_size)), "wk": w((down_size, down_size)),
            "wv": w((down_size, down_size)), "wf": w((down_size, down_size)),
            "ln1_g": 1.0 + w((down_size,)), "ln1_b": w((down_size,)),
            "w1": w((d_inner, down_size)), "b1": w((d_inner,)),
            "w2": w((down_size, d_inner)), "b2": w((down_size,)),
            "ln2_g": 1.0 + w((down_size,)), "ln2_b": w((down_size,)),
        })
    return raw


if __name__ == "__main__":
    key = jax.random.PRNGKey(0)
    batch, seq = 2, 8
    input_size, down_size, n_heads = 64, 32, 4              # d_k = 8, d_inner = 128 (small test)

    raw = init_params(key, input_size, down_size, n_heads)
    params = prepare_params(raw)

    hidden = jax.random.normal(jax.random.fold_in(key, 12345),
                               (batch, seq, input_size), dtype=jnp.float32)

    out = kadapter_forward(hidden, params, n_heads=n_heads)
    out = jax.block_until_ready(out)

    ref = reference_kadapter(hidden, raw, n_heads=n_heads)
    assert out.shape == hidden.shape
    max_err = float(jnp.max(jnp.abs(out - ref)))
    # Tolerance allows for the EUP approximate-reciprocal softmax normalization.
    assert jnp.allclose(out, ref, atol=2e-3, rtol=2e-3), f"mismatch vs reference: {max_err}"

    print("KERNEL_OK")
</pallas_src>

<mosaic_0001>
module attributes {stable_mosaic.version = 11 : i64} {
  func.func @kadapter_kernel(%arg0: i32, %arg1: memref<1x8x64xf32, #tpu.memory_space<vmem>>, %arg2: memref<64x32xf32, #tpu.memory_space<vmem>>, %arg3: memref<1x32xf32, #tpu.memory_space<vmem>>, %arg4: memref<2x32x32xf32, #tpu.memory_space<vmem>>, %arg5: memref<2x32x32xf32, #tpu.memory_space<vmem>>, %arg6: memref<2x32x32xf32, #tpu.memory_space<vmem>>, %arg7: memref<2x32x32xf32, #tpu.memory_space<vmem>>, %arg8: memref<2x1x32xf32, #tpu.memory_space<vmem>>, %arg9: memref<2x1x32xf32, #tpu.memory_space<vmem>>, %arg10: memref<2x32x128xf32, #tpu.memory_space<vmem>>, %arg11: memref<2x1x128xf32, #tpu.memory_space<vmem>>, %arg12: memref<2x128x32xf32, #tpu.memory_space<vmem>>, %arg13: memref<2x1x32xf32, #tpu.memory_space<vmem>>, %arg14: memref<2x1x32xf32, #tpu.memory_space<vmem>>, %arg15: memref<2x1x32xf32, #tpu.memory_space<vmem>>, %arg16: memref<32x64xf32, #tpu.memory_space<vmem>>, %arg17: memref<1x64xf32, #tpu.memory_space<vmem>>, %arg18: memref<1x8x64xf32, #tpu.memory_space<vmem>>) attributes {dimension_semantics = [#tpu.dimension_semantics<parallel>], iteration_bounds = array<i64: 2>, scalar_prefetch = 0 : i64, scratch_operands = 0 : i64, tpu.core_type = #tpu.core_type<tc>, window_params = [{transform_indices = @transform_0, window_bounds = array<i64: 1, 8, 64>}, {pipeline_mode = #tpu.pipeline_mode<synchronous>, transform_indices = @transform_1, window_bounds = array<i64: 64, 32>}, {pipeline_mode = #tpu.pipeline_mode<synchronous>, transform_indices = @transform_2, window_bounds = array<i64: 1, 32>}, {pipeline_mode = #tpu.pipeline_mode<synchronous>, transform_indices = @transform_3, window_bounds = array<i64: 2, 32, 32>}, {pipeline_mode = #tpu.pipeline_mode<synchronous>, transform_indices = @transform_4, window_bounds = array<i64: 2, 32, 32>}, {pipeline_mode = #tpu.pipeline_mode<synchronous>, transform_indices = @transform_5, window_bounds = array<i64: 2, 32, 32>}, {pipeline_mode = #tpu.pipeline_mode<synchronous>, transform_indices = @transform_6, window_bounds = array<i64: 2, 32, 32>}, {pipeline_mode = #tpu.pipeline_mode<synchronous>, transform_indices = @transform_7, window_bounds = array<i64: 2, 1, 32>}, {pipeline_mode = #tpu.pipeline_mode<synchronous>, transform_indices = @transform_8, window_bounds = array<i64: 2, 1, 32>}, {pipeline_mode = #tpu.pipeline_mode<synchronous>, transform_indices = @transform_9, window_bounds = array<i64: 2, 32, 128>}, {pipeline_mode = #tpu.pipeline_mode<synchronous>, transform_indices = @transform_10, window_bounds = array<i64: 2, 1, 128>}, {pipeline_mode = #tpu.pipeline_mode<synchronous>, transform_indices = @transform_11, window_bounds = array<i64: 2, 128, 32>}, {pipeline_mode = #tpu.pipeline_mode<synchronous>, transform_indices = @transform_12, window_bounds = array<i64: 2, 1, 32>}, {pipeline_mode = #tpu.pipeline_mode<synchronous>, transform_indices = @transform_13, window_bounds = array<i64: 2, 1, 32>}, {pipeline_mode = #tpu.pipeline_mode<synchronous>, transform_indices = @transform_14, window_bounds = array<i64: 2, 1, 32>}, {pipeline_mode = #tpu.pipeline_mode<synchronous>, transform_indices = @transform_15, window_bounds = array<i64: 32, 64>}, {pipeline_mode = #tpu.pipeline_mode<synchronous>, transform_indices = @transform_16, window_bounds = array<i64: 1, 64>}, {transform_indices = @transform_17, window_bounds = array<i64: 1, 8, 64>}]} {
    %c0 = arith.constant 0 : index
    %c0_0 = arith.constant 0 : index
    %c0_1 = arith.constant 0 : index
    %0 = vector.load %arg1[%c0, %c0_0, %c0_1] : memref<1x8x64xf32, #tpu.memory_space<vmem>>, vector<1x8x64xf32>
    %1 = vector.shape_cast %0 : vector<1x8x64xf32> to vector<8x64xf32>
    %c0_2 = arith.constant 0 : index
    %c0_3 = arith.constant 0 : index
    %2 = vector.load %arg2[%c0_2, %c0_3] : memref<64x32xf32, #tpu.memory_space<vmem>>, vector<64x32xf32>
    %cst = arith.constant dense<0.000000e+00> : vector<8x32xf32>
    %3 = tpu.matmul %1, %2, %cst {dimension_numbers = #tpu.dot_dimension_numbers<[1], [0], [0], [1], [0, 0, 1, 1], [], []>} : vector<8x64xf32>, vector<64x32xf32>, vector<8x32xf32> -> vector<8x32xf32>
    %c0_4 = arith.constant 0 : index
    %c0_5 = arith.constant 0 : index
    %4 = vector.load %arg3[%c0_4, %c0_5] : memref<1x32xf32, #tpu.memory_space<vmem>>, vector<1x32xf32>
    %5 = vector.broadcast %4 : vector<1x32xf32> to vector<8x32xf32>
    %6 = arith.addf %3, %5 : vector<8x32xf32>
    %c0_6 = arith.constant 0 : index
    %c0_7 = arith.constant 0 : index
    %c0_8 = arith.constant 0 : index
    %7 = vector.load %arg4[%c0_6, %c0_7, %c0_8] : memref<2x32x32xf32, #tpu.memory_space<vmem>>, vector<1x32x32xf32>
    %8 = vector.shape_cast %7 : vector<1x32x32xf32> to vector<32x32xf32>
    %cst_9 = arith.constant dense<0.000000e+00> : vector<8x32xf32>
    %9 = tpu.matmul %6, %8, %cst_9 {dimension_numbers = #tpu.dot_dimension_numbers<[1], [0], [0], [1], [0, 0, 1, 1], [], []>} : vector<8x32xf32>, vector<32x32xf32>, vector<8x32xf32> -> vector<8x32xf32>
    %c0_10 = arith.constant 0 : index
    %c0_11 = arith.constant 0 : index
    %c0_12 = arith.constant 0 : index
    %10 = vector.load %arg5[%c0_10, %c0_11, %c0_12] : memref<2x32x32xf32, #tpu.memory_space<vmem>>, vector<1x32x32xf32>
    %11 = vector.shape_cast %10 : vector<1x32x32xf32> to vector<32x32xf32>
    %cst_13 = arith.constant dense<0.000000e+00> : vector<8x32xf32>
    %12 = tpu.matmul %6, %11, %cst_13 {dimension_numbers = #tpu.dot_dimension_numbers<[1], [0], [0], [1], [0, 0, 1, 1], [], []>} : vector<8x32xf32>, vector<32x32xf32>, vector<8x32xf32> -> vector<8x32xf32>
    %c0_14 = arith.constant 0 : index
    %c0_15 = arith.constant 0 : index
    %c0_16 = arith.constant 0 : index
    %13 = vector.load %arg6[%c0_14, %c0_15, %c0_16] : memref<2x32x32xf32, #tpu.memory_space<vmem>>, vector<1x32x32xf32>
    %14 = vector.shape_cast %13 : vector<1x32x32xf32> to vector<32x32xf32>
    %cst_17 = arith.constant dense<0.000000e+00> : vector<8x32xf32>
    %15 = tpu.matmul %6, %14, %cst_17 {dimension_numbers = #tpu.dot_dimension_numbers<[1], [0], [0], [1], [0, 0, 1, 1], [], []>} : vector<8x32xf32>, vector<32x32xf32>, vector<8x32xf32> -> vector<8x32xf32>
    %16 = vector.extract_strided_slice %9 {offsets = [0, 0], sizes = [8, 8], strides = [1, 1]} : vector<8x32xf32> to vector<8x8xf32>
    %17 = vector.extract_strided_slice %9 {offsets = [0, 8], sizes = [8, 8], strides = [1, 1]} : vector<8x32xf32> to vector<8x8xf32>
    %18 = vector.extract_strided_slice %9 {offsets = [0, 16], sizes = [8, 8], strides = [1, 1]} : vector<8x32xf32> to vector<8x8xf32>
    %19 = vector.extract_strided_slice %9 {offsets = [0, 24], sizes = [8, 8], strides = [1, 1]} : vector<8x32xf32> to vector<8x8xf32>
    %20 = vector.shape_cast %16 : vector<8x8xf32> to vector<1x8x8xf32>
    %21 = vector.shape_cast %17 : vector<8x8xf32> to vector<1x8x8xf32>
    %22 = vector.shape_cast %18 : vector<8x8xf32> to vector<1x8x8xf32>
    %23 = vector.shape_cast %19 : vector<8x8xf32> to vector<1x8x8xf32>
    %24 = tpu.concatenate %20, %21, %22, %23 in 0 : vector<1x8x8xf32>, vector<1x8x8xf32>, vector<1x8x8xf32>, vector<1x8x8xf32> -> vector<4x8x8xf32>
    %25 = vector.extract_strided_slice %12 {offsets = [0, 0], sizes = [8, 8], strides = [1, 1]} : vector<8x32xf32> to vector<8x8xf32>
    %26 = vector.extract_strided_slice %12 {offsets = [0, 8], sizes = [8, 8], strides = [1, 1]} : vector<8x32xf32> to vector<8x8xf32>
    %27 = vector.extract_strided_slice %12 {offsets = [0, 16], sizes = [8, 8], strides = [1, 1]} : vector<8x32xf32> to vector<8x8xf32>
    %28 = vector.extract_strided_slice %12 {offsets = [0, 24], sizes = [8, 8], strides = [1, 1]} : vector<8x32xf32> to vector<8x8xf32>
    %29 = vector.shape_cast %25 : vector<8x8xf32> to vector<1x8x8xf32>
    %30 = vector.shape_cast %26 : vector<8x8xf32> to vector<1x8x8xf32>
    %31 = vector.shape_cast %27 : vector<8x8xf32> to vector<1x8x8xf32>
    %32 = vector.shape_cast %28 : vector<8x8xf32> to vector<1x8x8xf32>
    %33 = tpu.concatenate %29, %30, %31, %32 in 0 : vector<1x8x8xf32>, vector<1x8x8xf32>, vector<1x8x8xf32>, vector<1x8x8xf32> -> vector<4x8x8xf32>
    %34 = vector.extract_strided_slice %15 {offsets = [0, 0], sizes = [8, 8], strides = [1, 1]} : vector<8x32xf32> to vector<8x8xf32>
    %35 = vector.extract_strided_slice %15 {offsets = [0, 8], sizes = [8, 8], strides = [1, 1]} : vector<8x32xf32> to vector<8x8xf32>
    %36 = vector.extract_strided_slice %15 {offsets = [0, 16], sizes = [8, 8], strides = [1, 1]} : vector<8x32xf32> to vector<8x8xf32>
    %37 = vector.extract_strided_slice %15 {offsets = [0, 24], sizes = [8, 8], strides = [1, 1]} : vector<8x32xf32> to vector<8x8xf32>
    %38 = vector.shape_cast %34 : vector<8x8xf32> to vector<1x8x8xf32>
    %39 = vector.shape_cast %35 : vector<8x8xf32> to vector<1x8x8xf32>
    %40 = vector.shape_cast %36 : vector<8x8xf32> to vector<1x8x8xf32>
    %41 = vector.shape_cast %37 : vector<8x8xf32> to vector<1x8x8xf32>
    %42 = tpu.concatenate %38, %39, %40, %41 in 0 : vector<1x8x8xf32>, vector<1x8x8xf32>, vector<1x8x8xf32>, vector<1x8x8xf32> -> vector<4x8x8xf32>
    "tpu.trace_start"() <{level = 10 : i32, message = "hqd,hkd->hqk"}> : () -> ()
    %cst_18 = arith.constant dense<0.000000e+00> : vector<4x8x8xf32>
    %43 = tpu.matmul %24, %33, %cst_18 {dimension_numbers = #tpu.dot_dimension_numbers<[2], [2], [1], [1], [0, 0, 0, 1, 1, 1], [0], [0]>} : vector<4x8x8xf32>, vector<4x8x8xf32>, vector<4x8x8xf32> -> vector<4x8x8xf32>
    "tpu.trace_stop"() : () -> ()
    %cst_19 = arith.constant 0.353553385 : f32
    %44 = vector.broadcast %cst_19 : f32 to vector<4x8x8xf32>
    %45 = arith.mulf %43, %44 : vector<4x8x8xf32>
    %cst_20 = arith.constant dense<0xFF800000> : vector<4x8xf32>
    %46 = vector.multi_reduction <maximumf>, %45, %cst_20 [2] : vector<4x8x8xf32> to vector<4x8xf32>
    %47 = vector.shape_cast %46 : vector<4x8xf32> to vector<4x8x1xf32>
    %48 = vector.broadcast %47 : vector<4x8x1xf32> to vector<4x8x8xf32>
    %49 = arith.subf %45, %48 : vector<4x8x8xf32>
    %50 = math.exp %49 : vector<4x8x8xf32>
    %cst_21 = arith.constant dense<0.000000e+00> : vector<4x8xf32>
    %51 = vector.multi_reduction <add>, %50, %cst_21 [2] : vector<4x8x8xf32> to vector<4x8xf32>
    %52 = vector.shape_cast %51 : vector<4x8xf32> to vector<4x8x1xf32>
    %53 = tpu.reciprocal %52 {approx = true} : vector<4x8x1xf32> -> vector<4x8x1xf32>
    %54 = vector.broadcast %53 : vector<4x8x1xf32> to vector<4x8x8xf32>
    %55 = arith.mulf %50, %54 : vector<4x8x8xf32>
    "tpu.trace_start"() <{level = 10 : i32, message = "hqk,hkd->hqd"}> : () -> ()
    %cst_22 = arith.constant dense<0.000000e+00> : vector<4x8x8xf32>
    %56 = tpu.matmul %55, %42, %cst_22 {dimension_numbers = #tpu.dot_dimension_numbers<[2], [1], [1], [2], [0, 0, 0, 1, 1, 2], [0], [0]>} : vector<4x8x8xf32>, vector<4x8x8xf32>, vector<4x8x8xf32> -> vector<4x8x8xf32>
    "tpu.trace_stop"() : () -> ()
    %c0_23 = arith.constant 0 : index
    %c0_24 = arith.constant 0 : index
    %c0_25 = arith.constant 0 : index
    %57 = vector.load %arg7[%c0_23, %c0_24, %c0_25] : memref<2x32x32xf32, #tpu.memory_space<vmem>>, vector<1x32x32xf32>
    %58 = vector.shape_cast %57 : vector<1x32x32xf32> to vector<32x32xf32>
    %cst_26 = arith.constant 0.000000e+00 : f32
    %59 = vector.broadcast %cst_26 : f32 to vector<8x32xf32>
    %60 = vector.extract_strided_slice %56 {offsets = [0, 0, 0], sizes = [1, 8, 8], strides = [1, 1, 1]} : vector<4x8x8xf32> to vector<1x8x8xf32>
    %61 = vector.shape_cast %60 : vector<1x8x8xf32> to vector<8x8xf32>
    %62 = vector.extract_strided_slice %58 {offsets = [0, 0], sizes = [8, 32], strides = [1, 1]} : vector<32x32xf32> to vector<8x32xf32>
    %cst_27 = arith.constant dense<0.000000e+00> : vector<8x32xf32>
    %63 = tpu.matmul %61, %62, %cst_27 {dimension_numbers = #tpu.dot_dimension_numbers<[1], [0], [0], [1], [0, 0, 1, 1], [], []>} : vector<8x8xf32>, vector<8x32xf32>, vector<8x32xf32> -> vector<8x32xf32>
    %64 = arith.addf %59, %63 : vector<8x32xf32>
    %65 = vector.extract_strided_slice %56 {offsets = [1, 0, 0], sizes = [1, 8, 8], strides = [1, 1, 1]} : vector<4x8x8xf32> to vector<1x8x8xf32>
    %66 = vector.shape_cast %65 : vector<1x8x8xf32> to vector<8x8xf32>
    %67 = vector.extract_strided_slice %58 {offsets = [8, 0], sizes = [8, 32], strides = [1, 1]} : vector<32x32xf32> to vector<8x32xf32>
    %cst_28 = arith.constant dense<0.000000e+00> : vector<8x32xf32>
    %68 = tpu.matmul %66, %67, %cst_28 {dimension_numbers = #tpu.dot_dimension_numbers<[1], [0], [0], [1], [0, 0, 1, 1], [], []>} : vector<8x8xf32>, vector<8x32xf32>, vector<8x32xf32> -> vector<8x32xf32>
    %69 = arith.addf %64, %68 : vector<8x32xf32>
    %70 = vector.extract_strided_slice %56 {offsets = [2, 0, 0], sizes = [1, 8, 8], strides = [1, 1, 1]} : vector<4x8x8xf32> to vector<1x8x8xf32>
    %71 = vector.shape_cast %70 : vector<1x8x8xf32> to vector<8x8xf32>
    %72 = vector.extract_strided_slice %58 {offsets = [16, 0], sizes = [8, 32], strides = [1, 1]} : vector<32x32xf32> to vector<8x32xf32>
    %cst_29 = arith.constant dense<0.000000e+00> : vector<8x32xf32>
    %73 = tpu.matmul %71, %72, %cst_29 {dimension_numbers = #tpu.dot_dimension_numbers<[1], [0], [0], [1], [0, 0, 1, 1], [], []>} : vector<8x8xf32>, vector<8x32xf32>, vector<8x32xf32> -> vector<8x32xf32>
    %74 = arith.addf %69, %73 : vector<8x32xf32>
    %75 = vector.extract_strided_slice %56 {offsets = [3, 0, 0], sizes = [1, 8, 8], strides = [1, 1, 1]} : vector<4x8x8xf32> to vector<1x8x8xf32>
    %76 = vector.shape_cast %75 : vector<1x8x8xf32> to vector<8x8xf32>
    %77 = vector.extract_strided_slice %58 {offsets = [24, 0], sizes = [8, 32], strides = [1, 1]} : vector<32x32xf32> to vector<8x32xf32>
    %cst_30 = arith.constant dense<0.000000e+00> : vector<8x32xf32>
    %78 = tpu.matmul %76, %77, %cst_30 {dimension_numbers = #tpu.dot_dimension_numbers<[1], [0], [0], [1], [0, 0, 1, 1], [], []>} : vector<8x8xf32>, vector<8x32xf32>, vector<8x32xf32> -> vector<8x32xf32>
    %79 = arith.addf %74, %78 : vector<8x32xf32>
    %80 = arith.addf %6, %79 : vector<8x32xf32>
    %c0_31 = arith.constant 0 : index
    %c0_32 = arith.constant 0 : index
    %c0_33 = arith.constant 0 : index
    %81 = vector.load %arg8[%c0_31, %c0_32, %c0_33] : memref<2x1x32xf32, #tpu.memory_space<vmem>>, vector<1x1x32xf32>
    %82 = vector.shape_cast %81 : vector<1x1x32xf32> to vector<1x32xf32>
    %c0_34 = arith.constant 0 : index
    %c0_35 = arith.constant 0 : index
    %c0_36 = arith.constant 0 : index
    %83 = vector.load %arg9[%c0_34, %c0_35, %c0_36] : memref<2x1x32xf32, #tpu.memory_space<vmem>>, vector<1x1x32xf32>
    %84 = vector.shape_cast %83 : vector<1x1x32xf32> to vector<1x32xf32>
    %cst_37 = arith.constant dense<0.000000e+00> : vector<8xf32>
    %85 = vector.multi_reduction <add>, %80, %cst_37 [1] : vector<8x32xf32> to vector<8xf32>
    %86 = vector.shape_cast %85 : vector<8xf32> to vector<8x1xf32>
    %cst_38 = arith.constant 3.200000e+01 : f32
    %87 = vector.broadcast %cst_38 : f32 to vector<8x1xf32>
    %88 = arith.divf %86, %87 : vector<8x1xf32>
    %89 = vector.broadcast %88 : vector<8x1xf32> to vector<8x32xf32>
    %90 = arith.subf %80, %89 : vector<8x32xf32>
    %91 = vector.broadcast %88 : vector<8x1xf32> to vector<8x32xf32>
    %92 = arith.subf %80, %91 : vector<8x32xf32>
    %93 = arith.mulf %90, %92 : vector<8x32xf32>
    %cst_39 = arith.constant dense<0.000000e+00> : vector<8xf32>
    %94 = vector.multi_reduction <add>, %93, %cst_39 [1] : vector<8x32xf32> to vector<8xf32>
    %95 = vector.shape_cast %94 : vector<8xf32> to vector<8x1xf32>
    %cst_40 = arith.constant 3.200000e+01 : f32
    %96 = vector.broadcast %cst_40 : f32 to vector<8x1xf32>
    %97 = arith.divf %95, %96 : vector<8x1xf32>
    %98 = vector.broadcast %88 : vector<8x1xf32> to vector<8x32xf32>
    %99 = arith.subf %80, %98 : vector<8x32xf32>
    %cst_41 = arith.constant 9.99999997E-7 : f32
    %100 = vector.broadcast %cst_41 : f32 to vector<8x1xf32>
    %101 = arith.addf %97, %100 : vector<8x1xf32>
    %102 = math.rsqrt %101 : vector<8x1xf32>
    %103 = vector.broadcast %102 : vector<8x1xf32> to vector<8x32xf32>
    %104 = arith.mulf %99, %103 : vector<8x32xf32>
    %105 = vector.broadcast %82 : vector<1x32xf32> to vector<8x32xf32>
    %106 = arith.mulf %104, %105 : vector<8x32xf32>
    %107 = vector.broadcast %84 : vector<1x32xf32> to vector<8x32xf32>
    %108 = arith.addf %106, %107 : vector<8x32xf32>
    %c0_42 = arith.constant 0 : index
    %c0_43 = arith.constant 0 : index
    %c0_44 = arith.constant 0 : index
    %109 = vector.load %arg10[%c0_42, %c0_43, %c0_44] : memref<2x32x128xf32, #tpu.memory_space<vmem>>, vector<1x32x128xf32>
    %110 = vector.shape_cast %109 : vector<1x32x128xf32> to vector<32x128xf32>
    %cst_45 = arith.constant dense<0.000000e+00> : vector<8x128xf32>
    %111 = tpu.matmul %108, %110, %cst_45 {dimension_numbers = #tpu.dot_dimension_numbers<[1], [0], [0], [1], [0, 0, 1, 1], [], []>} : vector<8x32xf32>, vector<32x128xf32>, vector<8x128xf32> -> vector<8x128xf32>
    %c0_46 = arith.constant 0 : index
    %c0_47 = arith.constant 0 : index
    %c0_48 = arith.constant 0 : index
    %112 = vector.load %arg11[%c0_46, %c0_47, %c0_48] : memref<2x1x128xf32, #tpu.memory_space<vmem>>, vector<1x1x128xf32>
    %113 = vector.shape_cast %112 : vector<1x1x128xf32> to vector<1x128xf32>
    %114 = vector.broadcast %113 : vector<1x128xf32> to vector<8x128xf32>
    %115 = arith.addf %111, %114 : vector<8x128xf32>
    %cst_49 = arith.constant 0.000000e+00 : f32
    %116 = vector.broadcast %cst_49 : f32 to vector<8x128xf32>
    %117 = arith.maximumf %115, %116 : vector<8x128xf32>
    %c0_50 = arith.constant 0 : index
    %c0_51 = arith.constant 0 : index
    %c0_52 = arith.constant 0 : index
    %118 = vector.load %arg12[%c0_50, %c0_51, %c0_52] : memref<2x128x32xf32, #tpu.memory_space<vmem>>, vector<1x128x32xf32>
    %119 = vector.shape_cast %118 : vector<1x128x32xf32> to vector<128x32xf32>
    %cst_53 = arith.constant dense<0.000000e+00> : vector<8x32xf32>
    %120 = tpu.matmul %117, %119, %cst_53 {dimension_numbers = #tpu.dot_dimension_numbers<[1], [0], [0], [1], [0, 0, 1, 1], [], []>} : vector<8x128xf32>, vector<128x32xf32>, vector<8x32xf32> -> vector<8x32xf32>
    %c0_54 = arith.constant 0 : index
    %c0_55 = arith.constant 0 : index
    %c0_56 = arith.constant 0 : index
    %121 = vector.load %arg13[%c0_54, %c0_55, %c0_56] : memref<2x1x32xf32, #tpu.memory_space<vmem>>, vector<1x1x32xf32>
    %122 = vector.shape_cast %121 : vector<1x1x32xf32> to vector<1x32xf32>
    %123 = vector.broadcast %122 : vector<1x32xf32> to vector<8x32xf32>
    %124 = arith.addf %120, %123 : vector<8x32xf32>
    %125 = arith.addf %108, %124 : vector<8x32xf32>
    %c0_57 = arith.constant 0 : index
    %c0_58 = arith.constant 0 : index
    %c0_59 = arith.constant 0 : index
    %126 = vector.load %arg14[%c0_57, %c0_58, %c0_59] : memref<2x1x32xf32, #tpu.memory_space<vmem>>, vector<1x1x32xf32>
    %127 = vector.shape_cast %126 : vector<1x1x32xf32> to vector<1x32xf32>
    %c0_60 = arith.constant 0 : index
    %c0_61 = arith.constant 0 : index
    %c0_62 = arith.constant 0 : index
    %128 = vector.load %arg15[%c0_60, %c0_61, %c0_62] : memref<2x1x32xf32, #tpu.memory_space<vmem>>, vector<1x1x32xf32>
    %129 = vector.shape_cast %128 : vector<1x1x32xf32> to vector<1x32xf32>
    %cst_63 = arith.constant dense<0.000000e+00> : vector<8xf32>
    %130 = vector.multi_reduction <add>, %125, %cst_63 [1] : vector<8x32xf32> to vector<8xf32>
    %131 = vector.shape_cast %130 : vector<8xf32> to vector<8x1xf32>
    %cst_64 = arith.constant 3.200000e+01 : f32
    %132 = vector.broadcast %cst_64 : f32 to vector<8x1xf32>
    %133 = arith.divf %131, %132 : vector<8x1xf32>
    %134 = vector.broadcast %133 : vector<8x1xf32> to vector<8x32xf32>
    %135 = arith.subf %125, %134 : vector<8x32xf32>
    %136 = vector.broadcast %133 : vector<8x1xf32> to vector<8x32xf32>
    %137 = arith.subf %125, %136 : vector<8x32xf32>
    %138 = arith.mulf %135, %137 : vector<8x32xf32>
    %cst_65 = arith.constant dense<0.000000e+00> : vector<8xf32>
    %139 = vector.multi_reduction <add>, %138, %cst_65 [1] : vector<8x32xf32> to vector<8xf32>
    %140 = vector.shape_cast %139 : vector<8xf32> to vector<8x1xf32>
    %cst_66 = arith.constant 3.200000e+01 : f32
    %141 = vector.broadcast %cst_66 : f32 to vector<8x1xf32>
    %142 = arith.divf %140, %141 : vector<8x1xf32>
    %143 = vector.broadcast %133 : vector<8x1xf32> to vector<8x32xf32>
    %144 = arith.subf %125, %143 : vector<8x32xf32>
    %cst_67 = arith.constant 9.99999997E-7 : f32
    %145 = vector.broadcast %cst_67 : f32 to vector<8x1xf32>
    %146 = arith.addf %142, %145 : vector<8x1xf32>
    %147 = math.rsqrt %146 : vector<8x1xf32>
    %148 = vector.broadcast %147 : vector<8x1xf32> to vector<8x32xf32>
    %149 = arith.mulf %144, %148 : vector<8x32xf32>
    %150 = vector.broadcast %127 : vector<1x32xf32> to vector<8x32xf32>
    %151 = arith.mulf %149, %150 : vector<8x32xf32>
    %152 = vector.broadcast %129 : vector<1x32xf32> to vector<8x32xf32>
    %153 = arith.addf %151, %152 : vector<8x32xf32>
    %c1 = arith.constant 1 : index
    %c0_68 = arith.constant 0 : index
    %c0_69 = arith.constant 0 : index
    %154 = vector.load %arg4[%c1, %c0_68, %c0_69] : memref<2x32x32xf32, #tpu.memory_space<vmem>>, vector<1x32x32xf32>
    %155 = vector.shape_cast %154 : vector<1x32x32xf32> to vector<32x32xf32>
    %cst_70 = arith.constant dense<0.000000e+00> : vector<8x32xf32>
    %156 = tpu.matmul %153, %155, %cst_70 {dimension_numbers = #tpu.dot_dimension_numbers<[1], [0], [0], [1], [0, 0, 1, 1], [], []>} : vector<8x32xf32>, vector<32x32xf32>, vector<8x32xf32> -> vector<8x32xf32>
    %c1_71 = arith.constant 1 : index
    %c0_72 = arith.constant 0 : index
    %c0_73 = arith.constant 0 : index
    %157 = vector.load %arg5[%c1_71, %c0_72, %c0_73] : memref<2x32x32xf32, #tpu.memory_space<vmem>>, vector<1x32x32xf32>
    %158 = vector.shape_cast %157 : vector<1x32x32xf32> to vector<32x32xf32>
    %cst_74 = arith.constant dense<0.000000e+00> : vector<8x32xf32>
    %159 = tpu.matmul %153, %158, %cst_74 {dimension_numbers = #tpu.dot_dimension_numbers<[1], [0], [0], [1], [0, 0, 1, 1], [], []>} : vector<8x32xf32>, vector<32x32xf32>, vector<8x32xf32> -> vector<8x32xf32>
    %c1_75 = arith.constant 1 : index
    %c0_76 = arith.constant 0 : index
    %c0_77 = arith.constant 0 : index
    %160 = vector.load %arg6[%c1_75, %c0_76, %c0_77] : memref<2x32x32xf32, #tpu.memory_space<vmem>>, vector<1x32x32xf32>
    %161 = vector.shape_cast %160 : vector<1x32x32xf32> to vector<32x32xf32>
    %cst_78 = arith.constant dense<0.000000e+00> : vector<8x32xf32>
    %162 = tpu.matmul %153, %161, %cst_78 {dimension_numbers = #tpu.dot_dimension_numbers<[1], [0], [0], [1], [0, 0, 1, 1], [], []>} : vector<8x32xf32>, vector<32x32xf32>, vector<8x32xf32> -> vector<8x32xf32>
    %163 = vector.extract_strided_slice %156 {offsets = [0, 0], sizes = [8, 8], strides = [1, 1]} : vector<8x32xf32> to vector<8x8xf32>
    %164 = vector.extract_strided_slice %156 {offsets = [0, 8], sizes = [8, 8], strides = [1, 1]} : vector<8x32xf32> to vector<8x8xf32>
    %165 = vector.extract_strided_slice %156 {offsets = [0, 16], sizes = [8, 8], strides = [1, 1]} : vector<8x32xf32> to vector<8x8xf32>
    %166 = vector.extract_strided_slice %156 {offsets = [0, 24], sizes = [8, 8], strides = [1, 1]} : vector<8x32xf32> to vector<8x8xf32>
    %167 = vector.shape_cast %163 : vector<8x8xf32> to vector<1x8x8xf32>
    %168 = vector.shape_cast %164 : vector<8x8xf32> to vector<1x8x8xf32>
    %169 = vector.shape_cast %165 : vector<8x8xf32> to vector<1x8x8xf32>
    %170 = vector.shape_cast %166 : vector<8x8xf32> to vector<1x8x8xf32>
    %171 = tpu.concatenate %167, %168, %169, %170 in 0 : vector<1x8x8xf32>, vector<1x8x8xf32>, vector<1x8x8xf32>, vector<1x8x8xf32> -> vector<4x8x8xf32>
    %172 = vector.extract_strided_slice %159 {offsets = [0, 0], sizes = [8, 8], strides = [1, 1]} : vector<8x32xf32> to vector<8x8xf32>
    %173 = vector.extract_strided_slice %159 {offsets = [0, 8], sizes = [8, 8], strides = [1, 1]} : vector<8x32xf32> to vector<8x8xf32>
    %174 = vector.extract_strided_slice %159 {offsets = [0, 16], sizes = [8, 8], strides = [1, 1]} : vector<8x32xf32> to vector<8x8xf32>
    %175 = vector.extract_strided_slice %159 {offsets = [0, 24], sizes = [8, 8], strides = [1, 1]} : vector<8x32xf32> to vector<8x8xf32>
    %176 = vector.shape_cast %172 : vector<8x8xf32> to vector<1x8x8xf32>
    %177 = vector.shape_cast %173 : vector<8x8xf32> to vector<1x8x8xf32>
    %178 = vector.shape_cast %174 : vector<8x8xf32> to vector<1x8x8xf32>
    %179 = vector.shape_cast %175 : vector<8x8xf32> to vector<1x8x8xf32>
    %180 = tpu.concatenate %176, %177, %178, %179 in 0 : vector<1x8x8xf32>, vector<1x8x8xf32>, vector<1x8x8xf32>, vector<1x8x8xf32> -> vector<4x8x8xf32>
    %181 = vector.extract_strided_slice %162 {offsets = [0, 0], sizes = [8, 8], strides = [1, 1]} : vector<8x32xf32> to vector<8x8xf32>
    %182 = vector.extract_strided_slice %162 {offsets = [0, 8], sizes = [8, 8], strides = [1, 1]} : vector<8x32xf32> to vector<8x8xf32>
    %183 = vector.extract_strided_slice %162 {offsets = [0, 16], sizes = [8, 8], strides = [1, 1]} : vector<8x32xf32> to vector<8x8xf32>
    %184 = vector.extract_strided_slice %162 {offsets = [0, 24], sizes = [8, 8], strides = [1, 1]} : vector<8x32xf32> to vector<8x8xf32>
    %185 = vector.shape_cast %181 : vector<8x8xf32> to vector<1x8x8xf32>
    %186 = vector.shape_cast %182 : vector<8x8xf32> to vector<1x8x8xf32>
    %187 = vector.shape_cast %183 : vector<8x8xf32> to vector<1x8x8xf32>
    %188 = vector.shape_cast %184 : vector<8x8xf32> to vector<1x8x8xf32>
    %189 = tpu.concatenate %185, %186, %187, %188 in 0 : vector<1x8x8xf32>, vector<1x8x8xf32>, vector<1x8x8xf32>, vector<1x8x8xf32> -> vector<4x8x8xf32>
    "tpu.trace_start"() <{level = 10 : i32, message = "hqd,hkd->hqk"}> : () -> ()
    %cst_79 = arith.constant dense<0.000000e+00> : vector<4x8x8xf32>
    %190 = tpu.matmul %171, %180, %cst_79 {dimension_numbers = #tpu.dot_dimension_numbers<[2], [2], [1], [1], [0, 0, 0, 1, 1, 1], [0], [0]>} : vector<4x8x8xf32>, vector<4x8x8xf32>, vector<4x8x8xf32> -> vector<4x8x8xf32>
    "tpu.trace_stop"() : () -> ()
    %cst_80 = arith.constant 0.353553385 : f32
    %191 = vector.broadcast %cst_80 : f32 to vector<4x8x8xf32>
    %192 = arith.mulf %190, %191 : vector<4x8x8xf32>
    %cst_81 = arith.constant dense<0xFF800000> : vector<4x8xf32>
    %193 = vector.multi_reduction <maximumf>, %192, %cst_81 [2] : vector<4x8x8xf32> to vector<4x8xf32>
    %194 = vector.shape_cast %193 : vector<4x8xf32> to vector<4x8x1xf32>
    %195 = vector.broadcast %194 : vector<4x8x1xf32> to vector<4x8x8xf32>
    %196 = arith.subf %192, %195 : vector<4x8x8xf32>
    %197 = math.exp %196 : vector<4x8x8xf32>
    %cst_82 = arith.constant dense<0.000000e+00> : vector<4x8xf32>
    %198 = vector.multi_reduction <add>, %197, %cst_82 [2] : vector<4x8x8xf32> to vector<4x8xf32>
    %199 = vector.shape_cast %198 : vector<4x8xf32> to vector<4x8x1xf32>
    %200 = tpu.reciprocal %199 {approx = true} : vector<4x8x1xf32> -> vector<4x8x1xf32>
    %201 = vector.broadcast %200 : vector<4x8x1xf32> to vector<4x8x8xf32>
    %202 = arith.mulf %197, %201 : vector<4x8x8xf32>
    "tpu.trace_start"() <{level = 10 : i32, message = "hqk,hkd->hqd"}> : () -> ()
    %cst_83 = arith.constant dense<0.000000e+00> : vector<4x8x8xf32>
    %203 = tpu.matmul %202, %189, %cst_83 {dimension_numbers = #tpu.dot_dimension_numbers<[2], [1], [1], [2], [0, 0, 0, 1, 1, 2], [0], [0]>} : vector<4x8x8xf32>, vector<4x8x8xf32>, vector<4x8x8xf32> -> vector<4x8x8xf32>
    "tpu.trace_stop"() : () -> ()
    %c1_84 = arith.constant 1 : index
    %c0_85 = arith.constant 0 : index
    %c0_86 = arith.constant 0 : index
    %204 = vector.load %arg7[%c1_84, %c0_85, %c0_86] : memref<2x32x32xf32, #tpu.memory_space<vmem>>, vector<1x32x32xf32>
    %205 = vector.shape_cast %204 : vector<1x32x32xf32> to vector<32x32xf32>
    %cst_87 = arith.constant 0.000000e+00 : f32
    %206 = vector.broadcast %cst_87 : f32 to vector<8x32xf32>
    %207 = vector.extract_strided_slice %203 {offsets = [0, 0, 0], sizes = [1, 8, 8], strides = [1, 1, 1]} : vector<4x8x8xf32> to vector<1x8x8xf32>
    %208 = vector.shape_cast %207 : vector<1x8x8xf32> to vector<8x8xf32>
    %209 = vector.extract_strided_slice %205 {offsets = [0, 0], sizes = [8, 32], strides = [1, 1]} : vector<32x32xf32> to vector<8x32xf32>
    %cst_88 = arith.constant dense<0.000000e+00> : vector<8x32xf32>
    %210 = tpu.matmul %208, %209, %cst_88 {dimension_numbers = #tpu.dot_dimension_numbers<[1], [0], [0], [1], [0, 0, 1, 1], [], []>} : vector<8x8xf32>, vector<8x32xf32>, vector<8x32xf32> -> vector<8x32xf32>
    %211 = arith.addf %206, %210 : vector<8x32xf32>
    %212 = vector.extract_strided_slice %203 {offsets = [1, 0, 0], sizes = [1, 8, 8], strides = [1, 1, 1]} : vector<4x8x8xf32> to vector<1x8x8xf32>
    %213 = vector.shape_cast %212 : vector<1x8x8xf32> to vector<8x8xf32>
    %214 = vector.extract_strided_slice %205 {offsets = [8, 0], sizes = [8, 32], strides = [1, 1]} : vector<32x32xf32> to vector<8x32xf32>
    %cst_89 = arith.constant dense<0.000000e+00> : vector<8x32xf32>
    %215 = tpu.matmul %213, %214, %cst_89 {dimension_numbers = #tpu.dot_dimension_numbers<[1], [0], [0], [1], [0, 0, 1, 1], [], []>} : vector<8x8xf32>, vector<8x32xf32>, vector<8x32xf32> -> vector<8x32xf32>
    %216 = arith.addf %211, %215 : vector<8x32xf32>
    %217 = vector.extract_strided_slice %203 {offsets = [2, 0, 0], sizes = [1, 8, 8], strides = [1, 1, 1]} : vector<4x8x8xf32> to vector<1x8x8xf32>
    %218 = vector.shape_cast %217 : vector<1x8x8xf32> to vector<8x8xf32>
    %219 = vector.extract_strided_slice %205 {offsets = [16, 0], sizes = [8, 32], strides = [1, 1]} : vector<32x32xf32> to vector<8x32xf32>
    %cst_90 = arith.constant dense<0.000000e+00> : vector<8x32xf32>
    %220 = tpu.matmul %218, %219, %cst_90 {dimension_numbers = #tpu.dot_dimension_numbers<[1], [0], [0], [1], [0, 0, 1, 1], [], []>} : vector<8x8xf32>, vector<8x32xf32>, vector<8x32xf32> -> vector<8x32xf32>
    %221 = arith.addf %216, %220 : vector<8x32xf32>
    %222 = vector.extract_strided_slice %203 {offsets = [3, 0, 0], sizes = [1, 8, 8], strides = [1, 1, 1]} : vector<4x8x8xf32> to vector<1x8x8xf32>
    %223 = vector.shape_cast %222 : vector<1x8x8xf32> to vector<8x8xf32>
    %224 = vector.extract_strided_slice %205 {offsets = [24, 0], sizes = [8, 32], strides = [1, 1]} : vector<32x32xf32> to vector<8x32xf32>
    %cst_91 = arith.constant dense<0.000000e+00> : vector<8x32xf32>
    %225 = tpu.matmul %223, %224, %cst_91 {dimension_numbers = #tpu.dot_dimension_numbers<[1], [0], [0], [1], [0, 0, 1, 1], [], []>} : vector<8x8xf32>, vector<8x32xf32>, vector<8x32xf32> -> vector<8x32xf32>
    %226 = arith.addf %221, %225 : vector<8x32xf32>
    %227 = arith.addf %153, %226 : vector<8x32xf32>
    %c1_92 = arith.constant 1 : index
    %c0_93 = arith.constant 0 : index
    %c0_94 = arith.constant 0 : index
    %228 = vector.load %arg8[%c1_92, %c0_93, %c0_94] : memref<2x1x32xf32, #tpu.memory_space<vmem>>, vector<1x1x32xf32>
    %229 = vector.shape_cast %228 : vector<1x1x32xf32> to vector<1x32xf32>
    %c1_95 = arith.constant 1 : index
    %c0_96 = arith.constant 0 : index
    %c0_97 = arith.constant 0 : index
    %230 = vector.load %arg9[%c1_95, %c0_96, %c0_97] : memref<2x1x32xf32, #tpu.memory_space<vmem>>, vector<1x1x32xf32>
    %231 = vector.shape_cast %230 : vector<1x1x32xf32> to vector<1x32xf32>
    %cst_98 = arith.constant dense<0.000000e+00> : vector<8xf32>
    %232 = vector.multi_reduction <add>, %227, %cst_98 [1] : vector<8x32xf32> to vector<8xf32>
    %233 = vector.shape_cast %232 : vector<8xf32> to vector<8x1xf32>
    %cst_99 = arith.constant 3.200000e+01 : f32
    %234 = vector.broadcast %cst_99 : f32 to vector<8x1xf32>
    %235 = arith.divf %233, %234 : vector<8x1xf32>
    %236 = vector.broadcast %235 : vector<8x1xf32> to vector<8x32xf32>
    %237 = arith.subf %227, %236 : vector<8x32xf32>
    %238 = vector.broadcast %235 : vector<8x1xf32> to vector<8x32xf32>
    %239 = arith.subf %227, %238 : vector<8x32xf32>
    %240 = arith.mulf %237, %239 : vector<8x32xf32>
    %cst_100 = arith.constant dense<0.000000e+00> : vector<8xf32>
    %241 = vector.multi_reduction <add>, %240, %cst_100 [1] : vector<8x32xf32> to vector<8xf32>
    %242 = vector.shape_cast %241 : vector<8xf32> to vector<8x1xf32>
    %cst_101 = arith.constant 3.200000e+01 : f32
    %243 = vector.broadcast %cst_101 : f32 to vector<8x1xf32>
    %244 = arith.divf %242, %243 : vector<8x1xf32>
    %245 = vector.broadcast %235 : vector<8x1xf32> to vector<8x32xf32>
    %246 = arith.subf %227, %245 : vector<8x32xf32>
    %cst_102 = arith.constant 9.99999997E-7 : f32
    %247 = vector.broadcast %cst_102 : f32 to vector<8x1xf32>
    %248 = arith.addf %244, %247 : vector<8x1xf32>
    %249 = math.rsqrt %248 : vector<8x1xf32>
    %250 = vector.broadcast %249 : vector<8x1xf32> to vector<8x32xf32>
    %251 = arith.mulf %246, %250 : vector<8x32xf32>
    %252 = vector.broadcast %229 : vector<1x32xf32> to vector<8x32xf32>
    %253 = arith.mulf %251, %252 : vector<8x32xf32>
    %254 = vector.broadcast %231 : vector<1x32xf32> to vector<8x32xf32>
    %255 = arith.addf %253, %254 : vector<8x32xf32>
    %c1_103 = arith.constant 1 : index
    %c0_104 = arith.constant 0 : index
    %c0_105 = arith.constant 0 : index
    %256 = vector.load %arg10[%c1_103, %c0_104, %c0_105] : memref<2x32x128xf32, #tpu.memory_space<vmem>>, vector<1x32x128xf32>
    %257 = vector.shape_cast %256 : vector<1x32x128xf32> to vector<32x128xf32>
    %cst_106 = arith.constant dense<0.000000e+00> : vector<8x128xf32>
    %258 = tpu.matmul %255, %257, %cst_106 {dimension_numbers = #tpu.dot_dimension_numbers<[1], [0], [0], [1], [0, 0, 1, 1], [], []>} : vector<8x32xf32>, vector<32x128xf32>, vector<8x128xf32> -> vector<8x128xf32>
    %c1_107 = arith.constant 1 : index
    %c0_108 = arith.constant 0 : index
    %c0_109 = arith.constant 0 : index
    %259 = vector.load %arg11[%c1_107, %c0_108, %c0_109] : memref<2x1x128xf32, #tpu.memory_space<vmem>>, vector<1x1x128xf32>
    %260 = vector.shape_cast %259 : vector<1x1x128xf32> to vector<1x128xf32>
    %261 = vector.broadcast %260 : vector<1x128xf32> to vector<8x128xf32>
    %262 = arith.addf %258, %261 : vector<8x128xf32>
    %cst_110 = arith.constant 0.000000e+00 : f32
    %263 = vector.broadcast %cst_110 : f32 to vector<8x128xf32>
    %264 = arith.maximumf %262, %263 : vector<8x128xf32>
    %c1_111 = arith.constant 1 : index
    %c0_112 = arith.constant 0 : index
    %c0_113 = arith.constant 0 : index
    %265 = vector.load %arg12[%c1_111, %c0_112, %c0_113] : memref<2x128x32xf32, #tpu.memory_space<vmem>>, vector<1x128x32xf32>
    %266 = vector.shape_cast %265 : vector<1x128x32xf32> to vector<128x32xf32>
    %cst_114 = arith.constant dense<0.000000e+00> : vector<8x32xf32>
    %267 = tpu.matmul %264, %266, %cst_114 {dimension_numbers = #tpu.dot_dimension_numbers<[1], [0], [0], [1], [0, 0, 1, 1], [], []>} : vector<8x128xf32>, vector<128x32xf32>, vector<8x32xf32> -> vector<8x32xf32>
    %c1_115 = arith.constant 1 : index
    %c0_116 = arith.constant 0 : index
    %c0_117 = arith.constant 0 : index
    %268 = vector.load %arg13[%c1_115, %c0_116, %c0_117] : memref<2x1x32xf32, #tpu.memory_space<vmem>>, vector<1x1x32xf32>
    %269 = vector.shape_cast %268 : vector<1x1x32xf32> to vector<1x32xf32>
    %270 = vector.broadcast %269 : vector<1x32xf32> to vector<8x32xf32>
    %271 = arith.addf %267, %270 : vector<8x32xf32>
    %272 = arith.addf %255, %271 : vector<8x32xf32>
    %c1_118 = arith.constant 1 : index
    %c0_119 = arith.constant 0 : index
    %c0_120 = arith.constant 0 : index
    %273 = vector.load %arg14[%c1_118, %c0_119, %c0_120] : memref<2x1x32xf32, #tpu.memory_space<vmem>>, vector<1x1x32xf32>
    %274 = vector.shape_cast %273 : vector<1x1x32xf32> to vector<1x32xf32>
    %c1_121 = arith.constant 1 : index
    %c0_122 = arith.constant 0 : index
    %c0_123 = arith.constant 0 : index
    %275 = vector.load %arg15[%c1_121, %c0_122, %c0_123] : memref<2x1x32xf32, #tpu.memory_space<vmem>>, vector<1x1x32xf32>
    %276 = vector.shape_cast %275 : vector<1x1x32xf32> to vector<1x32xf32>
    %cst_124 = arith.constant dense<0.000000e+00> : vector<8xf32>
    %277 = vector.multi_reduction <add>, %272, %cst_124 [1] : vector<8x32xf32> to vector<8xf32>
    %278 = vector.shape_cast %277 : vector<8xf32> to vector<8x1xf32>
    %cst_125 = arith.constant 3.200000e+01 : f32
    %279 = vector.broadcast %cst_125 : f32 to vector<8x1xf32>
    %280 = arith.divf %278, %279 : vector<8x1xf32>
    %281 = vector.broadcast %280 : vector<8x1xf32> to vector<8x32xf32>
    %282 = arith.subf %272, %281 : vector<8x32xf32>
    %283 = vector.broadcast %280 : vector<8x1xf32> to vector<8x32xf32>
    %284 = arith.subf %272, %283 : vector<8x32xf32>
    %285 = arith.mulf %282, %284 : vector<8x32xf32>
    %cst_126 = arith.constant dense<0.000000e+00> : vector<8xf32>
    %286 = vector.multi_reduction <add>, %285, %cst_126 [1] : vector<8x32xf32> to vector<8xf32>
    %287 = vector.shape_cast %286 : vector<8xf32> to vector<8x1xf32>
    %cst_127 = arith.constant 3.200000e+01 : f32
    %288 = vector.broadcast %cst_127 : f32 to vector<8x1xf32>
    %289 = arith.divf %287, %288 : vector<8x1xf32>
    %290 = vector.broadcast %280 : vector<8x1xf32> to vector<8x32xf32>
    %291 = arith.subf %272, %290 : vector<8x32xf32>
    %cst_128 = arith.constant 9.99999997E-7 : f32
    %292 = vector.broadcast %cst_128 : f32 to vector<8x1xf32>
    %293 = arith.addf %289, %292 : vector<8x1xf32>
    %294 = math.rsqrt %293 : vector<8x1xf32>
    %295 = vector.broadcast %294 : vector<8x1xf32> to vector<8x32xf32>
    %296 = arith.mulf %291, %295 : vector<8x32xf32>
    %297 = vector.broadcast %274 : vector<1x32xf32> to vector<8x32xf32>
    %298 = arith.mulf %296, %297 : vector<8x32xf32>
    %299 = vector.broadcast %276 : vector<1x32xf32> to vector<8x32xf32>
    %300 = arith.addf %298, %299 : vector<8x32xf32>
    %c0_129 = arith.constant 0 : index
    %c0_130 = arith.constant 0 : index
    %301 = vector.load %arg16[%c0_129, %c0_130] : memref<32x64xf32, #tpu.memory_space<vmem>>, vector<32x64xf32>
    %cst_131 = arith.constant dense<0.000000e+00> : vector<8x64xf32>
    %302 = tpu.matmul %300, %301, %cst_131 {dimension_numbers = #tpu.dot_dimension_numbers<[1], [0], [0], [1], [0, 0, 1, 1], [], []>} : vector<8x32xf32>, vector<32x64xf32>, vector<8x64xf32> -> vector<8x64xf32>
    %c0_132 = arith.constant 0 : index
    %c0_133 = arith.constant 0 : index
    %303 = vector.load %arg17[%c0_132, %c0_133] : memref<1x64xf32, #tpu.memory_space<vmem>>, vector<1x64xf32>
    %304 = vector.broadcast %303 : vector<1x64xf32> to vector<8x64xf32>
    %305 = arith.addf %302, %304 : vector<8x64xf32>
    %306 = arith.addf %1, %305 : vector<8x64xf32>
    %c0_134 = arith.constant 0 : index
    %c0_135 = arith.constant 0 : index
    %c0_136 = arith.constant 0 : index
    %307 = vector.load %arg18[%c0_134, %c0_135, %c0_136] : memref<1x8x64xf32, #tpu.memory_space<vmem>>, vector<1x8x64xf32>
    %308 = vector.shape_cast %307 : vector<1x8x64xf32> to vector<8x64xf32>
    %309 = vector.shape_cast %306 : vector<8x64xf32> to vector<1x8x64xf32>
    tpu.vector_store %arg18[%c0_134, %c0_135, %c0_136], %309 {strides = array<i32>} : memref<1x8x64xf32, #tpu.memory_space<vmem>>, vector<1x8x64xf32>,
    return
  }
  func.func @transform_0(%arg0: i32) -> (i32, i32, i32) {
    %c0_i32 = arith.constant 0 : i32
    %c0_i32_0 = arith.constant 0 : i32
    %c0_i32_1 = arith.constant 0 : i32
    return %arg0, %c0_i32, %c0_i32_0 : i32, i32, i32
  }
  func.func @transform_1(%arg0: i32) -> (i32, i32) {
    %c0_i32 = arith.constant 0 : i32
    %c0_i32_0 = arith.constant 0 : i32
    %c0_i32_1 = arith.constant 0 : i32
    return %c0_i32, %c0_i32_0 : i32, i32
  }
  func.func @transform_2(%arg0: i32) -> (i32, i32) {
    %c0_i32 = arith.constant 0 : i32
    %c0_i32_0 = arith.constant 0 : i32
    %c0_i32_1 = arith.constant 0 : i32
    return %c0_i32, %c0_i32_0 : i32, i32
  }
  func.func @transform_3(%arg0: i32) -> (i32, i32, i32) {
    %c0_i32 = arith.constant 0 : i32
    %c0_i32_0 = arith.constant 0 : i32
    %c0_i32_1 = arith.constant 0 : i32
    %c0_i32_2 = arith.constant 0 : i32
    return %c0_i32, %c0_i32_0, %c0_i32_1 : i32, i32, i32
  }
  func.func @transform_4(%arg0: i32) -> (i32, i32, i32) {
    %c0_i32 = arith.constant 0 : i32
    %c0_i32_0 = arith.constant 0 : i32
    %c0_i32_1 = arith.constant 0 : i32
    %c0_i32_2 = arith.constant 0 : i32
    return %c0_i32, %c0_i32_0, %c0_i32_1 : i32, i32, i32
  }
  func.func @transform_5(%arg0: i32) -> (i32, i32, i32) {
    %c0_i32 = arith.constant 0 : i32
    %c0_i32_0 = arith.constant 0 : i32
    %c0_i32_1 = arith.constant 0 : i32
    %c0_i32_2 = arith.constant 0 : i32
    return %c0_i32, %c0_i32_0, %c0_i32_1 : i32, i32, i32
  }
  func.func @transform_6(%arg0: i32) -> (i32, i32, i32) {
    %c0_i32 = arith.constant 0 : i32
    %c0_i32_0 = arith.constant 0 : i32
    %c0_i32_1 = arith.constant 0 : i32
    %c0_i32_2 = arith.constant 0 : i32
    return %c0_i32, %c0_i32_0, %c0_i32_1 : i32, i32, i32
  }
  func.func @transform_7(%arg0: i32) -> (i32, i32, i32) {
    %c0_i32 = arith.constant 0 : i32
    %c0_i32_0 = arith.constant 0 : i32
    %c0_i32_1 = arith.constant 0 : i32
    %c0_i32_2 = arith.constant 0 : i32
    return %c0_i32, %c0_i32_0, %c0_i32_1 : i32, i32, i32
  }
  func.func @transform_8(%arg0: i32) -> (i32, i32, i32) {
    %c0_i32 = arith.constant 0 : i32
    %c0_i32_0 = arith.constant 0 : i32
    %c0_i32_1 = arith.constant 0 : i32
    %c0_i32_2 = arith.constant 0 : i32
    return %c0_i32, %c0_i32_0, %c0_i32_1 : i32, i32, i32
  }
  func.func @transform_9(%arg0: i32) -> (i32, i32, i32) {
    %c0_i32 = arith.constant 0 : i32
    %c0_i32_0 = arith.constant 0 : i32
    %c0_i32_1 = arith.constant 0 : i32
    %c0_i32_2 = arith.constant 0 : i32
    return %c0_i32, %c0_i32_0, %c0_i32_1 : i32, i32, i32
  }
  func.func @transform_10(%arg0: i32) -> (i32, i32, i32) {
    %c0_i32 = arith.constant 0 : i32
    %c0_i32_0 = arith.constant 0 : i32
    %c0_i32_1 = arith.constant 0 : i32
    %c0_i32_2 = arith.constant 0 : i32
    return %c0_i32, %c0_i32_0, %c0_i32_1 : i32, i32, i32
  }
  func.func @transform_11(%arg0: i32) -> (i32, i32, i32) {
    %c0_i32 = arith.constant 0 : i32
    %c0_i32_0 = arith.constant 0 : i32
    %c0_i32_1 = arith.constant 0 : i32
    %c0_i32_2 = arith.constant 0 : i32
    return %c0_i32, %c0_i32_0, %c0_i32_1 : i32, i32, i32
  }
  func.func @transform_12(%arg0: i32) -> (i32, i32, i32) {
    %c0_i32 = arith.constant 0 : i32
    %c0_i32_0 = arith.constant 0 : i32
    %c0_i32_1 = arith.constant 0 : i32
    %c0_i32_2 = arith.constant 0 : i32
    return %c0_i32, %c0_i32_0, %c0_i32_1 : i32, i32, i32
  }
  func.func @transform_13(%arg0: i32) -> (i32, i32, i32) {
    %c0_i32 = arith.constant 0 : i32
    %c0_i32_0 = arith.constant 0 : i32
    %c0_i32_1 = arith.constant 0 : i32
    %c0_i32_2 = arith.constant 0 : i32
    return %c0_i32, %c0_i32_0, %c0_i32_1 : i32, i32, i32
  }
  func.func @transform_14(%arg0: i32) -> (i32, i32, i32) {
    %c0_i32 = arith.constant 0 : i32
    %c0_i32_0 = arith.constant 0 : i32
    %c0_i32_1 = arith.constant 0 : i32
    %c0_i32_2 = arith.constant 0 : i32
    return %c0_i32, %c0_i32_0, %c0_i32_1 : i32, i32, i32
  }
  func.func @transform_15(%arg0: i32) -> (i32, i32) {
    %c0_i32 = arith.constant 0 : i32
    %c0_i32_0 = arith.constant 0 : i32
    %c0_i32_1 = arith.constant 0 : i32
    return %c0_i32, %c0_i32_0 : i32, i32
  }
  func.func @transform_16(%arg0: i32) -> (i32, i32) {
    %c0_i32 = arith.constant 0 : i32
    %c0_i32_0 = arith.constant 0 : i32
    %c0_i32_1 = arith.constant 0 : i32
    return %c0_i32, %c0_i32_0 : i32, i32
  }
  func.func @transform_17(%arg0: i32) -> (i32, i32, i32) {
    %c0_i32 = arith.constant 0 : i32
    %c0_i32_0 = arith.constant 0 : i32
    %c0_i32_1 = arith.constant 0 : i32
    return %arg0, %c0_i32, %c0_i32_0 : i32, i32, i32
  }
}

module attributes {stable_mosaic.version = 11 : i64} {
  func.func @kadapter_kernel(%arg0: i32, %arg1: memref<1x8x64xf32, #tpu.memory_space<vmem>>, %arg2: memref<64x32xf32, #tpu.memory_space<vmem>>, %arg3: memref<1x32xf32, #tpu.memory_space<vmem>>, %arg4: memref<2x32x32xf32, #tpu.memory_space<vmem>>, %arg5: memref<2x32x32xf32, #tpu.memory_space<vmem>>, %arg6: memref<2x32x32xf32, #tpu.memory_space<vmem>>, %arg7: memref<2x32x32xf32, #tpu.memory_space<vmem>>, %arg8: memref<2x1x32xf32, #tpu.memory_space<vmem>>, %arg9: memref<2x1x32xf32, #tpu.memory_space<vmem>>, %arg10: memref<2x32x128xf32, #tpu.memory_space<vmem>>, %arg11: memref<2x1x128xf32, #tpu.memory_space<vmem>>, %arg12: memref<2x128x32xf32, #tpu.memory_space<vmem>>, %arg13: memref<2x1x32xf32, #tpu.memory_space<vmem>>, %arg14: memref<2x1x32xf32, #tpu.memory_space<vmem>>, %arg15: memref<2x1x32xf32, #tpu.memory_space<vmem>>, %arg16: memref<32x64xf32, #tpu.memory_space<vmem>>, %arg17: memref<1x64xf32, #tpu.memory_space<vmem>>, %arg18: memref<1x8x64xf32, #tpu.memory_space<vmem>>) attributes {dimension_semantics = [#tpu.dimension_semantics<parallel>], iteration_bounds = array<i64: 2>, scalar_prefetch = 0 : i64, scratch_operands = 0 : i64, tpu.core_type = #tpu.core_type<tc>, window_params = [{transform_indices = @transform_0, window_bounds = array<i64: 1, 8, 64>}, {pipeline_mode = #tpu.pipeline_mode<synchronous>, transform_indices = @transform_1, window_bounds = array<i64: 64, 32>}, {pipeline_mode = #tpu.pipeline_mode<synchronous>, transform_indices = @transform_2, window_bounds = array<i64: 1, 32>}, {pipeline_mode = #tpu.pipeline_mode<synchronous>, transform_indices = @transform_3, window_bounds = array<i64: 2, 32, 32>}, {pipeline_mode = #tpu.pipeline_mode<synchronous>, transform_indices = @transform_4, window_bounds = array<i64: 2, 32, 32>}, {pipeline_mode = #tpu.pipeline_mode<synchronous>, transform_indices = @transform_5, window_bounds = array<i64: 2, 32, 32>}, {pipeline_mode = #tpu.pipeline_mode<synchronous>, transform_indices = @transform_6, window_bounds = array<i64: 2, 32, 32>}, {pipeline_mode = #tpu.pipeline_mode<synchronous>, transform_indices = @transform_7, window_bounds = array<i64: 2, 1, 32>}, {pipeline_mode = #tpu.pipeline_mode<synchronous>, transform_indices = @transform_8, window_bounds = array<i64: 2, 1, 32>}, {pipeline_mode = #tpu.pipeline_mode<synchronous>, transform_indices = @transform_9, window_bounds = array<i64: 2, 32, 128>}, {pipeline_mode = #tpu.pipeline_mode<synchronous>, transform_indices = @transform_10, window_bounds = array<i64: 2, 1, 128>}, {pipeline_mode = #tpu.pipeline_mode<synchronous>, transform_indices = @transform_11, window_bounds = array<i64: 2, 128, 32>}, {pipeline_mode = #tpu.pipeline_mode<synchronous>, transform_indices = @transform_12, window_bounds = array<i64: 2, 1, 32>}, {pipeline_mode = #tpu.pipeline_mode<synchronous>, transform_indices = @transform_13, window_bounds = array<i64: 2, 1, 32>}, {pipeline_mode = #tpu.pipeline_mode<synchronous>, transform_indices = @transform_14, window_bounds = array<i64: 2, 1, 32>}, {pipeline_mode = #tpu.pipeline_mode<synchronous>, transform_indices = @transform_15, window_bounds = array<i64: 32, 64>}, {pipeline_mode = #tpu.pipeline_mode<synchronous>, transform_indices = @transform_16, window_bounds = array<i64: 1, 64>}, {transform_indices = @transform_17, window_bounds = array<i64: 1, 8, 64>}]} {
    %c0 = arith.constant 0 : index
    %c0_0 = arith.constant 0 : index
    %c0_1 = arith.constant 0 : index
    %0 = vector.load %arg1[%c0, %c0_0, %c0_1] : memref<1x8x64xf32, #tpu.memory_space<vmem>>, vector<1x8x64xf32>
    %1 = vector.shape_cast %0 : vector<1x8x64xf32> to vector<8x64xf32>
    %c0_2 = arith.constant 0 : index
    %c0_3 = arith.constant 0 : index
    %2 = vector.load %arg2[%c0_2, %c0_3] : memref<64x32xf32, #tpu.memory_space<vmem>>, vector<64x32xf32>
    %cst = arith.constant dense<0.000000e+00> : vector<8x32xf32>
    %3 = tpu.matmul %1, %2, %cst {dimension_numbers = #tpu.dot_dimension_numbers<[1], [0], [0], [1], [0, 0, 1, 1], [], []>} : vector<8x64xf32>, vector<64x32xf32>, vector<8x32xf32> -> vector<8x32xf32>
    %c0_4 = arith.constant 0 : index
    %c0_5 = arith.constant 0 : index
    %4 = vector.load %arg3[%c0_4, %c0_5] : memref<1x32xf32, #tpu.memory_space<vmem>>, vector<1x32xf32>
    %5 = vector.broadcast %4 : vector<1x32xf32> to vector<8x32xf32>
    %6 = arith.addf %3, %5 : vector<8x32xf32>
    %c0_6 = arith.constant 0 : index
    %c0_7 = arith.constant 0 : index
    %c0_8 = arith.constant 0 : index
    %7 = vector.load %arg4[%c0_6, %c0_7, %c0_8] : memref<2x32x32xf32, #tpu.memory_space<vmem>>, vector<1x32x32xf32>
    %8 = vector.shape_cast %7 : vector<1x32x32xf32> to vector<32x32xf32>
    %cst_9 = arith.constant dense<0.000000e+00> : vector<8x32xf32>
    %9 = tpu.matmul %6, %8, %cst_9 {dimension_numbers = #tpu.dot_dimension_numbers<[1], [0], [0], [1], [0, 0, 1, 1], [], []>} : vector<8x32xf32>, vector<32x32xf32>, vector<8x32xf32> -> vector<8x32xf32>
    %c0_10 = arith.constant 0 : index
    %c0_11 = arith.constant 0 : index
    %c0_12 = arith.constant 0 : index
    %10 = vector.load %arg5[%c0_10, %c0_11, %c0_12] : memref<2x32x32xf32, #tpu.memory_space<vmem>>, vector<1x32x32xf32>
    %11 = vector.shape_cast %10 : vector<1x32x32xf32> to vector<32x32xf32>
    %cst_13 = arith.constant dense<0.000000e+00> : vector<8x32xf32>
    %12 = tpu.matmul %6, %11, %cst_13 {dimension_numbers = #tpu.dot_dimension_numbers<[1], [0], [0], [1], [0, 0, 1, 1], [], []>} : vector<8x32xf32>, vector<32x32xf32>, vector<8x32xf32> -> vector<8x32xf32>
    %c0_14 = arith.constant 0 : index
    %c0_15 = arith.constant 0 : index
    %c0_16 = arith.constant 0 : index
    %13 = vector.load %arg6[%c0_14, %c0_15, %c0_16] : memref<2x32x32xf32, #tpu.memory_space<vmem>>, vector<1x32x32xf32>
    %14 = vector.shape_cast %13 : vector<1x32x32xf32> to vector<32x32xf32>
    %cst_17 = arith.constant dense<0.000000e+00> : vector<8x32xf32>
    %15 = tpu.matmul %6, %14, %cst_17 {dimension_numbers = #tpu.dot_dimension_numbers<[1], [0], [0], [1], [0, 0, 1, 1], [], []>} : vector<8x32xf32>, vector<32x32xf32>, vector<8x32xf32> -> vector<8x32xf32>
    %16 = vector.extract_strided_slice %9 {offsets = [0, 0], sizes = [8, 8], strides = [1, 1]} : vector<8x32xf32> to vector<8x8xf32>
    %17 = vector.extract_strided_slice %9 {offsets = [0, 8], sizes = [8, 8], strides = [1, 1]} : vector<8x32xf32> to vector<8x8xf32>
    %18 = vector.extract_strided_slice %9 {offsets = [0, 16], sizes = [8, 8], strides = [1, 1]} : vector<8x32xf32> to vector<8x8xf32>
    %19 = vector.extract_strided_slice %9 {offsets = [0, 24], sizes = [8, 8], strides = [1, 1]} : vector<8x32xf32> to vector<8x8xf32>
    %20 = vector.shape_cast %16 : vector<8x8xf32> to vector<1x8x8xf32>
    %21 = vector.shape_cast %17 : vector<8x8xf32> to vector<1x8x8xf32>
    %22 = vector.shape_cast %18 : vector<8x8xf32> to vector<1x8x8xf32>
    %23 = vector.shape_cast %19 : vector<8x8xf32> to vector<1x8x8xf32>
    %24 = tpu.concatenate %20, %21, %22, %23 in 0 : vector<1x8x8xf32>, vector<1x8x8xf32>, vector<1x8x8xf32>, vector<1x8x8xf32> -> vector<4x8x8xf32>
    %25 = vector.extract_strided_slice %12 {offsets = [0, 0], sizes = [8, 8], strides = [1, 1]} : vector<8x32xf32> to vector<8x8xf32>
    %26 = vector.extract_strided_slice %12 {offsets = [0, 8], sizes = [8, 8], strides = [1, 1]} : vector<8x32xf32> to vector<8x8xf32>
    %27 = vector.extract_strided_slice %12 {offsets = [0, 16], sizes = [8, 8], strides = [1, 1]} : vector<8x32xf32> to vector<8x8xf32>
    %28 = vector.extract_strided_slice %12 {offsets = [0, 24], sizes = [8, 8], strides = [1, 1]} : vector<8x32xf32> to vector<8x8xf32>
    %29 = vector.shape_cast %25 : vector<8x8xf32> to vector<1x8x8xf32>
    %30 = vector.shape_cast %26 : vector<8x8xf32> to vector<1x8x8xf32>
    %31 = vector.shape_cast %27 : vector<8x8xf32> to vector<1x8x8xf32>
    %32 = vector.shape_cast %28 : vector<8x8xf32> to vector<1x8x8xf32>
    %33 = tpu.concatenate %29, %30, %31, %32 in 0 : vector<1x8x8xf32>, vector<1x8x8xf32>, vector<1x8x8xf32>, vector<1x8x8xf32> -> vector<4x8x8xf32>
    %34 = vector.extract_strided_slice %15 {offsets = [0, 0], sizes = [8, 8], strides = [1, 1]} : vector<8x32xf32> to vector<8x8xf32>
    %35 = vector.extract_strided_slice %15 {offsets = [0, 8], sizes = [8, 8], strides = [1, 1]} : vector<8x32xf32> to vector<8x8xf32>
    %36 = vector.extract_strided_slice %15 {offsets = [0, 16], sizes = [8, 8], strides = [1, 1]} : vector<8x32xf32> to vector<8x8xf32>
    %37 = vector.extract_strided_slice %15 {offsets = [0, 24], sizes = [8, 8], strides = [1, 1]} : vector<8x32xf32> to vector<8x8xf32>
    %38 = vector.shape_cast %34 : vector<8x8xf32> to vector<1x8x8xf32>
    %39 = vector.shape_cast %35 : vector<8x8xf32> to vector<1x8x8xf32>
    %40 = vector.shape_cast %36 : vector<8x8xf32> to vector<1x8x8xf32>
    %41 = vector.shape_cast %37 : vector<8x8xf32> to vector<1x8x8xf32>
    %42 = tpu.concatenate %38, %39, %40, %41 in 0 : vector<1x8x8xf32>, vector<1x8x8xf32>, vector<1x8x8xf32>, vector<1x8x8xf32> -> vector<4x8x8xf32>
    "tpu.trace_start"() <{level = 10 : i32, message = "hqd,hkd->hqk"}> : () -> ()
    %cst_18 = arith.constant dense<0.000000e+00> : vector<4x8x8xf32>
    %43 = tpu.matmul %24, %33, %cst_18 {dimension_numbers = #tpu.dot_dimension_numbers<[2], [2], [1], [1], [0, 0, 0, 1, 1, 1], [0], [0]>} : vector<4x8x8xf32>, vector<4x8x8xf32>, vector<4x8x8xf32> -> vector<4x8x8xf32>
    "tpu.trace_stop"() : () -> ()
    %cst_19 = arith.constant 0.353553385 : f32
    %44 = vector.broadcast %cst_19 : f32 to vector<4x8x8xf32>
    %45 = arith.mulf %43, %44 : vector<4x8x8xf32>
    %cst_20 = arith.constant dense<0xFF800000> : vector<4x8xf32>
    %46 = vector.multi_reduction <maximumf>, %45, %cst_20 [2] : vector<4x8x8xf32> to vector<4x8xf32>
    %47 = vector.shape_cast %46 : vector<4x8xf32> to vector<4x8x1xf32>
    %48 = vector.broadcast %47 : vector<4x8x1xf32> to vector<4x8x8xf32>
    %49 = arith.subf %45, %48 : vector<4x8x8xf32>
    %50 = math.exp %49 : vector<4x8x8xf32>
    %cst_21 = arith.constant dense<0.000000e+00> : vector<4x8xf32>
    %51 = vector.multi_reduction <add>, %50, %cst_21 [2] : vector<4x8x8xf32> to vector<4x8xf32>
    %52 = vector.shape_cast %51 : vector<4x8xf32> to vector<4x8x1xf32>
    %53 = tpu.reciprocal %52 {approx = true} : vector<4x8x1xf32> -> vector<4x8x1xf32>
    %54 = vector.broadcast %53 : vector<4x8x1xf32> to vector<4x8x8xf32>
    %55 = arith.mulf %50, %54 : vector<4x8x8xf32>
    "tpu.trace_start"() <{level = 10 : i32, message = "hqk,hkd->hqd"}> : () -> ()
    %cst_22 = arith.constant dense<0.000000e+00> : vector<4x8x8xf32>
    %56 = tpu.matmul %55, %42, %cst_22 {dimension_numbers = #tpu.dot_dimension_numbers<[2], [1], [1], [2], [0, 0, 0, 1, 1, 2], [0], [0]>} : vector<4x8x8xf32>, vector<4x8x8xf32>, vector<4x8x8xf32> -> vector<4x8x8xf32>
    "tpu.trace_stop"() : () -> ()
    %c0_23 = arith.constant 0 : index
    %c0_24 = arith.constant 0 : index
    %c0_25 = arith.constant 0 : index
    %57 = vector.load %arg7[%c0_23, %c0_24, %c0_25] : memref<2x32x32xf32, #tpu.memory_space<vmem>>, vector<1x32x32xf32>
    %58 = vector.shape_cast %57 : vector<1x32x32xf32> to vector<32x32xf32>
    %cst_26 = arith.constant 0.000000e+00 : f32
    %59 = vector.broadcast %cst_26 : f32 to vector<8x32xf32>
    %60 = vector.extract_strided_slice %56 {offsets = [0, 0, 0], sizes = [1, 8, 8], strides = [1, 1, 1]} : vector<4x8x8xf32> to vector<1x8x8xf32>
    %61 = vector.shape_cast %60 : vector<1x8x8xf32> to vector<8x8xf32>
    %62 = vector.extract_strided_slice %58 {offsets = [0, 0], sizes = [8, 32], strides = [1, 1]} : vector<32x32xf32> to vector<8x32xf32>
    %cst_27 = arith.constant dense<0.000000e+00> : vector<8x32xf32>
    %63 = tpu.matmul %61, %62, %cst_27 {dimension_numbers = #tpu.dot_dimension_numbers<[1], [0], [0], [1], [0, 0, 1, 1], [], []>} : vector<8x8xf32>, vector<8x32xf32>, vector<8x32xf32> -> vector<8x32xf32>
    %64 = arith.addf %59, %63 : vector<8x32xf32>
    %65 = vector.extract_strided_slice %56 {offsets = [1, 0, 0], sizes = [1, 8, 8], strides = [1, 1, 1]} : vector<4x8x8xf32> to vector<1x8x8xf32>
    %66 = vector.shape_cast %65 : vector<1x8x8xf32> to vector<8x8xf32>
    %67 = vector.extract_strided_slice %58 {offsets = [8, 0], sizes = [8, 32], strides = [1, 1]} : vector<32x32xf32> to vector<8x32xf32>
    %cst_28 = arith.constant dense<0.000000e+00> : vector<8x32xf32>
    %68 = tpu.matmul %66, %67, %cst_28 {dimension_numbers = #tpu.dot_dimension_numbers<[1], [0], [0], [1], [0, 0, 1, 1], [], []>} : vector<8x8xf32>, vector<8x32xf32>, vector<8x32xf32> -> vector<8x32xf32>
    %69 = arith.addf %64, %68 : vector<8x32xf32>
    %70 = vector.extract_strided_slice %56 {offsets = [2, 0, 0], sizes = [1, 8, 8], strides = [1, 1, 1]} : vector<4x8x8xf32> to vector<1x8x8xf32>
    %71 = vector.shape_cast %70 : vector<1x8x8xf32> to vector<8x8xf32>
    %72 = vector.extract_strided_slice %58 {offsets = [16, 0], sizes = [8, 32], strides = [1, 1]} : vector<32x32xf32> to vector<8x32xf32>
    %cst_29 = arith.constant dense<0.000000e+00> : vector<8x32xf32>
    %73 = tpu.matmul %71, %72, %cst_29 {dimension_numbers = #tpu.dot_dimension_numbers<[1], [0], [0], [1], [0, 0, 1, 1], [], []>} : vector<8x8xf32>, vector<8x32xf32>, vector<8x32xf32> -> vector<8x32xf32>
    %74 = arith.addf %69, %73 : vector<8x32xf32>
    %75 = vector.extract_strided_slice %56 {offsets = [3, 0, 0], sizes = [1, 8, 8], strides = [1, 1, 1]} : vector<4x8x8xf32> to vector<1x8x8xf32>
    %76 = vector.shape_cast %75 : vector<1x8x8xf32> to vector<8x8xf32>
    %77 = vector.extract_strided_slice %58 {offsets = [24, 0], sizes = [8, 32], strides = [1, 1]} : vector<32x32xf32> to vector<8x32xf32>
    %cst_30 = arith.constant dense<0.000000e+00> : vector<8x32xf32>
    %78 = tpu.matmul %76, %77, %cst_30 {dimension_numbers = #tpu.dot_dimension_numbers<[1], [0], [0], [1], [0, 0, 1, 1], [], []>} : vector<8x8xf32>, vector<8x32xf32>, vector<8x32xf32> -> vector<8x32xf32>
    %79 = arith.addf %74, %78 : vector<8x32xf32>
    %80 = arith.addf %6, %79 : vector<8x32xf32>
    %c0_31 = arith.constant 0 : index
    %c0_32 = arith.constant 0 : index
    %c0_33 = arith.constant 0 : index
    %81 = vector.load %arg8[%c0_31, %c0_32, %c0_33] : memref<2x1x32xf32, #tpu.memory_space<vmem>>, vector<1x1x32xf32>
    %82 = vector.shape_cast %81 : vector<1x1x32xf32> to vector<1x32xf32>
    %c0_34 = arith.constant 0 : index
    %c0_35 = arith.constant 0 : index
    %c0_36 = arith.constant 0 : index
    %83 = vector.load %arg9[%c0_34, %c0_35, %c0_36] : memref<2x1x32xf32, #tpu.memory_space<vmem>>, vector<1x1x32xf32>
    %84 = vector.shape_cast %83 : vector<1x1x32xf32> to vector<1x32xf32>
    %cst_37 = arith.constant dense<0.000000e+00> : vector<8xf32>
    %85 = vector.multi_reduction <add>, %80, %cst_37 [1] : vector<8x32xf32> to vector<8xf32>
    %86 = vector.shape_cast %85 : vector<8xf32> to vector<8x1xf32>
    %cst_38 = arith.constant 3.200000e+01 : f32
    %87 = vector.broadcast %cst_38 : f32 to vector<8x1xf32>
    %88 = arith.divf %86, %87 : vector<8x1xf32>
    %89 = vector.broadcast %88 : vector<8x1xf32> to vector<8x32xf32>
    %90 = arith.subf %80, %89 : vector<8x32xf32>
    %91 = vector.broadcast %88 : vector<8x1xf32> to vector<8x32xf32>
    %92 = arith.subf %80, %91 : vector<8x32xf32>
    %93 = arith.mulf %90, %92 : vector<8x32xf32>
    %cst_39 = arith.constant dense<0.000000e+00> : vector<8xf32>
    %94 = vector.multi_reduction <add>, %93, %cst_39 [1] : vector<8x32xf32> to vector<8xf32>
    %95 = vector.shape_cast %94 : vector<8xf32> to vector<8x1xf32>
    %cst_40 = arith.constant 3.200000e+01 : f32
    %96 = vector.broadcast %cst_40 : f32 to vector<8x1xf32>
    %97 = arith.divf %95, %96 : vector<8x1xf32>
    %98 = vector.broadcast %88 : vector<8x1xf32> to vector<8x32xf32>
    %99 = arith.subf %80, %98 : vector<8x32xf32>
    %cst_41 = arith.constant 9.99999997E-7 : f32
    %100 = vector.broadcast %cst_41 : f32 to vector<8x1xf32>
    %101 = arith.addf %97, %100 : vector<8x1xf32>
    %102 = math.rsqrt %101 : vector<8x1xf32>
    %103 = vector.broadcast %102 : vector<8x1xf32> to vector<8x32xf32>
    %104 = arith.mulf %99, %103 : vector<8x32xf32>
    %105 = vector.broadcast %82 : vector<1x32xf32> to vector<8x32xf32>
    %106 = arith.mulf %104, %105 : vector<8x32xf32>
    %107 = vector.broadcast %84 : vector<1x32xf32> to vector<8x32xf32>
    %108 = arith.addf %106, %107 : vector<8x32xf32>
    %c0_42 = arith.constant 0 : index
    %c0_43 = arith.constant 0 : index
    %c0_44 = arith.constant 0 : index
    %109 = vector.load %arg10[%c0_42, %c0_43, %c0_44] : memref<2x32x128xf32, #tpu.memory_space<vmem>>, vector<1x32x128xf32>
    %110 = vector.shape_cast %109 : vector<1x32x128xf32> to vector<32x128xf32>
    %cst_45 = arith.constant dense<0.000000e+00> : vector<8x128xf32>
    %111 = tpu.matmul %108, %110, %cst_45 {dimension_numbers = #tpu.dot_dimension_numbers<[1], [0], [0], [1], [0, 0, 1, 1], [], []>} : vector<8x32xf32>, vector<32x128xf32>, vector<8x128xf32> -> vector<8x128xf32>
    %c0_46 = arith.constant 0 : index
    %c0_47 = arith.constant 0 : index
    %c0_48 = arith.constant 0 : index
    %112 = vector.load %arg11[%c0_46, %c0_47, %c0_48] : memref<2x1x128xf32, #tpu.memory_space<vmem>>, vector<1x1x128xf32>
    %113 = vector.shape_cast %112 : vector<1x1x128xf32> to vector<1x128xf32>
    %114 = vector.broadcast %113 : vector<1x128xf32> to vector<8x128xf32>
    %115 = arith.addf %111, %114 : vector<8x128xf32>
    %cst_49 = arith.constant 0.000000e+00 : f32
    %116 = vector.broadcast %cst_49 : f32 to vector<8x128xf32>
    %117 = arith.maximumf %115, %116 : vector<8x128xf32>
    %c0_50 = arith.constant 0 : index
    %c0_51 = arith.constant 0 : index
    %c0_52 = arith.constant 0 : index
    %118 = vector.load %arg12[%c0_50, %c0_51, %c0_52] : memref<2x128x32xf32, #tpu.memory_space<vmem>>, vector<1x128x32xf32>
    %119 = vector.shape_cast %118 : vector<1x128x32xf32> to vector<128x32xf32>
    %cst_53 = arith.constant dense<0.000000e+00> : vector<8x32xf32>
    %120 = tpu.matmul %117, %119, %cst_53 {dimension_numbers = #tpu.dot_dimension_numbers<[1], [0], [0], [1], [0, 0, 1, 1], [], []>} : vector<8x128xf32>, vector<128x32xf32>, vector<8x32xf32> -> vector<8x32xf32>
    %c0_54 = arith.constant 0 : index
    %c0_55 = arith.constant 0 : index
    %c0_56 = arith.constant 0 : index
    %121 = vector.load %arg13[%c0_54, %c0_55, %c0_56] : memref<2x1x32xf32, #tpu.memory_space<vmem>>, vector<1x1x32xf32>
    %122 = vector.shape_cast %121 : vector<1x1x32xf32> to vector<1x32xf32>
    %123 = vector.broadcast %122 : vector<1x32xf32> to vector<8x32xf32>
    %124 = arith.addf %120, %123 : vector<8x32xf32>
    %125 = arith.addf %108, %124 : vector<8x32xf32>
    %c0_57 = arith.constant 0 : index
    %c0_58 = arith.constant 0 : index
    %c0_59 = arith.constant 0 : index
    %126 = vector.load %arg14[%c0_57, %c0_58, %c0_59] : memref<2x1x32xf32, #tpu.memory_space<vmem>>, vector<1x1x32xf32>
    %127 = vector.shape_cast %126 : vector<1x1x32xf32> to vector<1x32xf32>
    %c0_60 = arith.constant 0 : index
    %c0_61 = arith.constant 0 : index
    %c0_62 = arith.constant 0 : index
    %128 = vector.load %arg15[%c0_60, %c0_61, %c0_62] : memref<2x1x32xf32, #tpu.memory_space<vmem>>, vector<1x1x32xf32>
    %129 = vector.shape_cast %128 : vector<1x1x32xf32> to vector<1x32xf32>
    %cst_63 = arith.constant dense<0.000000e+00> : vector<8xf32>
    %130 = vector.multi_reduction <add>, %125, %cst_63 [1] : vector<8x32xf32> to vector<8xf32>
    %131 = vector.shape_cast %130 : vector<8xf32> to vector<8x1xf32>
    %cst_64 = arith.constant 3.200000e+01 : f32
    %132 = vector.broadcast %cst_64 : f32 to vector<8x1xf32>
    %133 = arith.divf %131, %132 : vector<8x1xf32>
    %134 = vector.broadcast %133 : vector<8x1xf32> to vector<8x32xf32>
    %135 = arith.subf %125, %134 : vector<8x32xf32>
    %136 = vector.broadcast %133 : vector<8x1xf32> to vector<8x32xf32>
    %137 = arith.subf %125, %136 : vector<8x32xf32>
    %138 = arith.mulf %135, %137 : vector<8x32xf32>
    %cst_65 = arith.constant dense<0.000000e+00> : vector<8xf32>
    %139 = vector.multi_reduction <add>, %138, %cst_65 [1] : vector<8x32xf32> to vector<8xf32>
    %140 = vector.shape_cast %139 : vector<8xf32> to vector<8x1xf32>
    %cst_66 = arith.constant 3.200000e+01 : f32
    %141 = vector.broadcast %cst_66 : f32 to vector<8x1xf32>
    %142 = arith.divf %140, %141 : vector<8x1xf32>
    %143 = vector.broadcast %133 : vector<8x1xf32> to vector<8x32xf32>
    %144 = arith.subf %125, %143 : vector<8x32xf32>
    %cst_67 = arith.constant 9.99999997E-7 : f32
    %145 = vector.broadcast %cst_67 : f32 to vector<8x1xf32>
    %146 = arith.addf %142, %145 : vector<8x1xf32>
    %147 = math.rsqrt %146 : vector<8x1xf32>
    %148 = vector.broadcast %147 : vector<8x1xf32> to vector<8x32xf32>
    %149 = arith.mulf %144, %148 : vector<8x32xf32>
    %150 = vector.broadcast %127 : vector<1x32xf32> to vector<8x32xf32>
    %151 = arith.mulf %149, %150 : vector<8x32xf32>
    %152 = vector.broadcast %129 : vector<1x32xf32> to vector<8x32xf32>
    %153 = arith.addf %151, %152 : vector<8x32xf32>
    %c1 = arith.constant 1 : index
    %c0_68 = arith.constant 0 : index
    %c0_69 = arith.constant 0 : index
    %154 = vector.load %arg4[%c1, %c0_68, %c0_69] : memref<2x32x32xf32, #tpu.memory_space<vmem>>, vector<1x32x32xf32>
    %155 = vector.shape_cast %154 : vector<1x32x32xf32> to vector<32x32xf32>
    %cst_70 = arith.constant dense<0.000000e+00> : vector<8x32xf32>
    %156 = tpu.matmul %153, %155, %cst_70 {dimension_numbers = #tpu.dot_dimension_numbers<[1], [0], [0], [1], [0, 0, 1, 1], [], []>} : vector<8x32xf32>, vector<32x32xf32>, vector<8x32xf32> -> vector<8x32xf32>
    %c1_71 = arith.constant 1 : index
    %c0_72 = arith.constant 0 : index
    %c0_73 = arith.constant 0 : index
    %157 = vector.load %arg5[%c1_71, %c0_72, %c0_73] : memref<2x32x32xf32, #tpu.memory_space<vmem>>, vector<1x32x32xf32>
    %158 = vector.shape_cast %157 : vector<1x32x32xf32> to vector<32x32xf32>
    %cst_74 = arith.constant dense<0.000000e+00> : vector<8x32xf32>
    %159 = tpu.matmul %153, %158, %cst_74 {dimension_numbers = #tpu.dot_dimension_numbers<[1], [0], [0], [1], [0, 0, 1, 1], [], []>} : vector<8x32xf32>, vector<32x32xf32>, vector<8x32xf32> -> vector<8x32xf32>
    %c1_75 = arith.constant 1 : index
    %c0_76 = arith.constant 0 : index
    %c0_77 = arith.constant 0 : index
    %160 = vector.load %arg6[%c1_75, %c0_76, %c0_77] : memref<2x32x32xf32, #tpu.memory_space<vmem>>, vector<1x32x32xf32>
    %161 = vector.shape_cast %160 : vector<1x32x32xf32> to vector<32x32xf32>
    %cst_78 = arith.constant dense<0.000000e+00> : vector<8x32xf32>
    %162 = tpu.matmul %153, %161, %cst_78 {dimension_numbers = #tpu.dot_dimension_numbers<[1], [0], [0], [1], [0, 0, 1, 1], [], []>} : vector<8x32xf32>, vector<32x32xf32>, vector<8x32xf32> -> vector<8x32xf32>
    %163 = vector.extract_strided_slice %156 {offsets = [0, 0], sizes = [8, 8], strides = [1, 1]} : vector<8x32xf32> to vector<8x8xf32>
    %164 = vector.extract_strided_slice %156 {offsets = [0, 8], sizes = [8, 8], strides = [1, 1]} : vector<8x32xf32> to vector<8x8xf32>
    %165 = vector.extract_strided_slice %156 {offsets = [0, 16], sizes = [8, 8], strides = [1, 1]} : vector<8x32xf32> to vector<8x8xf32>
    %166 = vector.extract_strided_slice %156 {offsets = [0, 24], sizes = [8, 8], strides = [1, 1]} : vector<8x32xf32> to vector<8x8xf32>
    %167 = vector.shape_cast %163 : vector<8x8xf32> to vector<1x8x8xf32>
    %168 = vector.shape_cast %164 : vector<8x8xf32> to vector<1x8x8xf32>
    %169 = vector.shape_cast %165 : vector<8x8xf32> to vector<1x8x8xf32>
    %170 = vector.shape_cast %166 : vector<8x8xf32> to vector<1x8x8xf32>
    %171 = tpu.concatenate %167, %168, %169, %170 in 0 : vector<1x8x8xf32>, vector<1x8x8xf32>, vector<1x8x8xf32>, vector<1x8x8xf32> -> vector<4x8x8xf32>
    %172 = vector.extract_strided_slice %159 {offsets = [0, 0], sizes = [8, 8], strides = [1, 1]} : vector<8x32xf32> to vector<8x8xf32>
    %173 = vector.extract_strided_slice %159 {offsets = [0, 8], sizes = [8, 8], strides = [1, 1]} : vector<8x32xf32> to vector<8x8xf32>
    %174 = vector.extract_strided_slice %159 {offsets = [0, 16], sizes = [8, 8], strides = [1, 1]} : vector<8x32xf32> to vector<8x8xf32>
    %175 = vector.extract_strided_slice %159 {offsets = [0, 24], sizes = [8, 8], strides = [1, 1]} : vector<8x32xf32> to vector<8x8xf32>
    %176 = vector.shape_cast %172 : vector<8x8xf32> to vector<1x8x8xf32>
    %177 = vector.shape_cast %173 : vector<8x8xf32> to vector<1x8x8xf32>
    %178 = vector.shape_cast %174 : vector<8x8xf32> to vector<1x8x8xf32>
    %179 = vector.shape_cast %175 : vector<8x8xf32> to vector<1x8x8xf32>
    %180 = tpu.concatenate %176, %177, %178, %179 in 0 : vector<1x8x8xf32>, vector<1x8x8xf32>, vector<1x8x8xf32>, vector<1x8x8xf32> -> vector<4x8x8xf32>
    %181 = vector.extract_strided_slice %162 {offsets = [0, 0], sizes = [8, 8], strides = [1, 1]} : vector<8x32xf32> to vector<8x8xf32>
    %182 = vector.extract_strided_slice %162 {offsets = [0, 8], sizes = [8, 8], strides = [1, 1]} : vector<8x32xf32> to vector<8x8xf32>
    %183 = vector.extract_strided_slice %162 {offsets = [0, 16], sizes = [8, 8], strides = [1, 1]} : vector<8x32xf32> to vector<8x8xf32>
    %184 = vector.extract_strided_slice %162 {offsets = [0, 24], sizes = [8, 8], strides = [1, 1]} : vector<8x32xf32> to vector<8x8xf32>
    %185 = vector.shape_cast %181 : vector<8x8xf32> to vector<1x8x8xf32>
    %186 = vector.shape_cast %182 : vector<8x8xf32> to vector<1x8x8xf32>
    %187 = vector.shape_cast %183 : vector<8x8xf32> to vector<1x8x8xf32>
    %188 = vector.shape_cast %184 : vector<8x8xf32> to vector<1x8x8xf32>
    %189 = tpu.concatenate %185, %186, %187, %188 in 0 : vector<1x8x8xf32>, vector<1x8x8xf32>, vector<1x8x8xf32>, vector<1x8x8xf32> -> vector<4x8x8xf32>
    "tpu.trace_start"() <{level = 10 : i32, message = "hqd,hkd->hqk"}> : () -> ()
    %cst_79 = arith.constant dense<0.000000e+00> : vector<4x8x8xf32>
    %190 = tpu.matmul %171, %180, %cst_79 {dimension_numbers = #tpu.dot_dimension_numbers<[2], [2], [1], [1], [0, 0, 0, 1, 1, 1], [0], [0]>} : vector<4x8x8xf32>, vector<4x8x8xf32>, vector<4x8x8xf32> -> vector<4x8x8xf32>
    "tpu.trace_stop"() : () -> ()
    %cst_80 = arith.constant 0.353553385 : f32
    %191 = vector.broadcast %cst_80 : f32 to vector<4x8x8xf32>
    %192 = arith.mulf %190, %191 : vector<4x8x8xf32>
    %cst_81 = arith.constant dense<0xFF800000> : vector<4x8xf32>
    %193 = vector.multi_reduction <maximumf>, %192, %cst_81 [2] : vector<4x8x8xf32> to vector<4x8xf32>
    %194 = vector.shape_cast %193 : vector<4x8xf32> to vector<4x8x1xf32>
    %195 = vector.broadcast %194 : vector<4x8x1xf32> to vector<4x8x8xf32>
    %196 = arith.subf %192, %195 : vector<4x8x8xf32>
    %197 = math.exp %196 : vector<4x8x8xf32>
    %cst_82 = arith.constant dense<0.000000e+00> : vector<4x8xf32>
    %198 = vector.multi_reduction <add>, %197, %cst_82 [2] : vector<4x8x8xf32> to vector<4x8xf32>
    %199 = vector.shape_cast %198 : vector<4x8xf32> to vector<4x8x1xf32>
    %200 = tpu.reciprocal %199 {approx = true} : vector<4x8x1xf32> -> vector<4x8x1xf32>
    %201 = vector.broadcast %200 : vector<4x8x1xf32> to vector<4x8x8xf32>
    %202 = arith.mulf %197, %201 : vector<4x8x8xf32>
    "tpu.trace_start"() <{level = 10 : i32, message = "hqk,hkd->hqd"}> : () -> ()
    %cst_83 = arith.constant dense<0.000000e+00> : vector<4x8x8xf32>
    %203 = tpu.matmul %202, %189, %cst_83 {dimension_numbers = #tpu.dot_dimension_numbers<[2], [1], [1], [2], [0, 0, 0, 1, 1, 2], [0], [0]>} : vector<4x8x8xf32>, vector<4x8x8xf32>, vector<4x8x8xf32> -> vector<4x8x8xf32>
    "tpu.trace_stop"() : () -> ()
    %c1_84 = arith.constant 1 : index
    %c0_85 = arith.constant 0 : index
    %c0_86 = arith.constant 0 : index
    %204 = vector.load %arg7[%c1_84, %c0_85, %c0_86] : memref<2x32x32xf32, #tpu.memory_space<vmem>>, vector<1x32x32xf32>
    %205 = vector.shape_cast %204 : vector<1x32x32xf32> to vector<32x32xf32>
    %cst_87 = arith.constant 0.000000e+00 : f32
    %206 = vector.broadcast %cst_87 : f32 to vector<8x32xf32>
    %207 = vector.extract_strided_slice %203 {offsets = [0, 0, 0], sizes = [1, 8, 8], strides = [1, 1, 1]} : vector<4x8x8xf32> to vector<1x8x8xf32>
    %208 = vector.shape_cast %207 : vector<1x8x8xf32> to vector<8x8xf32>
    %209 = vector.extract_strided_slice %205 {offsets = [0, 0], sizes = [8, 32], strides = [1, 1]} : vector<32x32xf32> to vector<8x32xf32>
    %cst_88 = arith.constant dense<0.000000e+00> : vector<8x32xf32>
    %210 = tpu.matmul %208, %209, %cst_88 {dimension_numbers = #tpu.dot_dimension_numbers<[1], [0], [0], [1], [0, 0, 1, 1], [], []>} : vector<8x8xf32>, vector<8x32xf32>, vector<8x32xf32> -> vector<8x32xf32>
    %211 = arith.addf %206, %210 : vector<8x32xf32>
    %212 = vector.extract_strided_slice %203 {offsets = [1, 0, 0], sizes = [1, 8, 8], strides = [1, 1, 1]} : vector<4x8x8xf32> to vector<1x8x8xf32>
    %213 = vector.shape_cast %212 : vector<1x8x8xf32> to vector<8x8xf32>
    %214 = vector.extract_strided_slice %205 {offsets = [8, 0], sizes = [8, 32], strides = [1, 1]} : vector<32x32xf32> to vector<8x32xf32>
    %cst_89 = arith.constant dense<0.000000e+00> : vector<8x32xf32>
    %215 = tpu.matmul %213, %214, %cst_89 {dimension_numbers = #tpu.dot_dimension_numbers<[1], [0], [0], [1], [0, 0, 1, 1], [], []>} : vector<8x8xf32>, vector<8x32xf32>, vector<8x32xf32> -> vector<8x32xf32>
    %216 = arith.addf %211, %215 : vector<8x32xf32>
    %217 = vector.extract_strided_slice %203 {offsets = [2, 0, 0], sizes = [1, 8, 8], strides = [1, 1, 1]} : vector<4x8x8xf32> to vector<1x8x8xf32>
    %218 = vector.shape_cast %217 : vector<1x8x8xf32> to vector<8x8xf32>
    %219 = vector.extract_strided_slice %205 {offsets = [16, 0], sizes = [8, 32], strides = [1, 1]} : vector<32x32xf32> to vector<8x32xf32>
    %cst_90 = arith.constant dense<0.000000e+00> : vector<8x32xf32>
    %220 = tpu.matmul %218, %219, %cst_90 {dimension_numbers = #tpu.dot_dimension_numbers<[1], [0], [0], [1], [0, 0, 1, 1], [], []>} : vector<8x8xf32>, vector<8x32xf32>, vector<8x32xf32> -> vector<8x32xf32>
    %221 = arith.addf %216, %220 : vector<8x32xf32>
    %222 = vector.extract_strided_slice %203 {offsets = [3, 0, 0], sizes = [1, 8, 8], strides = [1, 1, 1]} : vector<4x8x8xf32> to vector<1x8x8xf32>
    %223 = vector.shape_cast %222 : vector<1x8x8xf32> to vector<8x8xf32>
    %224 = vector.extract_strided_slice %205 {offsets = [24, 0], sizes = [8, 32], strides = [1, 1]} : vector<32x32xf32> to vector<8x32xf32>
    %cst_91 = arith.constant dense<0.000000e+00> : vector<8x32xf32>
    %225 = tpu.matmul %223, %224, %cst_91 {dimension_numbers = #tpu.dot_dimension_numbers<[1], [0], [0], [1], [0, 0, 1, 1], [], []>} : vector<8x8xf32>, vector<8x32xf32>, vector<8x32xf32> -> vector<8x32xf32>
    %226 = arith.addf %221, %225 : vector<8x32xf32>
    %227 = arith.addf %153, %226 : vector<8x32xf32>
    %c1_92 = arith.constant 1 : index
    %c0_93 = arith.constant 0 : index
    %c0_94 = arith.constant 0 : index
    %228 = vector.load %arg8[%c1_92, %c0_93, %c0_94] : memref<2x1x32xf32, #tpu.memory_space<vmem>>, vector<1x1x32xf32>
    %229 = vector.shape_cast %228 : vector<1x1x32xf32> to vector<1x32xf32>
    %c1_95 = arith.constant 1 : index
    %c0_96 = arith.constant 0 : index
    %c0_97 = arith.constant 0 : index
    %230 = vector.load %arg9[%c1_95, %c0_96, %c0_97] : memref<2x1x32xf32, #tpu.memory_space<vmem>>, vector<1x1x32xf32>
    %231 = vector.shape_cast %230 : vector<1x1x32xf32> to vector<1x32xf32>
    %cst_98 = arith.constant dense<0.000000e+00> : vector<8xf32>
    %232 = vector.multi_reduction <add>, %227, %cst_98 [1] : vector<8x32xf32> to vector<8xf32>
    %233 = vector.shape_cast %232 : vector<8xf32> to vector<8x1xf32>
    %cst_99 = arith.constant 3.200000e+01 : f32
    %234 = vector.broadcast %cst_99 : f32 to vector<8x1xf32>
    %235 = arith.divf %233, %234 : vector<8x1xf32>
    %236 = vector.broadcast %235 : vector<8x1xf32> to vector<8x32xf32>
    %237 = arith.subf %227, %236 : vector<8x32xf32>
    %238 = vector.broadcast %235 : vector<8x1xf32> to vector<8x32xf32>
    %239 = arith.subf %227, %238 : vector<8x32xf32>
    %240 = arith.mulf %237, %239 : vector<8x32xf32>
    %cst_100 = arith.constant dense<0.000000e+00> : vector<8xf32>
    %241 = vector.multi_reduction <add>, %240, %cst_100 [1] : vector<8x32xf32> to vector<8xf32>
    %242 = vector.shape_cast %241 : vector<8xf32> to vector<8x1xf32>
    %cst_101 = arith.constant 3.200000e+01 : f32
    %243 = vector.broadcast %cst_101 : f32 to vector<8x1xf32>
    %244 = arith.divf %242, %243 : vector<8x1xf32>
    %245 = vector.broadcast %235 : vector<8x1xf32> to vector<8x32xf32>
    %246 = arith.subf %227, %245 : vector<8x32xf32>
    %cst_102 = arith.constant 9.99999997E-7 : f32
    %247 = vector.broadcast %cst_102 : f32 to vector<8x1xf32>
    %248 = arith.addf %244, %247 : vector<8x1xf32>
    %249 = math.rsqrt %248 : vector<8x1xf32>
    %250 = vector.broadcast %249 : vector<8x1xf32> to vector<8x32xf32>
    %251 = arith.mulf %246, %250 : vector<8x32xf32>
    %252 = vector.broadcast %229 : vector<1x32xf32> to vector<8x32xf32>
    %253 = arith.mulf %251, %252 : vector<8x32xf32>
    %254 = vector.broadcast %231 : vector<1x32xf32> to vector<8x32xf32>
    %255 = arith.addf %253, %254 : vector<8x32xf32>
    %c1_103 = arith.constant 1 : index
    %c0_104 = arith.constant 0 : index
    %c0_105 = arith.constant 0 : index
    %256 = vector.load %arg10[%c1_103, %c0_104, %c0_105] : memref<2x32x128xf32, #tpu.memory_space<vmem>>, vector<1x32x128xf32>
    %257 = vector.shape_cast %256 : vector<1x32x128xf32> to vector<32x128xf32>
    %cst_106 = arith.constant dense<0.000000e+00> : vector<8x128xf32>
    %258 = tpu.matmul %255, %257, %cst_106 {dimension_numbers = #tpu.dot_dimension_numbers<[1], [0], [0], [1], [0, 0, 1, 1], [], []>} : vector<8x32xf32>, vector<32x128xf32>, vector<8x128xf32> -> vector<8x128xf32>
    %c1_107 = arith.constant 1 : index
    %c0_108 = arith.constant 0 : index
    %c0_109 = arith.constant 0 : index
    %259 = vector.load %arg11[%c1_107, %c0_108, %c0_109] : memref<2x1x128xf32, #tpu.memory_space<vmem>>, vector<1x1x128xf32>
    %260 = vector.shape_cast %259 : vector<1x1x128xf32> to vector<1x128xf32>
    %261 = vector.broadcast %260 : vector<1x128xf32> to vector<8x128xf32>
    %262 = arith.addf %258, %261 : vector<8x128xf32>
    %cst_110 = arith.constant 0.000000e+00 : f32
    %263 = vector.broadcast %cst_110 : f32 to vector<8x128xf32>
    %264 = arith.maximumf %262, %263 : vector<8x128xf32>
    %c1_111 = arith.constant 1 : index
    %c0_112 = arith.constant 0 : index
    %c0_113 = arith.constant 0 : index
    %265 = vector.load %arg12[%c1_111, %c0_112, %c0_113] : memref<2x128x32xf32, #tpu.memory_space<vmem>>, vector<1x128x32xf32>
    %266 = vector.shape_cast %265 : vector<1x128x32xf32> to vector<128x32xf32>
    %cst_114 = arith.constant dense<0.000000e+00> : vector<8x32xf32>
    %267 = tpu.matmul %264, %266, %cst_114 {dimension_numbers = #tpu.dot_dimension_numbers<[1], [0], [0], [1], [0, 0, 1, 1], [], []>} : vector<8x128xf32>, vector<128x32xf32>, vector<8x32xf32> -> vector<8x32xf32>
    %c1_115 = arith.constant 1 : index
    %c0_116 = arith.constant 0 : index
    %c0_117 = arith.constant 0 : index
    %268 = vector.load %arg13[%c1_115, %c0_116, %c0_117] : memref<2x1x32xf32, #tpu.memory_space<vmem>>, vector<1x1x32xf32>
    %269 = vector.shape_cast %268 : vector<1x1x32xf32> to vector<1x32xf32>
    %270 = vector.broadcast %269 : vector<1x32xf32> to vector<8x32xf32>
    %271 = arith.addf %267, %270 : vector<8x32xf32>
    %272 = arith.addf %255, %271 : vector<8x32xf32>
    %c1_118 = arith.constant 1 : index
    %c0_119 = arith.constant 0 : index
    %c0_120 = arith.constant 0 : index
    %273 = vector.load %arg14[%c1_118, %c0_119, %c0_120] : memref<2x1x32xf32, #tpu.memory_space<vmem>>, vector<1x1x32xf32>
    %274 = vector.shape_cast %273 : vector<1x1x32xf32> to vector<1x32xf32>
    %c1_121 = arith.constant 1 : index
    %c0_122 = arith.constant 0 : index
    %c0_123 = arith.constant 0 : index
    %275 = vector.load %arg15[%c1_121, %c0_122, %c0_123] : memref<2x1x32xf32, #tpu.memory_space<vmem>>, vector<1x1x32xf32>
    %276 = vector.shape_cast %275 : vector<1x1x32xf32> to vector<1x32xf32>
    %cst_124 = arith.constant dense<0.000000e+00> : vector<8xf32>
    %277 = vector.multi_reduction <add>, %272, %cst_124 [1] : vector<8x32xf32> to vector<8xf32>
    %278 = vector.shape_cast %277 : vector<8xf32> to vector<8x1xf32>
    %cst_125 = arith.constant 3.200000e+01 : f32
    %279 = vector.broadcast %cst_125 : f32 to vector<8x1xf32>
    %280 = arith.divf %278, %279 : vector<8x1xf32>
    %281 = vector.broadcast %280 : vector<8x1xf32> to vector<8x32xf32>
    %282 = arith.subf %272, %281 : vector<8x32xf32>
    %283 = vector.broadcast %280 : vector<8x1xf32> to vector<8x32xf32>
    %284 = arith.subf %272, %283 : vector<8x32xf32>
    %285 = arith.mulf %282, %284 : vector<8x32xf32>
    %cst_126 = arith.constant dense<0.000000e+00> : vector<8xf32>
    %286 = vector.multi_reduction <add>, %285, %cst_126 [1] : vector<8x32xf32> to vector<8xf32>
    %287 = vector.shape_cast %286 : vector<8xf32> to vector<8x1xf32>
    %cst_127 = arith.constant 3.200000e+01 : f32
    %288 = vector.broadcast %cst_127 : f32 to vector<8x1xf32>
    %289 = arith.divf %287, %288 : vector<8x1xf32>
    %290 = vector.broadcast %280 : vector<8x1xf32> to vector<8x32xf32>
    %291 = arith.subf %272, %290 : vector<8x32xf32>
    %cst_128 = arith.constant 9.99999997E-7 : f32
    %292 = vector.broadcast %cst_128 : f32 to vector<8x1xf32>
    %293 = arith.addf %289, %292 : vector<8x1xf32>
    %294 = math.rsqrt %293 : vector<8x1xf32>
    %295 = vector.broadcast %294 : vector<8x1xf32> to vector<8x32xf32>
    %296 = arith.mulf %291, %295 : vector<8x32xf32>
    %297 = vector.broadcast %274 : vector<1x32xf32> to vector<8x32xf32>
    %298 = arith.mulf %296, %297 : vector<8x32xf32>
    %299 = vector.broadcast %276 : vector<1x32xf32> to vector<8x32xf32>
    %300 = arith.addf %298, %299 : vector<8x32xf32>
    %c0_129 = arith.constant 0 : index
    %c0_130 = arith.constant 0 : index
    %301 = vector.load %arg16[%c0_129, %c0_130] : memref<32x64xf32, #tpu.memory_space<vmem>>, vector<32x64xf32>
    %cst_131 = arith.constant dense<0.000000e+00> : vector<8x64xf32>
    %302 = tpu.matmul %300, %301, %cst_131 {dimension_numbers = #tpu.dot_dimension_numbers<[1], [0], [0], [1], [0, 0, 1, 1], [], []>} : vector<8x32xf32>, vector<32x64xf32>, vector<8x64xf32> -> vector<8x64xf32>
    %c0_132 = arith.constant 0 : index
    %c0_133 = arith.constant 0 : index
    %303 = vector.load %arg17[%c0_132, %c0_133] : memref<1x64xf32, #tpu.memory_space<vmem>>, vector<1x64xf32>
    %304 = vector.broadcast %303 : vector<1x64xf32> to vector<8x64xf32>
    %305 = arith.addf %302, %304 : vector<8x64xf32>
    %306 = arith.addf %1, %305 : vector<8x64xf32>
    %c0_134 = arith.constant 0 : index
    %c0_135 = arith.constant 0 : index
    %c0_136 = arith.constant 0 : index
    %307 = vector.load %arg18[%c0_134, %c0_135, %c0_136] : memref<1x8x64xf32, #tpu.memory_space<vmem>>, vector<1x8x64xf32>
    %308 = vector.shape_cast %307 : vector<1x8x64xf32> to vector<8x64xf32>
    %309 = vector.shape_cast %306 : vector<8x64xf32> to vector<1x8x64xf32>
    tpu.vector_store %arg18[%c0_134, %c0_135, %c0_136], %309 {strides = array<i32>} : memref<1x8x64xf32, #tpu.memory_space<vmem>>, vector<1x8x64xf32>,
    return
  }
  func.func @transform_0(%arg0: i32) -> (i32, i32, i32) {
    %c0_i32 = arith.constant 0 : i32
    %c0_i32_0 = arith.constant 0 : i32
    %c0_i32_1 = arith.constant 0 : i32
    return %arg0, %c0_i32, %c0_i32_0 : i32, i32, i32
  }
  func.func @transform_1(%arg0: i32) -> (i32, i32) {
    %c0_i32 = arith.constant 0 : i32
    %c0_i32_0 = arith.constant 0 : i32
    %c0_i32_1 = arith.constant 0 : i32
    return %c0_i32, %c0_i32_0 : i32, i32
  }
  func.func @transform_2(%arg0: i32) -> (i32, i32) {
    %c0_i32 = arith.constant 0 : i32
    %c0_i32_0 = arith.constant 0 : i32
    %c0_i32_1 = arith.constant 0 : i32
    return %c0_i32, %c0_i32_0 : i32, i32
  }
  func.func @transform_3(%arg0: i32) -> (i32, i32, i32) {
    %c0_i32 = arith.constant 0 : i32
    %c0_i32_0 = arith.constant 0 : i32
    %c0_i32_1 = arith.constant 0 : i32
    %c0_i32_2 = arith.constant 0 : i32
    return %c0_i32, %c0_i32_0, %c0_i32_1 : i32, i32, i32
  }
  func.func @transform_4(%arg0: i32) -> (i32, i32, i32) {
    %c0_i32 = arith.constant 0 : i32
    %c0_i32_0 = arith.constant 0 : i32
    %c0_i32_1 = arith.constant 0 : i32
    %c0_i32_2 = arith.constant 0 : i32
    return %c0_i32, %c0_i32_0, %c0_i32_1 : i32, i32, i32
  }
  func.func @transform_5(%arg0: i32) -> (i32, i32, i32) {
    %c0_i32 = arith.constant 0 : i32
    %c0_i32_0 = arith.constant 0 : i32
    %c0_i32_1 = arith.constant 0 : i32
    %c0_i32_2 = arith.constant 0 : i32
    return %c0_i32, %c0_i32_0, %c0_i32_1 : i32, i32, i32
  }
  func.func @transform_6(%arg0: i32) -> (i32, i32, i32) {
    %c0_i32 = arith.constant 0 : i32
    %c0_i32_0 = arith.constant 0 : i32
    %c0_i32_1 = arith.constant 0 : i32
    %c0_i32_2 = arith.constant 0 : i32
    return %c0_i32, %c0_i32_0, %c0_i32_1 : i32, i32, i32
  }
  func.func @transform_7(%arg0: i32) -> (i32, i32, i32) {
    %c0_i32 = arith.constant 0 : i32
    %c0_i32_0 = arith.constant 0 : i32
    %c0_i32_1 = arith.constant 0 : i32
    %c0_i32_2 = arith.constant 0 : i32
    return %c0_i32, %c0_i32_0, %c0_i32_1 : i32, i32, i32
  }
  func.func @transform_8(%arg0: i32) -> (i32, i32, i32) {
    %c0_i32 = arith.constant 0 : i32
    %c0_i32_0 = arith.constant 0 : i32
    %c0_i32_1 = arith.constant 0 : i32
    %c0_i32_2 = arith.constant 0 : i32
    return %c0_i32, %c0_i32_0, %c0_i32_1 : i32, i32, i32
  }
  func.func @transform_9(%arg0: i32) -> (i32, i32, i32) {
    %c0_i32 = arith.constant 0 : i32
    %c0_i32_0 = arith.constant 0 : i32
    %c0_i32_1 = arith.constant 0 : i32
    %c0_i32_2 = arith.constant 0 : i32
    return %c0_i32, %c0_i32_0, %c0_i32_1 : i32, i32, i32
  }
  func.func @transform_10(%arg0: i32) -> (i32, i32, i32) {
    %c0_i32 = arith.constant 0 : i32
    %c0_i32_0 = arith.constant 0 : i32
    %c0_i32_1 = arith.constant 0 : i32
    %c0_i32_2 = arith.constant 0 : i32
    return %c0_i32, %c0_i32_0, %c0_i32_1 : i32, i32, i32
  }
  func.func @transform_11(%arg0: i32) -> (i32, i32, i32) {
    %c0_i32 = arith.constant 0 : i32
    %c0_i32_0 = arith.constant 0 : i32
    %c0_i32_1 = arith.constant 0 : i32
    %c0_i32_2 = arith.constant 0 : i32
    return %c0_i32, %c0_i32_0, %c0_i32_1 : i32, i32, i32
  }
  func.func @transform_12(%arg0: i32) -> (i32, i32, i32) {
    %c0_i32 = arith.constant 0 : i32
    %c0_i32_0 = arith.constant 0 : i32
    %c0_i32_1 = arith.constant 0 : i32
    %c0_i32_2 = arith.constant 0 : i32
    return %c0_i32, %c0_i32_0, %c0_i32_1 : i32, i32, i32
  }
  func.func @transform_13(%arg0: i32) -> (i32, i32, i32) {
    %c0_i32 = arith.constant 0 : i32
    %c0_i32_0 = arith.constant 0 : i32
    %c0_i32_1 = arith.constant 0 : i32
    %c0_i32_2 = arith.constant 0 : i32
    return %c0_i32, %c0_i32_0, %c0_i32_1 : i32, i32, i32
  }
  func.func @transform_14(%arg0: i32) -> (i32, i32, i32) {
    %c0_i32 = arith.constant 0 : i32
    %c0_i32_0 = arith.constant 0 : i32
    %c0_i32_1 = arith.constant 0 : i32
    %c0_i32_2 = arith.constant 0 : i32
    return %c0_i32, %c0_i32_0, %c0_i32_1 : i32, i32, i32
  }
  func.func @transform_15(%arg0: i32) -> (i32, i32) {
    %c0_i32 = arith.constant 0 : i32
    %c0_i32_0 = arith.constant 0 : i32
    %c0_i32_1 = arith.constant 0 : i32
    return %c0_i32, %c0_i32_0 : i32, i32
  }
  func.func @transform_16(%arg0: i32) -> (i32, i32) {
    %c0_i32 = arith.constant 0 : i32
    %c0_i32_0 = arith.constant 0 : i32
    %c0_i32_1 = arith.constant 0 : i32
    return %c0_i32, %c0_i32_0 : i32, i32
  }
  func.func @transform_17(%arg0: i32) -> (i32, i32, i32) {
    %c0_i32 = arith.constant 0 : i32
    %c0_i32_0 = arith.constant 0 : i32
    %c0_i32_1 = arith.constant 0 : i32
    return %arg0, %c0_i32, %c0_i32_0 : i32, i32, i32
  }
}

</mosaic_0001>

<bundles_post_ra>
// kernel: tpu_custom_call.1
= control target key start
LH: loop header
LB: loop body
LE: loop exit
PB: predicated region body
PF: predicated region fallthrough
CT: control target
= control target key end

     0   :  { %s5204_s0 = inlined_call_operand.vmem [shape: f32[2,8,64], index: 0, kind: input, shape index: {}]   ;;  %s5205_s1 = inlined_call_operand.vmem [shape: f32[64,32], index: 1, kind: input, shape index: {}]   ;;  %s5206_s2 = inlined_call_operand.vmem [shape: f32[1,32], index: 2, kind: input, shape index: {}]   ;;  %s5207_s3 = inlined_call_operand.vmem [shape: f32[2,32,32], index: 3, kind: input, shape index: {}]   ;;  %s5208_s4 = inlined_call_operand.vmem [shape: f32[2,32,32], index: 4, kind: input, shape index: {}]   ;;  %s5209_s5 = inlined_call_operand.vmem [shape: f32[2,32,32], index: 5, kind: input, shape index: {}]   ;;  %s5210_s6 = inlined_call_operand.vmem [shape: f32[2,32,32], index: 6, kind: input, shape index: {}]   ;;  %s5211_s7 = inlined_call_operand.vmem [shape: f32[2,1,32], index: 7, kind: input, shape index: {}]   ;;  %s5212_s8 = inlined_call_operand.vmem [shape: f32[2,1,32], index: 8, kind: input, shape index: {}]   ;;  %s5213_s9 = inlined_call_operand.vmem [shape: f32[2,32,128], index: 9, kind: input, shape index: {}]   ;;  %s5214_s10 = inlined_call_operand.vmem [shape: f32[2,1,128], index: 10, kind: input, shape index: {}]   ;;  %s5215_s11 = inlined_call_operand.vmem [shape: f32[2,128,32], index: 11, kind: input, shape index: {}]   ;;  %s5216_s12 = inlined_call_operand.vmem [shape: f32[2,1,32], index: 12, kind: input, shape index: {}]   ;;  %s5217_s13 = inlined_call_operand.vmem [shape: f32[2,1,32], index: 13, kind: input, shape index: {}]   ;;  %s5218_s14 = inlined_call_operand.vmem [shape: f32[2,1,32], index: 14, kind: input, shape index: {}]   ;;  %s5219_s15 = inlined_call_operand.vmem [shape: f32[32,64], index: 15, kind: input, shape index: {}]   ;;  %s5220_s16 = inlined_call_operand.vmem [shape: f32[1,64], index: 16, kind: input, shape index: {}]   ;;  %s5221_s17 = inlined_call_operand.hbm [shape: f32[2,8,64], index: 17, kind: output, shape index: {}]  }
   0x1   :  { %5234 = sst [smem:[#allocation11_spill]] %s5204_s0 }
   0x2   :  { %5235 = sst [smem:[#allocation12_spill]] %s5205_s1 }
   0x3   :  { %5236 = sst [smem:[#allocation13_spill]] %s5221_s17 }
   0x4   :  { %22 = vsyncpa [#allocation3], 0 }
   0x5   :  { %24 = vsyncpa [#allocation3 + $0x1], 0  ;;  %s4563_s24 = smov 0   ;;  %s4565_s25 = smov 0  }
   0x6   :  { %s4567_s26 = smov 0   ;;  %s4569_s27 = smov 0  }
   0x7 LB: > { %5237 = sst [smem:[#allocation5_spill]] %s4452_s24  ;;  %s4584_s28 = sadd.s32 4294967295, %s4464_s27   ;;  %s4464_s27 = sphi %s4569_s27, %s5253_s27   ;;  %s4460_s26 = sphi %s4567_s26, %s5255_s26   ;;  %s4456_s25 = sphi %s4565_s25, %s5257_s25   ;;  %s4452_s24 = sphi %s4563_s24, %s5256_s24  }
   0x8   : > { %5238 = sst [smem:[#allocation6_spill]] %s4460_s26  ;;  %s3650_s29 = sadd.s32 4294967294, %s4464_s27  }
   0x9   : > { %5239 = sst [smem:[#allocation7_spill]] %s4464_s27  ;;  %s4588_s0 = sadd.s32 1, %s4464_s27  }
   0xa   : > { %5240 = sst [smem:[#allocation8_spill]] %s4588_s0  ;;  %s399_s30 = sadd.s32 1, %s4460_s26 }
   0xb   : > { %s396_s18 = ssub.s32 %s4464_s27, %s4588_s0  ;;  %p409_p0 = scmp.ne.s32.totalorder %s4460_s26, %s4456_s25 }
   0xc   : > { %p397_p1 = scmp.eq.s32.totalorder %s396_s18, 0  ;;  %p410_p2 = scmp.eq.s32.totalorder %s4584_s28, 1 }
   0xd   : > { %p415_p3 = scmp.ne.s32.totalorder %s4456_s25, %s4452_s24  ;;  %p416_p4 = scmp.eq.s32.totalorder %s3650_s29, 1 }
   0xe   : > { %s4599_s19 = scalar_select %p397_p1, %s4460_s26, %s399_s30  }
   0xf   : > { %p4601_p5 = por %p410_p2, %p409_p0  ;;  %p4605_p6 = por %p416_p4, %p415_p3 }
  0x10   : > { %5241 = sst [smem:[#allocation9_spill]] %s4599_s19  ;;  %p3653_p7 = scmp.ge.s32.totalorder %s4464_s27, 1 }
  0x11   : > { %s5243_s20 = scalar_select %p4605_p6, 1, 0 }
  0x12   : > { %p489_p8 = scmp.lt.s32.totalorder %s4464_s27, 3 }
  0x13   : > { %5244 = sst [smem:[#allocation10_spill]] %s5243_s20 }
  0x14   : > { %p490_p9 = pnand %p3653_p7, %p489_p8 }
  0x15   : > { %s5245_s23 = sld [smem:[#allocation12_spill]] (!%p490_p9)  ;;  %v4466_v3 = vmov (!%p490_p9), 0.0|0.0   ;;  %vm4467_vm0 = vmmov (!%p490_p9), 0   ;;  %v4468_v6 = vmov (!%p490_p9), 0.0   ;;  %p540_p10 = scmp.lt.s32.totalorder (!%p490_p9), %s4584_s28, 1  ;;  %v712_v8 = vld [vmem:[%s5208_s4] sm:$0xff] (!%p490_p9) }
  0x16   : > { %493 = sbr.rel (%p490_p9) target bundleno = 5248 (0x1480), region = 88  ;;  %4202 = vmatprep.subr.bf16.mxu0 (!%p490_p9), %v4466_v3  ;;  %3910 = vmatprep.mubr.msk.f32.mxu0 (!%p490_p9), %vm4467_vm0, %v4468_v6  ;;  %v713_v9 = vld [vmem:[%s5208_s4 + $0x8] sm:$0xff] (!%p490_p9)  ;;  %s5246_s18 = sld [smem:[#allocation11_spill]] (!%p490_p9)  ;;  %v634_v17 = vld [vmem:[%s5207_s3] sm:$0xff] (!%p490_p9)  ;;  %vm560_vm1 = vcmask (!%p490_p9), 523264   ;;  %v636_v21 = vld [vmem:[%s5207_s3 + $0x10] sm:$0xff] (!%p490_p9) }
  0x17   : > { %4220 = vmatprep.subr.bf16.mxu1 (!%p490_p9), %v4466_v3  ;;  %3932 = vmatprep.mubr.msk.f32.mxu1 (!%p490_p9), %vm4467_vm0, %v4468_v6  ;;  %v4221_v12 = vpack.c.bf16 (!%p490_p9), %v713_v9, %v712_v8  ;;  %v635_v18 = vld [vmem:[%s5207_s3 + $0x8] sm:$0xff] (!%p490_p9)  ;;  %v637_v22 = vld [vmem:[%s5207_s3 + $0x18] sm:$0xff] (!%p490_p9)  ;;  %v714_v24 = vld [vmem:[%s5208_s4 + $0x10] sm:$0xff] (!%p490_p9)  ;;  %vm638_vm2 = vcmask (!%p490_p9), 261120   ;;  %vm884_vm3 = vcmask (!%p490_p9), 64512   ;;  %s5232_s30 = smov (!%p490_p9), 112  }
  0x18   : > { %v4215_v20 = vpack.c.bf16 (!%p490_p9), %v635_v18, %v634_v17  ;;  %v4218_v23 = vpack.c.bf16 (!%p490_p9), %v637_v22, %v636_v21  ;;  %v715_v25 = vld [vmem:[%s5208_s4 + $0x18] sm:$0xff] (!%p490_p9)  ;;  %v786_v27 = vld [vmem:[%s5209_s5] sm:$0xff] (!%p490_p9)  ;;  %v787_v28 = vld [vmem:[%s5209_s5 + $0x8] sm:$0xff] (!%p490_p9)  ;;  %s5230_s19 = smov (!%p490_p9), 104   ;;  %s5247_s0 = smov (!%p490_p9), 112  }
  0x19   : > { %4222 = vmatpush3.bf16.msra.mxu1 (!%p490_p9), %v4221_v12  ;;  %v4224_v26 = vpack.c.bf16 (!%p490_p9), %v715_v25, %v714_v24  ;;  %v3656_v29 = vld [vmem:[%s5206_s2] ss:$0 sm:$0xff] (!%p490_p9)  ;;  %v4227_v31 = vpack.c.bf16 (!%p490_p9), %v787_v28, %v786_v27  ;;  %v788_v34 = vld [vmem:[%s5209_s5 + $0x10] sm:$0xff] (!%p490_p9)  ;;  %v789_v35 = vld [vmem:[%s5209_s5 + $0x18] sm:$0xff] (!%p490_p9)  ;;  %s537_s27 = sand.u32 (!%p490_p9), 1, %s4456_s25   ;;  %s3755_s21 = sshll.u32 (!%p490_p9), %s4584_s28, 7 }
  0x1a   : > { %4223 = vmatprep.subr.bf16.mxu1 (!%p490_p9), %v4466_v3  ;;  %v4230_v36 = vpack.c.bf16 (!%p490_p9), %v789_v35, %v788_v34  ;;  %s3578_s29 = scalar_lea.sflag (!%p490_p9), [#allocation3], %s537_s27 }
  0x1b   : > { %v545_v0 = vld [vmem:[%s5245_s23] sm:$0xff] (!%p490_p9)  ;;  %v546_v1 = vld [vmem:[%s5245_s23 + $0x8] sm:$0xff] (!%p490_p9)  ;;  %v547_v2 = vld [vmem:[%s5245_s23 + $0x10] sm:$0xff] (!%p490_p9) }
  0x1c   : > { %v4203_v4 = vpack.c.bf16 (!%p490_p9), %v546_v1, %v545_v0  ;;  %v548_v5 = vld [vmem:[%s5245_s23 + $0x18] sm:$0xff] (!%p490_p9)  ;;  %v549_v10 = vld [vmem:[%s5245_s23 + $0x20] sm:$0xff] (!%p490_p9)  ;;  %v550_v11 = vld [vmem:[%s5245_s23 + $0x28] sm:$0xff] (!%p490_p9) }
  0x1d   : > { %v4206_v7 = vpack.c.bf16 %v548_v5, %v547_v2  ;;  %s541_s20 = scalar_select %p540_p10, %s4584_s28, 1  ;;  %v4209_v13 = vpack.c.bf16 %v550_v11, %v549_v10  ;;  %v551_v14 = vld [vmem:[%s5245_s23 + $0x30] sm:$0xff]  ;;  %v552_v15 = vld [vmem:[%s5245_s23 + $0x38] sm:$0xff]  ;;  %4225 = vmatpush3.bf16.msra.mxu1 %v4224_v26 }
  0x1e   : > { %4204 = vmatpush3.bf16.msra.mxu0 %v4203_v4  ;;  %v4212_v16 = vpack.c.bf16 %v552_v15, %v551_v14  ;;  %3946 = vmatprep.subr.mxu1 %v4468_v6 }
  0x1f   : > { %4205 = vmatprep.subr.bf16.mxu0 %v4466_v3  ;;  %s3655_s22 = sshll.u32 %s541_s20, 3 }
  0x20   : > { %s4656_s24 = scalar_lea.vmem %s5246_s18, %s3655_s22  ;;  %s4470_s18 = smov 120  }
  0x21   : > { %v544_v19 = vld [vmem:[%s4656_s24] sm:$0xff]  ;;  %s5248_s22 = smov 104  }
  0x22   : > { %4207 = vmatpush3.bf16.msra.mxu0 %v4206_v7 }
  0x23   : > { %4208 = vmatprep.subr.bf16.mxu0 %v4466_v3 }
  0x26   : > { %4210 = vmatpush3.bf16.msra.mxu0 %v4209_v13 }
  0x27   : > { %4211 = vmatprep.subr.bf16.mxu0 %v4466_v3 }
  0x2a   : > { %4213 = vmatpush3.bf16.msra.mxu0 %v4212_v16 }
  0x2b   : > { %4214 = vmatprep.subr.bf16.mxu0 %v4466_v3 }
  0x2d   : > { %3911 = vmatmul.mubr.msk.f32.vlgmr.msra.gmra.mrb[0].mxu0 %vm560_vm1, %v544_v19 }
  0x2e   : > { %4216 = vmatpush3.bf16.msra.mxu0 %v4215_v20  ;;  %3921 = vmatprep.mubr.msk.f32.mxu0 %vm4467_vm0, %v4468_v6 }
  0x2f   : > { %4217 = vmatprep.subr.bf16.mxu0 %v4466_v3 }
  0x32   : > { %4219 = vmatpush3.bf16.msra.mxu0 %v4218_v23 }
  0x33   : > { %4226 = vmatprep.subr.bf16.mxu0 %v4466_v3 }
 0x100   : > { %v630_v30 = vpop.f32.mrb[0].mxu0 }
 0x101   : > { %v4693_v32 = vadd.f32 %v3656_v29, %v630_v30  ;;  %v3912_v33 = vpop.f32.mrb[1].mxu0 }
 0x103   : > { %3922 = vmatmul.mubr.msk.f32.vlgmr.msra.gmra.mrb[2].mxu0 %vm638_vm2, %v4693_v32  ;;  %3933 = vmatmul.mubr.msk.f32.vlgmr.msra.gmra.mrb[0].mxu1 %vm638_vm2, %v4693_v32 }
 0x104   : > { %4228 = vmatpush3.bf16.msra.mxu0 %v4227_v31  ;;  %3943 = vmatprep.mubr.msk.f32.mxu0 %vm4467_vm0, %v4468_v6 }
 0x105   : > { %4229 = vmatprep.subr.bf16.mxu0 %v4466_v3  ;;  %3948 = vmatprep.mubr.msk.f32.mxu1 %vm4467_vm0, %v4468_v6 }
 0x108   : > { %4231 = vmatpush3.bf16.msra.mxu0 %v4230_v36 }
 0x109   : > { %3956 = vmatprep.subr.mxu0 %v4468_v6 }
 0x10b   : > { %3944 = vmatmul.mubr.msk.f32.vlgmr.msra.gmra.mrb[4].mxu0 %vm638_vm2, %v4693_v32 }
 0x10c   : > { %3958 = vmatprep.mubr.msk.f32.mxu0 %vm4467_vm0, %v4468_v6 }
 0x1d6   : > { %v708_v37 = vpop.f32.mrb[2].mxu0  ;;  %v782_v38 = vpop.f32.mrb[0].mxu1 }
 0x1d7   : > { %870 = vrot.lane.b32.xlu1 %v782_v38, %s5232_s30  ;;  %868 = vrot.lane.b32.xlu0 %v782_v38, %s4470_s18  ;;  %v3923_v39 = vpop.f32.mrb[3].mxu0  ;;  %v3934_v40 = vpop.f32.mrb[1].mxu1 }
 0x1d8   : > { %3947 = vmatpush3.xpose.msk.msra.mxu1 %vm884_vm3, %v782_v38  ;;  %v1521_v39 = vld [vmem:[%s5210_s6] sm:$0xff]  ;;  %v1522_v40 = vld [vmem:[%s5210_s6 + $0x8] sm:$0xff] }
 0x1d9   : > { %3951 = vmatprep.subr.mxu1 %v4468_v6 }
 0x1db   : > { %3949 = vmatmul.mubr.msk.f32.vlgmr.msra.gmra.mrb[2].mxu1 %vm884_vm3, %v708_v37  ;;  %872 = vrot.lane.b32.xlu1 %v782_v38, %s5230_s19 }
 0x1dc   : > { %861 = vrot.lane.b32.xlu0 %v708_v37, %s4470_s18  ;;  %3953 = vmatprep.mubr.msk.f32.mxu1 %vm4467_vm0, %v4468_v6 }
 0x1de   : > { %v4724_v41 = vpop.f32.mrb[4].mxu0 }
 0x1df   : > { %v3945_v42 = vpop.f32.mrb[5].mxu0  ;;  %865 = vrot.lane.b32.xlu1 %v708_v37, %s5230_s19 }
 0x1e0   : > { %863 = vrot.lane.b32.xlu0 %v708_v37, %s5232_s30 }
 0x249   : > { %v871_v43 = vpop.permute.xlu1 %870  ;;  %v869_v44 = vpop.permute.xlu0 %868 }
 0x24a   : > { %3952 = vmatpush3.xpose.msk.msra.mxu1 %vm884_vm3, %v869_v44  ;;  %3957 = vmatpush3.xpose.msk.msra.mxu0 %vm884_vm3, %v871_v43  ;;  %v1523_v44 = vld [vmem:[%s5210_s6 + $0x10] sm:$0xff] }
 0x24b   : > { %3961 = vmatprep.subr.mxu1 %v4468_v6  ;;  %3966 = vmatprep.subr.mxu0 %v4468_v6 }
 0x24d   : > { %v873_v45 = vpop.permute.xlu1 %872 }
 0x24e   : > { %v862_v46 = vpop.permute.xlu0 %861 }
 0x24f   : > { %3954 = vmatmul.mubr.msk.f32.vlgmr.msra.gmra.mrb[4].mxu1 %vm884_vm3, %v862_v46 }
 0x250   : > { %3962 = vmatpush3.xpose.msk.msra.mxu1 %vm884_vm3, %v873_v45  ;;  %3963 = vmatprep.mubr.msk.f32.mxu1 %vm4467_vm0, %v4468_v6 }
 0x251   : > { %v866_v47 = vpop.permute.xlu1 %865  ;;  %3971 = vmatprep.subr.mxu1 %v4468_v6 }
 0x252   : > { %v864_v48 = vpop.permute.xlu0 %863 }
 0x253   : > { %3959 = vmatmul.mubr.msk.f32.vlgmr.msra.gmra.mrb[6].mxu0 %vm884_vm3, %v864_v48  ;;  %3964 = vmatmul.mubr.msk.f32.vlgmr.msra.gmra.mrb[6].mxu1 %vm884_vm3, %v866_v47 }
 0x254   : > { %3967 = vmatpush3.msra.mxu0 %v4724_v41  ;;  %3968 = vmatprep.mubr.msk.f32.mxu0 %vm4467_vm0, %v4468_v6 }
 0x255   : > { %3976 = vmatprep.subr.mxu0 %v4468_v6  ;;  %3973 = vmatprep.mubr.msk.f32.mxu1 %vm4467_vm0, %v4468_v6 }
 0x2ae   : > { %v955_v49 = vpop.f32.mrb[2].mxu1 }
 0x2af   : > { %v1181_v50 = vmul.f32 0.35355338, %v955_v49  ;;  %v3950_v51 = vpop.f32.mrb[3].mxu1 }
 0x2b1   : > { %v1185_v52 = vsel %vm884_vm3, %v1181_v50, -inf }
 0x2b2   : > { %1186 = vmax.xlane.f32.xlu0 %v1185_v52 }
 0x322   : > { %v1029_v53 = vpop.f32.mrb[4].mxu1 }
 0x323   : > { %v1182_v54 = vmul.f32 0.35355338, %v1029_v53  ;;  %v3955_v55 = vpop.f32.mrb[5].mxu1 }
 0x325   : > { %v1188_v56 = vsel %vm884_vm3, %v1182_v54, -inf }
 0x326   : > { %1189 = vmax.xlane.f32.xlu1 %v1188_v56  ;;  %v1103_v57 = vpop.f32.mrb[6].mxu0  ;;  %v1177_v58 = vpop.f32.mrb[6].mxu1 }
 0x327   : > { %v1183_v59 = vmul.f32 0.35355338, %v1103_v57  ;;  %v3960_v60 = vpop.f32.mrb[7].mxu0  ;;  %v3965_v61 = vpop.f32.mrb[7].mxu1  ;;  %v1184_v62 = vmul.f32 0.35355338, %v1177_v58 }
 0x329   : > { %v1191_v63 = vsel %vm884_vm3, %v1183_v59, -inf  ;;  %v1194_v0 = vsel %vm884_vm3, %v1184_v62, -inf }
 0x32a   : > { %1192 = vmax.xlane.f32.xlu0 %v1191_v63 }
 0x32e   : > { %1195 = vmax.xlane.f32.xlu0 %v1194_v0 }
 0x337   : > { %875 = vrot.lane.b32.xlu1 %v4724_v41, %s4470_s18 }
 0x33f   : > { %v1187_v1 = vpop.xlane.xlu0 %1186 }
 0x340   : > { %v1197_v2 = vsub.f32 %v1181_v50, %v1187_v1 }
 0x342   : > { %v1201_v4 = vmul.f32 1.442695, %v1197_v2 }
 0x344   : > { %4361 = vpow2.f32 %v1201_v4 }
 0x34e   : > { %v4362_v5 = vpop.eup %4361 }
 0x34f   : > { %v1209_v7 = vsel %vm884_vm3, %v4362_v5, 0.0 }
 0x35b   : > { %1210 = vadd.xlane.f32.xlu1 %v1209_v7  ;;  %v1850_v7 = vld [vmem:[%s5213_s9] sm:$0xff] }
 0x3b3   : > { %v1190_v8 = vpop.xlane.xlu1 %1189 }
 0x3b4   : > { %v1198_v9 = vsub.f32 %v1182_v54, %v1190_v8  ;;  %v1851_v8 = vld [vmem:[%s5213_s9 + $0x8] sm:$0xff] }
 0x3b6   : > { %v1203_v10 = vmul.f32 1.442695, %v1198_v9  ;;  %v4233_v9 = vpack.c.bf16 %v1851_v8, %v1850_v7 }
 0x3b7   : > { %v876_v11 = vpop.permute.xlu1 %875  ;;  %v1193_v12 = vpop.xlane.xlu0 %1192 }
 0x3b8   : > { %4363 = vpow2.f32 %v1203_v10  ;;  %v1199_v13 = vsub.f32 %v1183_v59, %v1193_v12  ;;  %3972 = vmatpush3.msra.mxu1 %v876_v11  ;;  %v1853_v10 = vld [vmem:[%s5213_s9 + $0x18] sm:$0xff]  ;;  %v1935_v12 = vld [vmem:[%s5215_s11] sm:$0xff] }
 0x3b9   : > { %3981 = vmatprep.subr.mxu1 %v4468_v6 }
 0x3ba   : > { %v1205_v14 = vmul.f32 1.442695, %v1199_v13  ;;  %v1936_v13 = vld [vmem:[%s5215_s11 + $0x8] sm:$0xff] }
 0x3bb   : > { %v1196_v15 = vpop.xlane.xlu0 %1195 }
 0x3bc   : > { %4365 = vpow2.f32 %v1205_v14  ;;  %v1200_v16 = vsub.f32 %v1184_v62, %v1196_v15  ;;  %v1937_v14 = vld [vmem:[%s5215_s11 + $0x10] sm:$0xff]  ;;  %v4239_v15 = vpack.c.bf16 %v1936_v13, %v1935_v12  ;;  %v3690_v12 = vld [vmem:[%s5208_s4 + $0x28] sm:$0xff]  ;;  %v3683_v13 = vld [vmem:[%s5218_s14] ss:$0 sm:$0xff] }
 0x3be   : > { %v1207_v17 = vmul.f32 1.442695, %v1200_v16  ;;  %v1938_v16 = vld [vmem:[%s5215_s11 + $0x18] sm:$0xff] }
 0x3c0   : > { %4367 = vpow2.f32 %v1207_v17  ;;  %v4242_v17 = vpack.c.bf16 %v1938_v16, %v1937_v14 }
 0x3c2   : > { %v4364_v18 = vpop.eup %4363 }
 0x3c3   : > { %v1212_v19 = vsel %vm884_vm3, %v4364_v18, 0.0 }
 0x3c4   : > { %1213 = vadd.xlane.f32.xlu0 %v1212_v19  ;;  %v1940_v19 = vld [vmem:[%s5215_s11 + $0x28] sm:$0xff] }
 0x3c6   : > { %v4366_v20 = vpop.eup %4365 }
 0x3c7   : > { %v1215_v21 = vsel %vm884_vm3, %v4366_v20, 0.0 }
 0x3c8   : > { %1216 = vadd.xlane.f32.xlu1 %v1215_v21  ;;  %v1941_v21 = vld [vmem:[%s5215_s11 + $0x30] sm:$0xff] }
 0x3ca   : > { %v4368_v22 = vpop.eup %4367 }
 0x3cb   : > { %v1218_v23 = vsel %vm884_vm3, %v4368_v22, 0.0 }
 0x3cc   : > { %1219 = vadd.xlane.f32.xlu0 %v1218_v23 }
 0x3d9   : > { %881 = vrot.lane.b32.xlu1 %v4724_v41, %s5230_s19  ;;  %s3654_s19 = sshll.u32 %s537_s27, 3 }
 0x3da   : > { %s539_s20 = scalar_lea.vmem [#allocation2], %s3654_s19 }
 0x3db   : > { %s3591_s26 = sshll.u32 %s539_s20, 4  ;;  %s5163_s26 = int_to_ptr.vmem [resolvable:$true] %s3591_s26 }
 0x3dc   : > { %s4402_s28 = scalar_lea.vmem %s5163_s26, 128 }
 0x3dd   : > { %p4403_p11 = scmp.ne.s32.totalorder %s5163_s26, %s4402_s28 }
 0x3df   : > { %p4404_p12 = pnand %p4403_p11, %p4601_p5 }
 0x3e1   : > { %p4405_p13 = pneg %p4404_p12 }
 0x3e2   : > { %878 = vrot.lane.b32.xlu0 %v4724_v41, %s5232_s30  ;;  %v1524_v41 = vld [vmem:[%s5210_s6 + $0x18] sm:$0xff] }
 0x3e8   : > { %v1211_v24 = vpop.xlane.xlu1 %1210 }
 0x3e9   : > { %4369 = vrcp.f32 %v1211_v24  ;;  %v1943_v24 = vld [vmem:[%s5215_s11 + $0x40] sm:$0xff] }
 0x3f3   : > { %v4370_v25 = vpop.eup %4369 }
 0x3f4   : > { %v1225_v26 = vmul.f32 %v4370_v25, %v4362_v5  ;;  %v1944_v25 = vld [vmem:[%s5215_s11 + $0x48] sm:$0xff] }
 0x3f6   : > { %3969 = vmatmul.mubr.msk.f32.vlgmr.msra.gmra.mrb[8].mxu0 %vm884_vm3, %v1225_v26  ;;  %v4251_v26 = vpack.c.bf16 %v1944_v25, %v1943_v24  ;;  %v3697_v24 = vld [vmem:[%s5209_s5 + $0x38] sm:$0xff] }
 0x3f7   : > { %3978 = vmatprep.mubr.msk.f32.mxu0 %vm4467_vm0, %v4468_v6 }
 0x451   : > { %v1214_v27 = vpop.xlane.xlu0 %1213 }
 0x452   : > { %4371 = vrcp.f32 %v1214_v27  ;;  %v1945_v27 = vld [vmem:[%s5215_s11 + $0x50] sm:$0xff] }
 0x455   : > { %v1217_v28 = vpop.xlane.xlu1 %1216 }
 0x456   : > { %4373 = vrcp.f32 %v1217_v28  ;;  %v1946_v28 = vld [vmem:[%s5215_s11 + $0x58] sm:$0xff] }
 0x459   : > { %v1220_v29 = vpop.xlane.xlu0 %1219  ;;  %v882_v34 = vpop.permute.xlu1 %881 }
 0x45a   : > { %4375 = vrcp.f32 %v1220_v29  ;;  %v4254_v29 = vpack.c.bf16 %v1946_v28, %v1945_v27 }
 0x45c   : > { %v4372_v30 = vpop.eup %4371 }
 0x45d   : > { %v1226_v31 = vmul.f32 %v4372_v30, %v4364_v18  ;;  %v879_v33 = vpop.permute.xlu0 %878  ;;  %v1939_v18 = vld [vmem:[%s5215_s11 + $0x20] sm:$0xff] }
 0x45e   : > { %3977 = vmatpush3.msra.mxu0 %v879_v33  ;;  %v1947_v30 = vld [vmem:[%s5215_s11 + $0x60] sm:$0xff] }
 0x45f   : > { %3974 = vmatmul.mubr.msk.f32.vlgmr.msra.gmra.mrb[8].mxu1 %vm884_vm3, %v1226_v31  ;;  %3986 = vmatprep.subr.mxu0 %v4468_v6  ;;  %v1948_v31 = vld [vmem:[%s5215_s11 + $0x68] sm:$0xff] }
 0x460   : > { %v4374_v35 = vpop.eup %4373  ;;  %3982 = vmatpush3.msra.mxu1 %v882_v34  ;;  %3983 = vmatprep.mubr.msk.f32.mxu1 %vm4467_vm0, %v4468_v6  ;;  %v4257_v33 = vpack.c.bf16 %v1948_v31, %v1947_v30 }
 0x461   : > { %v1227_v36 = vmul.f32 %v4374_v35, %v4366_v20  ;;  %3991 = vmatprep.subr.mxu1 %v4468_v6  ;;  %v4245_v20 = vpack.c.bf16 %v1940_v19, %v1939_v18  ;;  %v3692_v18 = vld [vmem:[%s5208_s4 + $0x38] sm:$0xff] }
 0x463   : > { %3979 = vmatmul.mubr.msk.f32.vlgmr.msra.gmra.mrb[10].mxu0 %vm884_vm3, %v1227_v36 }
 0x464   : > { %v4376_v37 = vpop.eup %4375  ;;  %3988 = vmatprep.mubr.msk.f32.mxu0 %vm4467_vm0, %v4468_v6  ;;  %3987 = vmatpush3.msra.mxu0 %v1522_v40  ;;  %v3678_v40 = vld [vmem:[%s5212_s8] ss:$0 sm:$0xff] }
 0x465   : > { %v1228_v38 = vmul.f32 %v4376_v37, %v4368_v22  ;;  %3996 = vmatprep.subr.mxu0 %v4468_v6  ;;  %v1942_v22 = vld [vmem:[%s5215_s11 + $0x38] sm:$0xff] }
 0x466   : > { %v4248_v23 = vpack.c.bf16 %v1942_v22, %v1941_v21  ;;  %v3695_v21 = vld [vmem:[%s5209_s5 + $0x28] sm:$0xff] }
 0x467   : > { %3984 = vmatmul.mubr.msk.f32.vlgmr.msra.gmra.mrb[10].mxu1 %vm884_vm3, %v1228_v38  ;;  %v3677_v38 = vld [vmem:[%s5211_s7] ss:$0 sm:$0xff] }
 0x468   : > { %3992 = vmatpush3.msra.mxu1 %v1521_v39  ;;  %3993 = vmatprep.mubr.msk.f32.mxu1 %vm4467_vm0, %v4468_v6 }
 0x469   : > { %4001 = vmatprep.subr.mxu1 %v4468_v6 }
 0x4c9   : > { %v1298_v42 = vpop.f32.mrb[8].mxu0 }
 0x4ca   : > { %v3970_v43 = vpop.f32.mrb[9].mxu0  ;;  %3994 = vmatmul.mubr.msk.f32.vlgmr.msra.gmra.mrb[12].mxu1 %vm884_vm3, %v1298_v42 }
 0x4cb   : > { %4002 = vmatpush3.msra.mxu1 %v1524_v41  ;;  %4003 = vmatprep.mubr.msk.f32.mxu1 %vm4467_vm0, %v4468_v6  ;;  %v1949_v43 = vld [vmem:[%s5215_s11 + $0x70] sm:$0xff] }
 0x4cc   : > { %4238 = vmatprep.subr.bf16.mxu1 %v4466_v3 }
 0x532   : > { %v1371_v45 = vpop.f32.mrb[8].mxu1 }
 0x533   : > { %v3975_v46 = vpop.f32.mrb[9].mxu1  ;;  %3989 = vmatmul.mubr.msk.f32.vlgmr.msra.gmra.mrb[12].mxu0 %vm884_vm3, %v1371_v45 }
 0x534   : > { %3997 = vmatpush3.msra.mxu0 %v1523_v44  ;;  %3998 = vmatprep.mubr.msk.f32.mxu0 %vm4467_vm0, %v4468_v6  ;;  %v1950_v44 = vld [vmem:[%s5215_s11 + $0x78] sm:$0xff]  ;;  %v3679_v46 = vld [vmem:[%s5214_s10] ss:$0 sm:$0xff] }
 0x535   : > { %4232 = vmatprep.subr.bf16.mxu0 %v4466_v3  ;;  %v4260_v45 = vpack.c.bf16 %v1950_v44, %v1949_v43 }
 0x536   : > { %v1444_v47 = vpop.f32.mrb[10].mxu0 }
 0x537   : > { %v3980_v48 = vpop.f32.mrb[11].mxu0  ;;  %3999 = vmatmul.mubr.msk.f32.vlgmr.msra.gmra.mrb[14].mxu0 %vm884_vm3, %v1444_v47 }
 0x538   : > { %4014 = vmatprep.mubr.msk.f32.mxu0 %vm4467_vm0, %v4468_v6  ;;  %4234 = vmatpush3.bf16.msra.mxu0 %v4233_v9 }
 0x539   : > { %4235 = vmatprep.subr.bf16.mxu0 %v4466_v3 }
 0x53a   : > { %v1517_v49 = vpop.f32.mrb[10].mxu1 }
 0x53b   : > { %v3985_v50 = vpop.f32.mrb[11].mxu1  ;;  %4004 = vmatmul.mubr.msk.f32.vlgmr.msra.gmra.mrb[14].mxu1 %vm884_vm3, %v1517_v49 }
 0x53c   : > { %4049 = vmatprep.mubr.msk.f32.mxu1 %vm4467_vm0, %v4468_v6  ;;  %4240 = vmatpush3.bf16.msra.mxu1 %v4239_v15 }
 0x53d   : > { %4241 = vmatprep.subr.bf16.mxu1 %v4466_v3 }
 0x540   : > { %4243 = vmatpush3.bf16.msra.mxu1 %v4242_v17  ;;  %v3691_v17 = vld [vmem:[%s5208_s4 + $0x30] sm:$0xff] }
 0x541   : > { %4244 = vmatprep.subr.bf16.mxu1 %v4466_v3  ;;  %v4272_v19 = vpack.c.bf16 %v3692_v18, %v3691_v17 }
 0x544   : > { %4246 = vmatpush3.bf16.msra.mxu1 %v4245_v20  ;;  %v3694_v20 = vld [vmem:[%s5209_s5 + $0x20] sm:$0xff] }
 0x545   : > { %4247 = vmatprep.subr.bf16.mxu1 %v4466_v3  ;;  %v4275_v22 = vpack.c.bf16 %v3695_v21, %v3694_v20 }
 0x548   : > { %4249 = vmatpush3.bf16.msra.mxu1 %v4248_v23  ;;  %v3696_v23 = vld [vmem:[%s5209_s5 + $0x30] sm:$0xff] }
 0x549   : > { %4250 = vmatprep.subr.bf16.mxu1 %v4466_v3  ;;  %v4278_v25 = vpack.c.bf16 %v3697_v24, %v3696_v23 }
 0x54c   : > { %4252 = vmatpush3.bf16.msra.mxu1 %v4251_v26 }
 0x54d   : > { %4253 = vmatprep.subr.bf16.mxu1 %v4466_v3 }
 0x550   : > { %4255 = vmatpush3.bf16.msra.mxu1 %v4254_v29 }
 0x551   : > { %4256 = vmatprep.subr.bf16.mxu1 %v4466_v3 }
 0x554   : > { %4258 = vmatpush3.bf16.msra.mxu1 %v4257_v33 }
 0x555   : > { %4259 = vmatprep.subr.bf16.mxu1 %v4466_v3 }
 0x558   : > { %4261 = vmatpush3.bf16.msra.mxu1 %v4260_v45 }
 0x559   : > { %4090 = vmatprep.subr.mxu1 %v4468_v6 }
 0x59d   : > { %v1667_v51 = vpop.f32.mrb[12].mxu1 }
 0x59e   : > { %v3995_v52 = vpop.f32.mrb[13].mxu1 }
 0x606   : > { %v1594_v53 = vpop.f32.mrb[12].mxu0 }
 0x607   : > { %v1668_v54 = vadd.f32 %v1667_v51, %v1594_v53  ;;  %v3990_v55 = vpop.f32.mrb[13].mxu0  ;;  %v3681_v51 = vld [vmem:[%s5216_s12] ss:$0 sm:$0xff] }
 0x60a   : > { %v1740_v56 = vpop.f32.mrb[14].mxu0 }
 0x60b   : > { %v1744_v57 = vadd.f32 %v1740_v56, %v1668_v54  ;;  %v4000_v58 = vpop.f32.mrb[15].mxu0 }
 0x60e   : > { %v1814_v59 = vpop.f32.mrb[14].mxu1 }
 0x60f   : > { %v1818_v60 = vadd.f32 %v1814_v59, %v1744_v57  ;;  %v4005_v61 = vpop.f32.mrb[15].mxu1 }
 0x611   : > { %v1819_v62 = vadd.f32 %v1818_v60, %v4693_v32  ;;  %v1852_v32 = vld [vmem:[%s5213_s9 + $0x10] sm:$0xff] }
 0x612   : > { %v4236_v11 = vpack.c.bf16 %v1853_v10, %v1852_v32  ;;  %v3682_v32 = vld [vmem:[%s5217_s13] ss:$0 sm:$0xff] }
 0x613   : > { %v1822_v63 = vsel %vm638_vm2, %v1819_v62, 0.0 }
 0x614   : > { %1823 = vadd.xlane.f32.xlu1 %v1822_v63  ;;  %4237 = vmatpush3.bf16.msra.mxu0 %v4236_v11  ;;  %v3685_v63 = vld [vmem:[%s5207_s3 + $0x28] sm:$0xff]  ;;  %v3689_v11 = vld [vmem:[%s5208_s4 + $0x20] sm:$0xff] }
 0x615   : > { %4262 = vmatprep.subr.bf16.mxu0 %v4466_v3  ;;  %v4269_v15 = vpack.c.bf16 %v3690_v12, %v3689_v11 }
 0x6a1   : > { %v1824_v0 = vpop.xlane.xlu1 %1823 }
 0x6a2   : > { %v1826_v1 = vmul.f32 0.03125, %v1824_v0 }
 0x6a4   : > { %v1827_v2 = vsub.f32 %v1819_v62, %v1826_v1  ;;  %v3684_v62 = vld [vmem:[%s5207_s3 + $0x20] sm:$0xff]  ;;  %v3686_v1 = vld [vmem:[%s5207_s3 + $0x30] sm:$0xff] }
 0x6a5   : > { %v4263_v0 = vpack.c.bf16 %v3685_v63, %v3684_v62 }
 0x6a6   : > { %v1828_v4 = vmul.f32 %v1827_v2, %v1827_v2 }
 0x6a8   : > { %v1829_v5 = vsel %vm638_vm2, %v1828_v4, 0.0 }
 0x6a9   : > { %1830 = vadd.xlane.f32.xlu0 %v1829_v5 }
 0x736   : > { %v1831_v34 = vpop.xlane.xlu0 %1830 }
 0x737   : > { %v1832_v35 = vmul.f32 0.03125, %v1831_v34 }
 0x739   : > { %v1833_v36 = vadd.f32 1e-06, %v1832_v35 }
 0x73b   : > { %4377 = vrsqrt.f32 %v1833_v36 }
 0x745   : > { %v4378_v37 = vpop.eup %4377 }
 0x746   : > { %v1835_v39 = vmul.f32 %v4378_v37, %v1827_v2  ;;  %v3687_v2 = vld [vmem:[%s5207_s3 + $0x38] sm:$0xff] }
 0x747   : > { %v4266_v4 = vpack.c.bf16 %v3687_v2, %v3686_v1 }
 0x748   : > { %v1842_v41 = vmul.f32 %v3677_v38, %v1835_v39 }
 0x74a   : > { %v1849_v42 = vadd.f32 %v3678_v40, %v1842_v41 }
 0x74c   : > { %4015 = vmatmul.mubr.msk.f32.vlgmr.msra.gmra.mrb[16].mxu0 %vm638_vm2, %v1849_v42 }
 0x74d   : > { %4060 = vmatprep.mubr.msk.f32.mxu0 %vm4467_vm0, %v4468_v6  ;;  %4264 = vmatpush3.bf16.msra.mxu0 %v4263_v0 }
 0x74e   : > { %4265 = vmatprep.subr.bf16.mxu0 %v4466_v3 }
 0x751   : > { %4267 = vmatpush3.bf16.msra.mxu0 %v4266_v4 }
 0x752   : > { %4268 = vmatprep.subr.bf16.mxu0 %v4466_v3 }
 0x81f   : > { %v1930_v47 = vpop.f32.mrb[16].mxu0 }
 0x820   : > { %v1931_v48 = vadd.f32 %v3679_v46, %v1930_v47  ;;  %v4016_v49 = vpop.f32.mrb[17].mxu0 }
 0x822   : > { %v1934_v50 = vmax.f32 %v1931_v48, 0.0 }
 0x824   : > { %4050 = vmatmul.mubr.f32.vlgmr.msra.gmra.mrb[16].mxu1 %v1934_v50 }
 0x825   : > { %4092 = vmatprep.mubr.msk.f32.mxu1 %vm4467_vm0, %v4468_v6 }
 0x8f7   : > { %v2024_v52 = vpop.f32.mrb[16].mxu1 }
 0x8f8   : > { %v2025_v53 = vadd.f32 %v3681_v51, %v2024_v52  ;;  %v4051_v54 = vpop.f32.mrb[17].mxu1 }
 0x8fa   : > { %v2028_v55 = vadd.f32 %v2025_v53, %v1849_v42 }
 0x8fc   : > { %v2031_v56 = vsel %vm638_vm2, %v2028_v55, 0.0 }
 0x8fd   : > { %2032 = vadd.xlane.f32.xlu0 %v2031_v56 }
 0x98a   : > { %v2033_v57 = vpop.xlane.xlu0 %2032 }
 0x98b   : > { %v2034_v58 = vmul.f32 0.03125, %v2033_v57 }
 0x98d   : > { %v2035_v59 = vsub.f32 %v2028_v55, %v2034_v58 }
 0x98f   : > { %v2036_v60 = vmul.f32 %v2035_v59, %v2035_v59 }
 0x991   : > { %v2037_v61 = vsel %vm638_vm2, %v2036_v60, 0.0 }
 0x992   : > { %2038 = vadd.xlane.f32.xlu1 %v2037_v61 }
 0xa1f   : > { %v2039_v5 = vpop.xlane.xlu1 %2038 }
 0xa20   : > { %v2040_v7 = vmul.f32 0.03125, %v2039_v5 }
 0xa22   : > { %v2041_v8 = vadd.f32 1e-06, %v2040_v7 }
 0xa24   : > { %4379 = vrsqrt.f32 %v2041_v8 }
 0xa2e   : > { %v4380_v9 = vpop.eup %4379 }
 0xa2f   : > { %v2043_v10 = vmul.f32 %v4380_v9, %v2035_v59 }
 0xa31   : > { %v2050_v14 = vmul.f32 %v3682_v32, %v2043_v10 }
 0xa33   : > { %v4920_v16 = vadd.f32 %v3683_v13, %v2050_v14 }
 0xa35   : > { %4061 = vmatmul.mubr.msk.f32.vlgmr.msra.gmra.mrb[18].mxu0 %vm638_vm2, %v4920_v16 }
 0xa36   : > { %4270 = vmatpush3.bf16.msra.mxu0 %v4269_v15  ;;  %4071 = vmatprep.mubr.msk.f32.mxu0 %vm4467_vm0, %v4468_v6 }
 0xa37   : > { %4271 = vmatprep.subr.bf16.mxu0 %v4466_v3 }
 0xa3a   : > { %4273 = vmatpush3.bf16.msra.mxu0 %v4272_v19 }
 0xa3b   : > { %4274 = vmatprep.subr.bf16.mxu0 %v4466_v3 }
 0xa3d   : > { %4072 = vmatmul.mubr.msk.f32.vlgmr.msra.gmra.mrb[20].mxu0 %vm638_vm2, %v4920_v16 }
 0xa3e   : > { %4276 = vmatpush3.bf16.msra.mxu0 %v4275_v22  ;;  %4082 = vmatprep.mubr.msk.f32.mxu0 %vm4467_vm0, %v4468_v6 }
 0xa3f   : > { %4277 = vmatprep.subr.bf16.mxu0 %v4466_v3 }
 0xa42   : > { %4279 = vmatpush3.bf16.msra.mxu0 %v4278_v25 }
 0xa43   : > { %4085 = vmatprep.subr.mxu0 %v4468_v6 }
 0xa45   : > { %4083 = vmatmul.mubr.msk.f32.vlgmr.msra.gmra.mrb[22].mxu0 %vm638_vm2, %v4920_v16 }
 0xa46   : > { %4087 = vmatprep.mubr.msk.f32.mxu0 %vm4467_vm0, %v4468_v6 }
 0xb08   : > { %v2132_v26 = vpop.f32.mrb[18].mxu0 }
 0xb09   : > { %2287 = vrot.lane.b32.xlu1 %v2132_v26, %s4470_s18  ;;  %v4062_v27 = vpop.f32.mrb[19].mxu0 }
 0xb10   : > { %v2207_v28 = vpop.f32.mrb[20].mxu0 }
 0xb11   : > { %2296 = vrot.lane.b32.xlu1 %v2207_v28, %s5247_s0  ;;  %2294 = vrot.lane.b32.xlu0 %v2207_v28, %s4470_s18  ;;  %v4073_v29 = vpop.f32.mrb[21].mxu0 }
 0xb12   : > { %4086 = vmatpush3.xpose.msk.msra.mxu0 %vm884_vm3, %v2207_v28  ;;  %v3712_v29 = vld [vmem:[%s5210_s6 + $0x28] sm:$0xff] }
 0xb13   : > { %4095 = vmatprep.subr.mxu0 %v4468_v6 }
 0xb15   : > { %4088 = vmatmul.mubr.msk.f32.vlgmr.msra.gmra.mrb[24].mxu0 %vm884_vm3, %v2132_v26  ;;  %2289 = vrot.lane.b32.xlu1 %v2132_v26, %s5247_s0 }
 0xb16   : > { %2298 = vrot.lane.b32.xlu0 %v2207_v28, %s5248_s22  ;;  %4097 = vmatprep.mubr.msk.f32.mxu0 %vm4467_vm0, %v4468_v6  ;;  %v3711_v28 = vld [vmem:[%s5210_s6 + $0x20] sm:$0xff] }
 0xb18   : > { %v4966_v30 = vpop.f32.mrb[22].mxu0 }
 0xb19   : > { %v4084_v31 = vpop.f32.mrb[23].mxu0 }
 0xb1a   : > { %2291 = vrot.lane.b32.xlu0 %v2132_v26, %s5248_s22 }
 0xb7b   : > { %v2288_v33 = vpop.permute.xlu1 %2287 }
 0xb83   : > { %v2297_v34 = vpop.permute.xlu1 %2296  ;;  %v2295_v35 = vpop.permute.xlu0 %2294 }
 0xb84   : > { %4091 = vmatpush3.xpose.msk.msra.mxu1 %vm884_vm3, %v2295_v35  ;;  %4096 = vmatpush3.xpose.msk.msra.mxu0 %vm884_vm3, %v2297_v34  ;;  %v3713_v34 = vld [vmem:[%s5210_s6 + $0x30] sm:$0xff] }
 0xb85   : > { %4100 = vmatprep.subr.mxu1 %v4468_v6  ;;  %4105 = vmatprep.subr.mxu0 %v4468_v6 }
 0xb87   : > { %v2290_v36 = vpop.permute.xlu1 %2289  ;;  %4093 = vmatmul.mubr.msk.f32.vlgmr.msra.gmra.mrb[18].mxu1 %vm884_vm3, %v2288_v33 }
 0xb88   : > { %v2299_v37 = vpop.permute.xlu0 %2298  ;;  %4098 = vmatmul.mubr.msk.f32.vlgmr.msra.gmra.mrb[26].mxu0 %vm884_vm3, %v2290_v36  ;;  %4102 = vmatprep.mubr.msk.f32.mxu1 %vm4467_vm0, %v4468_v6 }
 0xb89   : > { %4101 = vmatpush3.xpose.msk.msra.mxu1 %vm884_vm3, %v2299_v37  ;;  %4106 = vmatpush3.msra.mxu0 %v4966_v30 }
 0xb8a   : > { %4107 = vmatprep.mubr.msk.f32.mxu0 %vm4467_vm0, %v4468_v6  ;;  %4115 = vmatprep.subr.mxu0 %v4468_v6 }
 0xb8b   : > { %4110 = vmatprep.subr.mxu1 %v4468_v6 }
 0xb8c   : > { %v2292_v38 = vpop.permute.xlu0 %2291 }
 0xb8d   : > { %4103 = vmatmul.mubr.msk.f32.vlgmr.msra.gmra.mrb[20].mxu1 %vm884_vm3, %v2292_v38 }
 0xb8e   : > { %4112 = vmatprep.mubr.msk.f32.mxu1 %vm4467_vm0, %v4468_v6 }
 0xbe8   : > { %v2380_v39 = vpop.f32.mrb[24].mxu0 }
 0xbe9   : > { %v2606_v40 = vmul.f32 0.35355338, %v2380_v39  ;;  %v4089_v41 = vpop.f32.mrb[25].mxu0 }
 0xbeb   : > { %v2610_v42 = vsel %vm884_vm3, %v2606_v40, -inf }
 0xbec   : > { %2611 = vmax.xlane.f32.xlu1 %v2610_v42 }
 0xc5a   : > { %v2454_v43 = vpop.f32.mrb[18].mxu1 }
 0xc5b   : > { %v2607_v44 = vmul.f32 0.35355338, %v2454_v43  ;;  %v4094_v45 = vpop.f32.mrb[19].mxu1  ;;  %v2528_v46 = vpop.f32.mrb[26].mxu0 }
 0xc5c   : > { %v4099_v47 = vpop.f32.mrb[27].mxu0  ;;  %v2608_v48 = vmul.f32 0.35355338, %v2528_v46 }
 0xc5d   : > { %v2613_v49 = vsel %vm884_vm3, %v2607_v44, -inf }
 0xc5e   : > { %2614 = vmax.xlane.f32.xlu0 %v2613_v49  ;;  %v2616_v53 = vsel %vm884_vm3, %v2608_v48, -inf }
 0xc60   : > { %v2602_v50 = vpop.f32.mrb[20].mxu1 }
 0xc61   : > { %v2609_v51 = vmul.f32 0.35355338, %v2602_v50  ;;  %v4104_v52 = vpop.f32.mrb[21].mxu1 }
 0xc62   : > { %2617 = vmax.xlane.f32.xlu0 %v2616_v53 }
 0xc63   : > { %v2619_v54 = vsel %vm884_vm3, %v2609_v51, -inf }
 0xc64   : > { %2620 = vmax.xlane.f32.xlu1 %v2619_v54 }
 0xc79   : > { %v2612_v55 = vpop.xlane.xlu1 %2611 }
 0xc7a   : > { %v2622_v56 = vsub.f32 %v2606_v40, %v2612_v55 }
 0xc7c   : > { %v2626_v57 = vmul.f32 1.442695, %v2622_v56 }
 0xc7e   : > { %4381 = vpow2.f32 %v2626_v57 }
 0xc88   : > { %v4382_v58 = vpop.eup %4381 }
 0xc89   : > { %v2634_v59 = vsel %vm884_vm3, %v4382_v58, 0.0 }
 0xc8a   : > { %2635 = vadd.xlane.f32.xlu0 %v2634_v59  ;;  %v3723_v59 = vld [vmem:[%s5213_s9 + $0x20] sm:$0xff] }
 0xceb   : > { %v2615_v60 = vpop.xlane.xlu0 %2614 }
 0xcec   : > { %v2623_v61 = vsub.f32 %v2607_v44, %v2615_v60  ;;  %v3724_v60 = vld [vmem:[%s5213_s9 + $0x28] sm:$0xff] }
 0xcee   : > { %v2628_v62 = vmul.f32 1.442695, %v2623_v61  ;;  %v4281_v61 = vpack.c.bf16 %v3724_v60, %v3723_v59 }
 0xcef   : > { %v2618_v63 = vpop.xlane.xlu0 %2617 }
 0xcf0   : > { %4383 = vpow2.f32 %v2628_v62  ;;  %v2624_v0 = vsub.f32 %v2608_v48, %v2618_v63  ;;  %v3726_v62 = vld [vmem:[%s5213_s9 + $0x38] sm:$0xff] }
 0xcf1   : > { %v2621_v9 = vpop.xlane.xlu1 %2620 }
 0xcf2   : > { %v2630_v1 = vmul.f32 1.442695, %v2624_v0  ;;  %v2625_v32 = vsub.f32 %v2609_v51, %v2621_v9  ;;  %v3730_v0 = vld [vmem:[%s5215_s11 + $0x80] sm:$0xff]  ;;  %v3735_v9 = vld [vmem:[%s5215_s11 + $0xa8] sm:$0xff] }
 0xcf4   : > { %4385 = vpow2.f32 %v2630_v1  ;;  %v2632_v10 = vmul.f32 1.442695, %v2625_v32  ;;  %v3731_v1 = vld [vmem:[%s5215_s11 + $0x88] sm:$0xff] }
 0xcfa   : > { %v4384_v2 = vpop.eup %4383 }
 0xcfb   : > { %v2637_v4 = vsel %vm884_vm3, %v4384_v2, 0.0 }
 0xcfc   : > { %2638 = vadd.xlane.f32.xlu1 %v2637_v4  ;;  %v4287_v4 = vpack.c.bf16 %v3731_v1, %v3730_v0  ;;  %v3752_v0 = vld [vmem:[%s5220_s16] ss:$0 sm:$0xff] }
 0xcfe   : > { %v4386_v5 = vpop.eup %4385 }
 0xcff   : > { %v2640_v7 = vsel %vm884_vm3, %v4386_v5, 0.0 }
 0xd00   : > { %2641 = vadd.xlane.f32.xlu0 %v2640_v7 }
 0xd0d   : > { %2304 = vrot.lane.b32.xlu1 %v4966_v30, %s5247_s0 }
 0xd16   : > { %2301 = vrot.lane.b32.xlu0 %v4966_v30, %s4470_s18  ;;  %s5249_s18 = sld [smem:[#allocation13_spill]] }
 0xd17   : > { %v2636_v8 = vpop.xlane.xlu0 %2635 }
 0xd18   : > { %4387 = vrcp.f32 %v2636_v8  ;;  %v3734_v8 = vld [vmem:[%s5215_s11 + $0xa0] sm:$0xff] }
 0xd19   : > { %4389 = vpow2.f32 %v2632_v10  ;;  %v4293_v32 = vpack.c.bf16 %v3735_v9, %v3734_v8  ;;  %v3736_v10 = vld [vmem:[%s5215_s11 + $0xb0] sm:$0xff] }
 0xd1c   : > { %s5161_s17 = scalar_lea.hbm %s5249_s18, %s3755_s21 }
 0xd22   : > { %v4388_v11 = vpop.eup %4387 }
 0xd23   : > { %v2650_v12 = vmul.f32 %v4388_v11, %v4382_v58  ;;  %v4390_v13 = vpop.eup %4389  ;;  %v3737_v11 = vld [vmem:[%s5215_s11 + $0xb8] sm:$0xff] }
 0xd24   : > { %v2643_v14 = vsel %vm884_vm3, %v4390_v13, 0.0 }
 0xd25   : > { %4108 = vmatmul.mubr.msk.f32.vlgmr.msra.gmra.mrb[28].mxu0 %vm884_vm3, %v2650_v12  ;;  %v4296_v12 = vpack.c.bf16 %v3737_v11, %v3736_v10 }
 0xd26   : > { %4117 = vmatprep.mubr.msk.f32.mxu0 %vm4467_vm0, %v4468_v6 }
 0xd31   : > { %2644 = vadd.xlane.f32.xlu1 %v2643_v14  ;;  %v3739_v14 = vld [vmem:[%s5215_s11 + $0xc8] sm:$0xff] }
 0xd42   : > { %2307 = vrot.lane.b32.xlu1 %v4966_v30, %s5248_s22  ;;  %v3714_v30 = vld [vmem:[%s5210_s6 + $0x38] sm:$0xff] }
 0xd89   : > { %v2639_v15 = vpop.xlane.xlu1 %2638 }
 0xd8a   : > { %4391 = vrcp.f32 %v2639_v15 }
 0xd8d   : > { %v2305_v17 = vpop.permute.xlu1 %2304  ;;  %v2642_v18 = vpop.xlane.xlu0 %2641 }
 0xd8e   : > { %4393 = vrcp.f32 %v2642_v18  ;;  %4116 = vmatpush3.msra.mxu0 %v2305_v17  ;;  %v3740_v17 = vld [vmem:[%s5215_s11 + $0xd0] sm:$0xff]  ;;  %v3741_v18 = vld [vmem:[%s5215_s11 + $0xd8] sm:$0xff] }
 0xd8f   : > { %4125 = vmatprep.subr.mxu0 %v4468_v6 }
 0xd91   : > { %v2302_v19 = vpop.permute.xlu0 %2301 }
 0xd92   : > { %4111 = vmatpush3.msra.mxu1 %v2302_v19  ;;  %v4302_v19 = vpack.c.bf16 %v3741_v18, %v3740_v17 }
 0xd93   : > { %4120 = vmatprep.subr.mxu1 %v4468_v6 }
 0xd94   : > { %v4392_v20 = vpop.eup %4391 }
 0xd95   : > { %v2651_v21 = vmul.f32 %v4392_v20, %v4384_v2  ;;  %v3732_v2 = vld [vmem:[%s5215_s11 + $0x90] sm:$0xff]  ;;  %v3742_v20 = vld [vmem:[%s5215_s11 + $0xe0] sm:$0xff] }
 0xd97   : > { %4113 = vmatmul.mubr.msk.f32.vlgmr.msra.gmra.mrb[22].mxu1 %vm884_vm3, %v2651_v21  ;;  %v3743_v21 = vld [vmem:[%s5215_s11 + $0xe8] sm:$0xff] }
 0xd98   : > { %v4394_v22 = vpop.eup %4393  ;;  %4122 = vmatprep.mubr.msk.f32.mxu1 %vm4467_vm0, %v4468_v6 }
 0xd99   : > { %v2652_v23 = vmul.f32 %v4394_v22, %v4386_v5  ;;  %v3733_v5 = vld [vmem:[%s5215_s11 + $0x98] sm:$0xff]  ;;  %v4305_v22 = vpack.c.bf16 %v3743_v21, %v3742_v20 }
 0xd9a   : > { %v4290_v7 = vpack.c.bf16 %v3733_v5, %v3732_v2  ;;  %v4401_v5 = vld [vmem:[%s4656_s24] sm:$0xff]  ;;  %s4472_s24 = smov [#allocation2]  }
 0xd9b   : > { %4118 = vmatmul.mubr.msk.f32.vlgmr.msra.gmra.mrb[30].mxu0 %vm884_vm3, %v2652_v23  ;;  %s4406_s19 = sshll.u32 %s4472_s24, 4  ;;  %s4407_s19 = int_to_ptr.vmem [resolvable:$false] %s4406_s19 }
 0xd9c   : > { %4127 = vmatprep.mubr.msk.f32.mxu0 %vm4467_vm0, %v4468_v6  ;;  %4126 = vmatpush3.msra.mxu0 %v3712_v29  ;;  %v3722_v29 = vld [vmem:[%s5212_s8 + $0x1] ss:$0 sm:$0xff]  ;;  %s4408_s30 = scalar_lea.vmem %s4407_s19, 256  ;;  %p4409_p0 = scmp.lt.s32.totalorder %s5163_s26, %s4407_s19 }
 0xd9d   : > { %4135 = vmatprep.subr.mxu0 %v4468_v6  ;;  %p4410_p1 = scmp.lt.s32.totalorder %s4408_s30, %s4402_s28 }
 0xd9f   : > { %p4411_p2 = por %p4410_p1, %p4409_p0 }
 0xda1   : > { %p4412_p3 = pnand %p4411_p2, %p4405_p13 }
 0xdbe   : > { %v2645_v24 = vpop.xlane.xlu1 %2644 }
 0xdbf   : > { %4395 = vrcp.f32 %v2645_v24 }
 0xdc2   : > { %v2308_v25 = vpop.permute.xlu1 %2307 }
 0xdc3   : > { %4121 = vmatpush3.msra.mxu1 %v2308_v25 }
 0xdc4   : > { %4130 = vmatprep.subr.mxu1 %v4468_v6 }
 0xdc9   : > { %v4396_v26 = vpop.eup %4395 }
 0xdca   : > { %v2653_v27 = vmul.f32 %v4396_v26, %v4390_v13  ;;  %v3738_v13 = vld [vmem:[%s5215_s11 + $0xc0] sm:$0xff] }
 0xdcb   : > { %v4299_v15 = vpack.c.bf16 %v3739_v14, %v3738_v13 }
 0xdcc   : > { %4123 = vmatmul.mubr.msk.f32.vlgmr.msra.gmra.mrb[24].mxu1 %vm884_vm3, %v2653_v27  ;;  %v3721_v27 = vld [vmem:[%s5211_s7 + $0x1] ss:$0 sm:$0xff] }
 0xdcd   : > { %4131 = vmatpush3.msra.mxu1 %v3711_v28  ;;  %4132 = vmatprep.mubr.msk.f32.mxu1 %vm4467_vm0, %v4468_v6 }
 0xdce   : > { %4140 = vmatprep.subr.mxu1 %v4468_v6 }
 0xdf8   : > { %v2723_v31 = vpop.f32.mrb[28].mxu0 }
 0xdf9   : > { %v4109_v33 = vpop.f32.mrb[29].mxu0  ;;  %4133 = vmatmul.mubr.msk.f32.vlgmr.msra.gmra.mrb[26].mxu1 %vm884_vm3, %v2723_v31 }
 0xdfa   : > { %4141 = vmatpush3.msra.mxu1 %v3714_v30  ;;  %4142 = vmatprep.mubr.msk.f32.mxu1 %vm4467_vm0, %v4468_v6  ;;  %v3744_v33 = vld [vmem:[%s5215_s11 + $0xf0] sm:$0xff] }
 0xdfb   : > { %4286 = vmatprep.subr.bf16.mxu1 %v4466_v3 }
 0xe6a   : > { %v2796_v35 = vpop.f32.mrb[22].mxu1 }
 0xe6b   : > { %v4114_v36 = vpop.f32.mrb[23].mxu1  ;;  %4128 = vmatmul.mubr.msk.f32.vlgmr.msra.gmra.mrb[32].mxu0 %vm884_vm3, %v2796_v35 }
 0xe6c   : > { %4136 = vmatpush3.msra.mxu0 %v3713_v34  ;;  %4137 = vmatprep.mubr.msk.f32.mxu0 %vm4467_vm0, %v4468_v6  ;;  %v3745_v34 = vld [vmem:[%s5215_s11 + $0xf8] sm:$0xff]  ;;  %v3728_v36 = vld [vmem:[%s5214_s10 + $0x1] ss:$0 sm:$0xff] }
 0xe6d   : > { %4280 = vmatprep.subr.bf16.mxu0 %v4466_v3  ;;  %v4308_v35 = vpack.c.bf16 %v3745_v34, %v3744_v33 }
 0xe6e   : > { %v2869_v37 = vpop.f32.mrb[30].mxu0 }
 0xe6f   : > { %v4119_v38 = vpop.f32.mrb[31].mxu0  ;;  %4138 = vmatmul.mubr.msk.f32.vlgmr.msra.gmra.mrb[34].mxu0 %vm884_vm3, %v2869_v37 }
 0xe70   : > { %4153 = vmatprep.mubr.msk.f32.mxu0 %vm4467_vm0, %v4468_v6  ;;  %4282 = vmatpush3.bf16.msra.mxu0 %v4281_v61 }
 0xe71   : > { %4283 = vmatprep.subr.bf16.mxu0 %v4466_v3 }
 0xe9f   : > { %v2942_v39 = vpop.f32.mrb[24].mxu1 }
 0xea0   : > { %v4124_v40 = vpop.f32.mrb[25].mxu1  ;;  %4143 = vmatmul.mubr.msk.f32.vlgmr.msra.gmra.mrb[28].mxu1 %vm884_vm3, %v2942_v39 }
 0xea1   : > { %4188 = vmatprep.mubr.msk.f32.mxu1 %vm4467_vm0, %v4468_v6  ;;  %4288 = vmatpush3.bf16.msra.mxu1 %v4287_v4 }
 0xea2   : > { %4289 = vmatprep.subr.bf16.mxu1 %v4466_v3 }
 0xea5   : > { %4291 = vmatpush3.bf16.msra.mxu1 %v4290_v7 }
 0xea6   : > { %4292 = vmatprep.subr.bf16.mxu1 %v4466_v3 }
 0xea9   : > { %4294 = vmatpush3.bf16.msra.mxu1 %v4293_v32 }
 0xeaa   : > { %4295 = vmatprep.subr.bf16.mxu1 %v4466_v3 }
 0xead   : > { %4297 = vmatpush3.bf16.msra.mxu1 %v4296_v12 }
 0xeae   : > { %4298 = vmatprep.subr.bf16.mxu1 %v4466_v3 }
 0xeb1   : > { %4300 = vmatpush3.bf16.msra.mxu1 %v4299_v15 }
 0xeb2   : > { %4301 = vmatprep.subr.bf16.mxu1 %v4466_v3 }
 0xeb5   : > { %4303 = vmatpush3.bf16.msra.mxu1 %v4302_v19 }
 0xeb6   : > { %4304 = vmatprep.subr.bf16.mxu1 %v4466_v3 }
 0xeb9   : > { %4306 = vmatpush3.bf16.msra.mxu1 %v4305_v22 }
 0xeba   : > { %4307 = vmatprep.subr.bf16.mxu1 %v4466_v3 }
 0xebd   : > { %4309 = vmatpush3.bf16.msra.mxu1 %v4308_v35 }
 0xecc   : > { %v3093_v41 = vpop.f32.mrb[26].mxu1 }
 0xecd   : > { %v4134_v42 = vpop.f32.mrb[27].mxu1 }
 0xf3e   : > { %v3020_v43 = vpop.f32.mrb[32].mxu0 }
 0xf3f   : > { %v3094_v44 = vadd.f32 %v3093_v41, %v3020_v43  ;;  %v4129_v45 = vpop.f32.mrb[33].mxu0 }
 0xf42   : > { %v3166_v46 = vpop.f32.mrb[34].mxu0 }
 0xf43   : > { %v3170_v47 = vadd.f32 %v3166_v46, %v3094_v44  ;;  %v4139_v48 = vpop.f32.mrb[35].mxu0 }
 0xf73   : > { %v3240_v49 = vpop.f32.mrb[28].mxu1 }
 0xf74   : > { %v3244_v50 = vadd.f32 %v3240_v49, %v3170_v47  ;;  %v4144_v51 = vpop.f32.mrb[29].mxu1 }
 0xf75   : > { %v3491_v51 = vld [vmem:[%s5219_s15] sm:$0xff] }
 0xf76   : > { %v3245_v52 = vadd.f32 %v3244_v50, %v4920_v16  ;;  %v3725_v16 = vld [vmem:[%s5213_s9 + $0x30] sm:$0xff] }
 0xf77   : > { %v4284_v63 = vpack.c.bf16 %v3726_v62, %v3725_v16  ;;  %v3751_v16 = vld [vmem:[%s5218_s14 + $0x1] ss:$0 sm:$0xff] }
 0xf78   : > { %v3250_v53 = vsel %vm638_vm2, %v3245_v52, 0.0 }
 0xf79   : > { %3251 = vadd.xlane.f32.xlu0 %v3250_v53  ;;  %4285 = vmatpush3.bf16.msra.mxu0 %v4284_v63 }
 0xf7a   : > { %4310 = vmatprep.subr.bf16.mxu0 %v4466_v3 }
0x1006   : > { %v3252_v54 = vpop.xlane.xlu0 %3251 }
0x1007   : > { %v3253_v55 = vmul.f32 0.03125, %v3252_v54  ;;  %v3493_v54 = vld [vmem:[%s5219_s15 + $0x10] sm:$0xff] }
0x1009   : > { %v3254_v56 = vsub.f32 %v3245_v52, %v3253_v55  ;;  %v3492_v52 = vld [vmem:[%s5219_s15 + $0x8] sm:$0xff]  ;;  %v3494_v55 = vld [vmem:[%s5219_s15 + $0x18] sm:$0xff] }
0x100a   : > { %v4311_v53 = vpack.c.bf16 %v3492_v52, %v3491_v51 }
0x100b   : > { %v3255_v57 = vmul.f32 %v3254_v56, %v3254_v56 }
0x100d   : > { %v3256_v58 = vsel %vm638_vm2, %v3255_v57, 0.0 }
0x100e   : > { %3257 = vadd.xlane.f32.xlu1 %v3256_v58 }
0x109b   : > { %v3258_v23 = vpop.xlane.xlu1 %3257 }
0x109c   : > { %v3259_v24 = vmul.f32 0.03125, %v3258_v23 }
0x109e   : > { %v3260_v25 = vadd.f32 1e-06, %v3259_v24 }
0x10a0   : > { %4397 = vrsqrt.f32 %v3260_v25 }
0x10aa   : > { %v4398_v26 = vpop.eup %4397 }
0x10ab   : > { %v3262_v28 = vmul.f32 %v4398_v26, %v3254_v56  ;;  %v4314_v56 = vpack.c.bf16 %v3494_v55, %v3493_v54 }
0x10ad   : > { %v3269_v30 = vmul.f32 %v3721_v27, %v3262_v28 }
0x10af   : > { %v3276_v31 = vadd.f32 %v3722_v29, %v3269_v30 }
0x10b1   : > { %4154 = vmatmul.mubr.msk.f32.vlgmr.msra.gmra.mrb[36].mxu0 %vm638_vm2, %v3276_v31 }
0x10b2   : > { %4199 = vmatprep.mubr.msk.f32.mxu0 %vm4467_vm0, %v4468_v6  ;;  %v3747_v6 = vld [vmem:[%s5216_s12 + $0x1] ss:$0 sm:$0xff]  ;;  %4312 = vmatpush3.bf16.msra.mxu0 %v4311_v53 }
0x10b3   : > { %4313 = vmatprep.subr.bf16.mxu0 %v4466_v3  ;;  %v3750_v3 = vld [vmem:[%s5217_s13 + $0x1] ss:$0 sm:$0xff] }
0x10b6   : > { %4315 = vmatpush3.bf16.msra.mxu0 %v4314_v56 }
0x1184   : > { %v3359_v37 = vpop.f32.mrb[36].mxu0 }
0x1185   : > { %v3360_v38 = vadd.f32 %v3728_v36, %v3359_v37  ;;  %v4155_v39 = vpop.f32.mrb[37].mxu0 }
0x1187   : > { %v3363_v40 = vmax.f32 %v3360_v38, 0.0 }
0x1189   : > { %4189 = vmatmul.mubr.f32.vlgmr.msra.gmra.mrb[30].mxu1 %v3363_v40 }
0x125c   : > { %v3455_v41 = vpop.f32.mrb[30].mxu1 }
0x125d   : > { %v3456_v42 = vadd.f32 %v3747_v6, %v3455_v41  ;;  %v4190_v43 = vpop.f32.mrb[31].mxu1 }
0x125f   : > { %v3459_v44 = vadd.f32 %v3456_v42, %v3276_v31 }
0x1261   : > { %v3464_v45 = vsel %vm638_vm2, %v3459_v44, 0.0 }
0x1262   : > { %3465 = vadd.xlane.f32.xlu0 %v3464_v45 }
0x12ef   : > { %v3466_v46 = vpop.xlane.xlu0 %3465 }
0x12f0   : > { %v3467_v47 = vmul.f32 0.03125, %v3466_v46 }
0x12f2   : > { %v3468_v48 = vsub.f32 %v3459_v44, %v3467_v47 }
0x12f4   : > { %v3469_v49 = vmul.f32 %v3468_v48, %v3468_v48 }
0x12f6   : > { %v3470_v50 = vsel %vm638_vm2, %v3469_v49, 0.0 }
0x12f7   : > { %3471 = vadd.xlane.f32.xlu0 %v3470_v50 }
0x1384   : > { %v3472_v57 = vpop.xlane.xlu0 %3471 }
0x1385   : > { %v3473_v58 = vmul.f32 0.03125, %v3472_v57 }
0x1387   : > { %v3474_v59 = vadd.f32 1e-06, %v3473_v58 }
0x1389   : > { %4399 = vrsqrt.f32 %v3474_v59 }
0x1393   : > { %v4400_v60 = vpop.eup %4399 }
0x1394   : > { %v3476_v61 = vmul.f32 %v4400_v60, %v3468_v48 }
0x1396   : > { %v3483_v62 = vmul.f32 %v3750_v3, %v3476_v61 }
0x1398   : > { %v3490_v63 = vadd.f32 %v3751_v16, %v3483_v62 }
0x139a   : > { %4200 = vmatmul.mubr.msk.f32.vlgmr.msra.gmra.mrb[38].mxu0 %vm638_vm2, %v3490_v63 }
0x146d   : > { %v3571_v1 = vpop.f32.mrb[38].mxu0 }
0x146e   : > { %v3572_v2 = vadd.f32 %v3752_v0, %v3571_v1  ;;  %v4201_v4 = vpop.f32.mrb[39].mxu0 }
0x1470   : > { %v3575_v7 = vadd.f32 %v4401_v5, %v3572_v2 }
0x1472   : > { %3576 = vst.msk [vmem:[%s539_s20] sm:$0xff] %vm560_vm1, %v3575_v7 }
0x1473   : > { %4415 = shalt.err (!%p4412_p3)
}
0x1474   : > { %s4416_s27 = scalar_lea.hbm %s5161_s17, 128  ;;  %s4420_s0 = scalar_lea.hbm %s5249_s18, 256 }
0x1475   : > { %p4417_p4 = scmp.ne.s32.totalorder %s5161_s17, %s4416_s27  ;;  %p4421_p9 = scmp.lt.u32.totalorder %s5161_s17, %s5249_s18 }
0x1476   : > { %p4422_p10 = scmp.lt.u32.totalorder %s4420_s0, %s4416_s27  ;;  %p4424_p12 = scmp.lt.u32.totalorder %s4416_s27, %s5161_s17 }
0x1477   : > { %p4418_p7 = pnand %p4417_p4, %p4601_p5 }
0x1478   : > { %p4423_p11 = por %p4422_p10, %p4421_p9 }
0x1479   : > { %p4419_p8 = pneg %p4418_p7 }
0x147a   : > { %p4425_p13 = por %p4424_p12, %p4423_p11 }
0x147c   : > { %p4426_p0 = pnand %p4425_p13, %p4419_p8 }
0x147e   : > { %4429 = shalt.err (!%p4426_p0)
}
0x147f   : > { %4316 = dma.vmem_to_hbm [thread:$0]  (%p4601_p5), %s5163_s26, 128, %s5161_s17, %s3578_s29  }
0x1480 PF: > { %s5250_s28 = sld [smem:[#allocation7_spill]]  ;;  %s5251_s19 = sld [smem:[#allocation5_spill]] }
0x1486   : > { %p4322_p1 = scmp.ge.s32.totalorder %s5250_s28, 2  ;;  %s3603_s21 = sand.u32 1, %s5251_s19  }
0x1487   : > { %s3604_s20 = scalar_lea.sflag [#allocation3], %s3603_s21 }
0x1488   : > { %p4319_p2 = pnand %p4322_p1, %p4605_p6 }
0x148a   : > { %4447 = dma.done.wait (!%p4319_p2), %s3604_s20, 128  }
0x148b   : > { %4449 = vsyncadd (!%p4319_p2), %s3604_s20, 4294967168  ;;  %s5253_s27 = sld [smem:[#allocation8_spill]]  ;;  %s5254_s0 = sld [smem:[#allocation6_spill]] }
0x148c   : > { %s5255_s26 = sld [smem:[#allocation9_spill]]  ;;  %s5256_s24 = smov %s4456_s25 }
0x1491   : > { %p27_p3 = scmp.ge.s32.totalorder %s5253_s27, 4   ;;  %s5257_s25 = smov %s5254_s0 }
0x1493   :  { %29 = sbr.rel (!%p27_p3) target bundleno = 7 (0x7), region = 135 }
0x149a   :  { %3609 = vsyncpa [#allocation3], 1 }
0x149b   :  { %3611 = vsyncpa [#allocation3 + $0x1], 1 }

// kernel: tpu_custom_call.1
= control target key start
LH: loop header
LB: loop body
LE: loop exit
PB: predicated region body
PF: predicated region fallthrough
CT: control target
= control target key end

     0   :  { %s5204_s0 = inlined_call_operand.vmem [shape: f32[2,8,64], index: 0, kind: input, shape index: {}]   ;;  %s5205_s1 = inlined_call_operand.vmem [shape: f32[64,32], index: 1, kind: input, shape index: {}]   ;;  %s5206_s2 = inlined_call_operand.vmem [shape: f32[1,32], index: 2, kind: input, shape index: {}]   ;;  %s5207_s3 = inlined_call_operand.vmem [shape: f32[2,32,32], index: 3, kind: input, shape index: {}]   ;;  %s5208_s4 = inlined_call_operand.vmem [shape: f32[2,32,32], index: 4, kind: input, shape index: {}]   ;;  %s5209_s5 = inlined_call_operand.vmem [shape: f32[2,32,32], index: 5, kind: input, shape index: {}]   ;;  %s5210_s6 = inlined_call_operand.vmem [shape: f32[2,32,32], index: 6, kind: input, shape index: {}]   ;;  %s5211_s7 = inlined_call_operand.vmem [shape: f32[2,1,32], index: 7, kind: input, shape index: {}]   ;;  %s5212_s8 = inlined_call_operand.vmem [shape: f32[2,1,32], index: 8, kind: input, shape index: {}]   ;;  %s5213_s9 = inlined_call_operand.vmem [shape: f32[2,32,128], index: 9, kind: input, shape index: {}]   ;;  %s5214_s10 = inlined_call_operand.vmem [shape: f32[2,1,128], index: 10, kind: input, shape index: {}]   ;;  %s5215_s11 = inlined_call_operand.vmem [shape: f32[2,128,32], index: 11, kind: input, shape index: {}]   ;;  %s5216_s12 = inlined_call_operand.vmem [shape: f32[2,1,32], index: 12, kind: input, shape index: {}]   ;;  %s5217_s13 = inlined_call_operand.vmem [shape: f32[2,1,32], index: 13, kind: input, shape index: {}]   ;;  %s5218_s14 = inlined_call_operand.vmem [shape: f32[2,1,32], index: 14, kind: input, shape index: {}]   ;;  %s5219_s15 = inlined_call_operand.vmem [shape: f32[32,64], index: 15, kind: input, shape index: {}]   ;;  %s5220_s16 = inlined_call_operand.vmem [shape: f32[1,64], index: 16, kind: input, shape index: {}]   ;;  %s5221_s17 = inlined_call_operand.hbm [shape: f32[2,8,64], index: 17, kind: output, shape index: {}]  }
   0x1   :  { %5234 = sst [smem:[#allocation11_spill]] %s5204_s0 }
   0x2   :  { %5235 = sst [smem:[#allocation12_spill]] %s5205_s1 }
   0x3   :  { %5236 = sst [smem:[#allocation13_spill]] %s5221_s17 }
   0x4   :  { %22 = vsyncpa [#allocation3], 0 }
   0x5   :  { %24 = vsyncpa [#allocation3 + $0x1], 0  ;;  %s4563_s24 = smov 0   ;;  %s4565_s25 = smov 0  }
   0x6   :  { %s4567_s26 = smov 0   ;;  %s4569_s27 = smov 0  }
   0x7 LB: > { %5237 = sst [smem:[#allocation5_spill]] %s4452_s24  ;;  %s4584_s28 = sadd.s32 4294967295, %s4464_s27   ;;  %s4464_s27 = sphi %s4569_s27, %s5253_s27   ;;  %s4460_s26 = sphi %s4567_s26, %s5255_s26   ;;  %s4456_s25 = sphi %s4565_s25, %s5257_s25   ;;  %s4452_s24 = sphi %s4563_s24, %s5256_s24  }
   0x8   : > { %5238 = sst [smem:[#allocation6_spill]] %s4460_s26  ;;  %s3650_s29 = sadd.s32 4294967294, %s4464_s27  }
   0x9   : > { %5239 = sst [smem:[#allocation7_spill]] %s4464_s27  ;;  %s4588_s0 = sadd.s32 1, %s4464_s27  }
   0xa   : > { %5240 = sst [smem:[#allocation8_spill]] %s4588_s0  ;;  %s399_s30 = sadd.s32 1, %s4460_s26 }
   0xb   : > { %s396_s18 = ssub.s32 %s4464_s27, %s4588_s0  ;;  %p409_p0 = scmp.ne.s32.totalorder %s4460_s26, %s4456_s25 }
   0xc   : > { %p397_p1 = scmp.eq.s32.totalorder %s396_s18, 0  ;;  %p410_p2 = scmp.eq.s32.totalorder %s4584_s28, 1 }
   0xd   : > { %p415_p3 = scmp.ne.s32.totalorder %s4456_s25, %s4452_s24  ;;  %p416_p4 = scmp.eq.s32.totalorder %s3650_s29, 1 }
   0xe   : > { %s4599_s19 = scalar_select %p397_p1, %s4460_s26, %s399_s30  }
   0xf   : > { %p4601_p5 = por %p410_p2, %p409_p0  ;;  %p4605_p6 = por %p416_p4, %p415_p3 }
  0x10   : > { %5241 = sst [smem:[#allocation9_spill]] %s4599_s19  ;;  %p3653_p7 = scmp.ge.s32.totalorder %s4464_s27, 1 }
  0x11   : > { %s5243_s20 = scalar_select %p4605_p6, 1, 0 }
  0x12   : > { %p489_p8 = scmp.lt.s32.totalorder %s4464_s27, 3 }
  0x13   : > { %5244 = sst [smem:[#allocation10_spill]] %s5243_s20 }
  0x14   : > { %p490_p9 = pnand %p3653_p7, %p489_p8 }
  0x15   : > { %s5245_s23 = sld [smem:[#allocation12_spill]] (!%p490_p9)  ;;  %v4466_v3 = vmov (!%p490_p9), 0.0|0.0   ;;  %vm4467_vm0 = vmmov (!%p490_p9), 0   ;;  %v4468_v6 = vmov (!%p490_p9), 0.0   ;;  %p540_p10 = scmp.lt.s32.totalorder (!%p490_p9), %s4584_s28, 1  ;;  %v712_v8 = vld [vmem:[%s5208_s4] sm:$0xff] (!%p490_p9) }
  0x16   : > { %493 = sbr.rel (%p490_p9) target bundleno = 5248 (0x1480), region = 88  ;;  %4202 = vmatprep.subr.bf16.mxu0 (!%p490_p9), %v4466_v3  ;;  %3910 = vmatprep.mubr.msk.f32.mxu0 (!%p490_p9), %vm4467_vm0, %v4468_v6  ;;  %v713_v9 = vld [vmem:[%s5208_s4 + $0x8] sm:$0xff] (!%p490_p9)  ;;  %s5246_s18 = sld [smem:[#allocation11_spill]] (!%p490_p9)  ;;  %v634_v17 = vld [vmem:[%s5207_s3] sm:$0xff] (!%p490_p9)  ;;  %vm560_vm1 = vcmask (!%p490_p9), 523264   ;;  %v636_v21 = vld [vmem:[%s5207_s3 + $0x10] sm:$0xff] (!%p490_p9) }
  0x17   : > { %4220 = vmatprep.subr.bf16.mxu1 (!%p490_p9), %v4466_v3  ;;  %3932 = vmatprep.mubr.msk.f32.mxu1 (!%p490_p9), %vm4467_vm0, %v4468_v6  ;;  %v4221_v12 = vpack.c.bf16 (!%p490_p9), %v713_v9, %v712_v8  ;;  %v635_v18 = vld [vmem:[%s5207_s3 + $0x8] sm:$0xff] (!%p490_p9)  ;;  %v637_v22 = vld [vmem:[%s5207_s3 + $0x18] sm:$0xff] (!%p490_p9)  ;;  %v714_v24 = vld [vmem:[%s5208_s4 + $0x10] sm:$0xff] (!%p490_p9)  ;;  %vm638_vm2 = vcmask (!%p490_p9), 261120   ;;  %vm884_vm3 = vcmask (!%p490_p9), 64512   ;;  %s5232_s30 = smov (!%p490_p9), 112  }
  0x18   : > { %v4215_v20 = vpack.c.bf16 (!%p490_p9), %v635_v18, %v634_v17  ;;  %v4218_v23 = vpack.c.bf16 (!%p490_p9), %v637_v22, %v636_v21  ;;  %v715_v25 = vld [vmem:[%s5208_s4 + $0x18] sm:$0xff] (!%p490_p9)  ;;  %v786_v27 = vld [vmem:[%s5209_s5] sm:$0xff] (!%p490_p9)  ;;  %v787_v28 = vld [vmem:[%s5209_s5 + $0x8] sm:$0xff] (!%p490_p9)  ;;  %s5230_s19 = smov (!%p490_p9), 104   ;;  %s5247_s0 = smov (!%p490_p9), 112  }
  0x19   : > { %4222 = vmatpush3.bf16.msra.mxu1 (!%p490_p9), %v4221_v12  ;;  %v4224_v26 = vpack.c.bf16 (!%p490_p9), %v715_v25, %v714_v24  ;;  %v3656_v29 = vld [vmem:[%s5206_s2] ss:$0 sm:$0xff] (!%p490_p9)  ;;  %v4227_v31 = vpack.c.bf16 (!%p490_p9), %v787_v28, %v786_v27  ;;  %v788_v34 = vld [vmem:[%s5209_s5 + $0x10] sm:$0xff] (!%p490_p9)  ;;  %v789_v35 = vld [vmem:[%s5209_s5 + $0x18] sm:$0xff] (!%p490_p9)  ;;  %s537_s27 = sand.u32 (!%p490_p9), 1, %s4456_s25   ;;  %s3755_s21 = sshll.u32 (!%p490_p9), %s4584_s28, 7 }
  0x1a   : > { %4223 = vmatprep.subr.bf16.mxu1 (!%p490_p9), %v4466_v3  ;;  %v4230_v36 = vpack.c.bf16 (!%p490_p9), %v789_v35, %v788_v34  ;;  %s3578_s29 = scalar_lea.sflag (!%p490_p9), [#allocation3], %s537_s27 }
  0x1b   : > { %v545_v0 = vld [vmem:[%s5245_s23] sm:$0xff] (!%p490_p9)  ;;  %v546_v1 = vld [vmem:[%s5245_s23 + $0x8] sm:$0xff] (!%p490_p9)  ;;  %v547_v2 = vld [vmem:[%s5245_s23 + $0x10] sm:$0xff] (!%p490_p9) }
  0x1c   : > { %v4203_v4 = vpack.c.bf16 (!%p490_p9), %v546_v1, %v545_v0  ;;  %v548_v5 = vld [vmem:[%s5245_s23 + $0x18] sm:$0xff] (!%p490_p9)  ;;  %v549_v10 = vld [vmem:[%s5245_s23 + $0x20] sm:$0xff] (!%p490_p9)  ;;  %v550_v11 = vld [vmem:[%s5245_s23 + $0x28] sm:$0xff] (!%p490_p9) }
  0x1d   : > { %v4206_v7 = vpack.c.bf16 %v548_v5, %v547_v2  ;;  %s541_s20 = scalar_select %p540_p10, %s4584_s28, 1  ;;  %v4209_v13 = vpack.c.bf16 %v550_v11, %v549_v10  ;;  %v551_v14 = vld [vmem:[%s5245_s23 + $0x30] sm:$0xff]  ;;  %v552_v15 = vld [vmem:[%s5245_s23 + $0x38] sm:$0xff]  ;;  %4225 = vmatpush3.bf16.msra.mxu1 %v4224_v26 }
  0x1e   : > { %4204 = vmatpush3.bf16.msra.mxu0 %v4203_v4  ;;  %v4212_v16 = vpack.c.bf16 %v552_v15, %v551_v14  ;;  %3946 = vmatprep.subr.mxu1 %v4468_v6 }
  0x1f   : > { %4205 = vmatprep.subr.bf16.mxu0 %v4466_v3  ;;  %s3655_s22 = sshll.u32 %s541_s20, 3 }
  0x20   : > { %s4656_s24 = scalar_lea.vmem %s5246_s18, %s3655_s22  ;;  %s4470_s18 = smov 120  }
  0x21   : > { %v544_v19 = vld [vmem:[%s4656_s24] sm:$0xff]  ;;  %s5248_s22 = smov 104  }
  0x22   : > { %4207 = vmatpush3.bf16.msra.mxu0 %v4206_v7 }
  0x23   : > { %4208 = vmatprep.subr.bf16.mxu0 %v4466_v3 }
  0x26   : > { %4210 = vmatpush3.bf16.msra.mxu0 %v4209_v13 }
  0x27   : > { %4211 = vmatprep.subr.bf16.mxu0 %v4466_v3 }
  0x2a   : > { %4213 = vmatpush3.bf16.msra.mxu0 %v4212_v16 }
  0x2b   : > { %4214 = vmatprep.subr.bf16.mxu0 %v4466_v3 }
  0x2d   : > { %3911 = vmatmul.mubr.msk.f32.vlgmr.msra.gmra.mrb[0].mxu0 %vm560_vm1, %v544_v19 }
  0x2e   : > { %4216 = vmatpush3.bf16.msra.mxu0 %v4215_v20  ;;  %3921 = vmatprep.mubr.msk.f32.mxu0 %vm4467_vm0, %v4468_v6 }
  0x2f   : > { %4217 = vmatprep.subr.bf16.mxu0 %v4466_v3 }
  0x32   : > { %4219 = vmatpush3.bf16.msra.mxu0 %v4218_v23 }
  0x33   : > { %4226 = vmatprep.subr.bf16.mxu0 %v4466_v3 }
 0x100   : > { %v630_v30 = vpop.f32.mrb[0].mxu0 }
 0x101   : > { %v4693_v32 = vadd.f32 %v3656_v29, %v630_v30  ;;  %v3912_v33 = vpop.f32.mrb[1].mxu0 }
 0x103   : > { %3922 = vmatmul.mubr.msk.f32.vlgmr.msra.gmra.mrb[2].mxu0 %vm638_vm2, %v4693_v32  ;;  %3933 = vmatmul.mubr.msk.f32.vlgmr.msra.gmra.mrb[0].mxu1 %vm638_vm2, %v4693_v32 }
 0x104   : > { %4228 = vmatpush3.bf16.msra.mxu0 %v4227_v31  ;;  %3943 = vmatprep.mubr.msk.f32.mxu0 %vm4467_vm0, %v4468_v6 }
 0x105   : > { %4229 = vmatprep.subr.bf16.mxu0 %v4466_v3  ;;  %3948 = vmatprep.mubr.msk.f32.mxu1 %vm4467_vm0, %v4468_v6 }
 0x108   : > { %4231 = vmatpush3.bf16.msra.mxu0 %v4230_v36 }
 0x109   : > { %3956 = vmatprep.subr.mxu0 %v4468_v6 }
 0x10b   : > { %3944 = vmatmul.mubr.msk.f32.vlgmr.msra.gmra.mrb[4].mxu0 %vm638_vm2, %v4693_v32 }
 0x10c   : > { %3958 = vmatprep.mubr.msk.f32.mxu0 %vm4467_vm0, %v4468_v6 }
 0x1d6   : > { %v708_v37 = vpop.f32.mrb[2].mxu0  ;;  %v782_v38 = vpop.f32.mrb[0].mxu1 }
 0x1d7   : > { %870 = vrot.lane.b32.xlu1 %v782_v38, %s5232_s30  ;;  %868 = vrot.lane.b32.xlu0 %v782_v38, %s4470_s18  ;;  %v3923_v39 = vpop.f32.mrb[3].mxu0  ;;  %v3934_v40 = vpop.f32.mrb[1].mxu1 }
 0x1d8   : > { %3947 = vmatpush3.xpose.msk.msra.mxu1 %vm884_vm3, %v782_v38  ;;  %v1521_v39 = vld [vmem:[%s5210_s6] sm:$0xff]  ;;  %v1522_v40 = vld [vmem:[%s5210_s6 + $0x8] sm:$0xff] }
 0x1d9   : > { %3951 = vmatprep.subr.mxu1 %v4468_v6 }
 0x1db   : > { %3949 = vmatmul.mubr.msk.f32.vlgmr.msra.gmra.mrb[2].mxu1 %vm884_vm3, %v708_v37  ;;  %872 = vrot.lane.b32.xlu1 %v782_v38, %s5230_s19 }
 0x1dc   : > { %861 = vrot.lane.b32.xlu0 %v708_v37, %s4470_s18  ;;  %3953 = vmatprep.mubr.msk.f32.mxu1 %vm4467_vm0, %v4468_v6 }
 0x1de   : > { %v4724_v41 = vpop.f32.mrb[4].mxu0 }
 0x1df   : > { %v3945_v42 = vpop.f32.mrb[5].mxu0  ;;  %865 = vrot.lane.b32.xlu1 %v708_v37, %s5230_s19 }
 0x1e0   : > { %863 = vrot.lane.b32.xlu0 %v708_v37, %s5232_s30 }
 0x249   : > { %v871_v43 = vpop.permute.xlu1 %870  ;;  %v869_v44 = vpop.permute.xlu0 %868 }
 0x24a   : > { %3952 = vmatpush3.xpose.msk.msra.mxu1 %vm884_vm3, %v869_v44  ;;  %3957 = vmatpush3.xpose.msk.msra.mxu0 %vm884_vm3, %v871_v43  ;;  %v1523_v44 = vld [vmem:[%s5210_s6 + $0x10] sm:$0xff] }
 0x24b   : > { %3961 = vmatprep.subr.mxu1 %v4468_v6  ;;  %3966 = vmatprep.subr.mxu0 %v4468_v6 }
 0x24d   : > { %v873_v45 = vpop.permute.xlu1 %872 }
 0x24e   : > { %v862_v46 = vpop.permute.xlu0 %861 }
 0x24f   : > { %3954 = vmatmul.mubr.msk.f32.vlgmr.msra.gmra.mrb[4].mxu1 %vm884_vm3, %v862_v46 }
 0x250   : > { %3962 = vmatpush3.xpose.msk.msra.mxu1 %vm884_vm3, %v873_v45  ;;  %3963 = vmatprep.mubr.msk.f32.mxu1 %vm4467_vm0, %v4468_v6 }
 0x251   : > { %v866_v47 = vpop.permute.xlu1 %865  ;;  %3971 = vmatprep.subr.mxu1 %v4468_v6 }
 0x252   : > { %v864_v48 = vpop.permute.xlu0 %863 }
 0x253   : > { %3959 = vmatmul.mubr.msk.f32.vlgmr.msra.gmra.mrb[6].mxu0 %vm884_vm3, %v864_v48  ;;  %3964 = vmatmul.mubr.msk.f32.vlgmr.msra.gmra.mrb[6].mxu1 %vm884_vm3, %v866_v47 }
 0x254   : > { %3967 = vmatpush3.msra.mxu0 %v4724_v41  ;;  %3968 = vmatprep.mubr.msk.f32.mxu0 %vm4467_vm0, %v4468_v6 }
 0x255   : > { %3976 = vmatprep.subr.mxu0 %v4468_v6  ;;  %3973 = vmatprep.mubr.msk.f32.mxu1 %vm4467_vm0, %v4468_v6 }
 0x2ae   : > { %v955_v49 = vpop.f32.mrb[2].mxu1 }
 0x2af   : > { %v1181_v50 = vmul.f32 0.35355338, %v955_v49  ;;  %v3950_v51 = vpop.f32.mrb[3].mxu1 }
 0x2b1   : > { %v1185_v52 = vsel %vm884_vm3, %v1181_v50, -inf }
 0x2b2   : > { %1186 = vmax.xlane.f32.xlu0 %v1185_v52 }
 0x322   : > { %v1029_v53 = vpop.f32.mrb[4].mxu1 }
 0x323   : > { %v1182_v54 = vmul.f32 0.35355338, %v1029_v53  ;;  %v3955_v55 = vpop.f32.mrb[5].mxu1 }
 0x325   : > { %v1188_v56 = vsel %vm884_vm3, %v1182_v54, -inf }
 0x326   : > { %1189 = vmax.xlane.f32.xlu1 %v1188_v56  ;;  %v1103_v57 = vpop.f32.mrb[6].mxu0  ;;  %v1177_v58 = vpop.f32.mrb[6].mxu1 }
 0x327   : > { %v1183_v59 = vmul.f32 0.35355338, %v1103_v57  ;;  %v3960_v60 = vpop.f32.mrb[7].mxu0  ;;  %v3965_v61 = vpop.f32.mrb[7].mxu1  ;;  %v1184_v62 = vmul.f32 0.35355338, %v1177_v58 }
 0x329   : > { %v1191_v63 = vsel %vm884_vm3, %v1183_v59, -inf  ;;  %v1194_v0 = vsel %vm884_vm3, %v1184_v62, -inf }
 0x32a   : > { %1192 = vmax.xlane.f32.xlu0 %v1191_v63 }
 0x32e   : > { %1195 = vmax.xlane.f32.xlu0 %v1194_v0 }
 0x337   : > { %875 = vrot.lane.b32.xlu1 %v4724_v41, %s4470_s18 }
 0x33f   : > { %v1187_v1 = vpop.xlane.xlu0 %1186 }
 0x340   : > { %v1197_v2 = vsub.f32 %v1181_v50, %v1187_v1 }
 0x342   : > { %v1201_v4 = vmul.f32 1.442695, %v1197_v2 }
 0x344   : > { %4361 = vpow2.f32 %v1201_v4 }
 0x34e   : > { %v4362_v5 = vpop.eup %4361 }
 0x34f   : > { %v1209_v7 = vsel %vm884_vm3, %v4362_v5, 0.0 }
 0x35b   : > { %1210 = vadd.xlane.f32.xlu1 %v1209_v7  ;;  %v1850_v7 = vld [vmem:[%s5213_s9] sm:$0xff] }
 0x3b3   : > { %v1190_v8 = vpop.xlane.xlu1 %1189 }
 0x3b4   : > { %v1198_v9 = vsub.f32 %v1182_v54, %v1190_v8  ;;  %v1851_v8 = vld [vmem:[%s5213_s9 + $0x8] sm:$0xff] }
 0x3b6   : > { %v1203_v10 = vmul.f32 1.442695, %v1198_v9  ;;  %v4233_v9 = vpack.c.bf16 %v1851_v8, %v1850_v7 }
 0x3b7   : > { %v876_v11 = vpop.permute.xlu1 %875  ;;  %v1193_v12 = vpop.xlane.xlu0 %1192 }
 0x3b8   : > { %4363 = vpow2.f32 %v1203_v10  ;;  %v1199_v13 = vsub.f32 %v1183_v59, %v1193_v12  ;;  %3972 = vmatpush3.msra.mxu1 %v876_v11  ;;  %v1853_v10 = vld [vmem:[%s5213_s9 + $0x18] sm:$0xff]  ;;  %v1935_v12 = vld [vmem:[%s5215_s11] sm:$0xff] }
 0x3b9   : > { %3981 = vmatprep.subr.mxu1 %v4468_v6 }
 0x3ba   : > { %v1205_v14 = vmul.f32 1.442695, %v1199_v13  ;;  %v1936_v13 = vld [vmem:[%s5215_s11 + $0x8] sm:$0xff] }
 0x3bb   : > { %v1196_v15 = vpop.xlane.xlu0 %1195 }
 0x3bc   : > { %4365 = vpow2.f32 %v1205_v14  ;;  %v1200_v16 = vsub.f32 %v1184_v62, %v1196_v15  ;;  %v1937_v14 = vld [vmem:[%s5215_s11 + $0x10] sm:$0xff]  ;;  %v4239_v15 = vpack.c.bf16 %v1936_v13, %v1935_v12  ;;  %v3690_v12 = vld [vmem:[%s5208_s4 + $0x28] sm:$0xff]  ;;  %v3683_v13 = vld [vmem:[%s5218_s14] ss:$0 sm:$0xff] }
 0x3be   : > { %v1207_v17 = vmul.f32 1.442695, %v1200_v16  ;;  %v1938_v16 = vld [vmem:[%s5215_s11 + $0x18] sm:$0xff] }
 0x3c0   : > { %4367 = vpow2.f32 %v1207_v17  ;;  %v4242_v17 = vpack.c.bf16 %v1938_v16, %v1937_v14 }
 0x3c2   : > { %v4364_v18 = vpop.eup %4363 }
 0x3c3   : > { %v1212_v19 = vsel %vm884_vm3, %v4364_v18, 0.0 }
 0x3c4   : > { %1213 = vadd.xlane.f32.xlu0 %v1212_v19  ;;  %v1940_v19 = vld [vmem:[%s5215_s11 + $0x28] sm:$0xff] }
 0x3c6   : > { %v4366_v20 = vpop.eup %4365 }
 0x3c7   : > { %v1215_v21 = vsel %vm884_vm3, %v4366_v20, 0.0 }
 0x3c8   : > { %1216 = vadd.xlane.f32.xlu1 %v1215_v21  ;;  %v1941_v21 = vld [vmem:[%s5215_s11 + $0x30] sm:$0xff] }
 0x3ca   : > { %v4368_v22 = vpop.eup %4367 }
 0x3cb   : > { %v1218_v23 = vsel %vm884_vm3, %v4368_v22, 0.0 }
 0x3cc   : > { %1219 = vadd.xlane.f32.xlu0 %v1218_v23 }
 0x3d9   : > { %881 = vrot.lane.b32.xlu1 %v4724_v41, %s5230_s19  ;;  %s3654_s19 = sshll.u32 %s537_s27, 3 }
 0x3da   : > { %s539_s20 = scalar_lea.vmem [#allocation2], %s3654_s19 }
 0x3db   : > { %s3591_s26 = sshll.u32 %s539_s20, 4  ;;  %s5163_s26 = int_to_ptr.vmem [resolvable:$true] %s3591_s26 }
 0x3dc   : > { %s4402_s28 = scalar_lea.vmem %s5163_s26, 128 }
 0x3dd   : > { %p4403_p11 = scmp.ne.s32.totalorder %s5163_s26, %s4402_s28 }
 0x3df   : > { %p4404_p12 = pnand %p4403_p11, %p4601_p5 }
 0x3e1   : > { %p4405_p13 = pneg %p4404_p12 }
 0x3e2   : > { %878 = vrot.lane.b32.xlu0 %v4724_v41, %s5232_s30  ;;  %v1524_v41 = vld [vmem:[%s5210_s6 + $0x18] sm:$0xff] }
 0x3e8   : > { %v1211_v24 = vpop.xlane.xlu1 %1210 }
 0x3e9   : > { %4369 = vrcp.f32 %v1211_v24  ;;  %v1943_v24 = vld [vmem:[%s5215_s11 + $0x40] sm:$0xff] }
 0x3f3   : > { %v4370_v25 = vpop.eup %4369 }
 0x3f4   : > { %v1225_v26 = vmul.f32 %v4370_v25, %v4362_v5  ;;  %v1944_v25 = vld [vmem:[%s5215_s11 + $0x48] sm:$0xff] }
 0x3f6   : > { %3969 = vmatmul.mubr.msk.f32.vlgmr.msra.gmra.mrb[8].mxu0 %vm884_vm3, %v1225_v26  ;;  %v4251_v26 = vpack.c.bf16 %v1944_v25, %v1943_v24  ;;  %v3697_v24 = vld [vmem:[%s5209_s5 + $0x38] sm:$0xff] }
 0x3f7   : > { %3978 = vmatprep.mubr.msk.f32.mxu0 %vm4467_vm0, %v4468_v6 }
 0x451   : > { %v1214_v27 = vpop.xlane.xlu0 %1213 }
 0x452   : > { %4371 = vrcp.f32 %v1214_v27  ;;  %v1945_v27 = vld [vmem:[%s5215_s11 + $0x50] sm:$0xff] }
 0x455   : > { %v1217_v28 = vpop.xlane.xlu1 %1216 }
 0x456   : > { %4373 = vrcp.f32 %v1217_v28  ;;  %v1946_v28 = vld [vmem:[%s5215_s11 + $0x58] sm:$0xff] }
 0x459   : > { %v1220_v29 = vpop.xlane.xlu0 %1219  ;;  %v882_v34 = vpop.permute.xlu1 %881 }
 0x45a   : > { %4375 = vrcp.f32 %v1220_v29  ;;  %v4254_v29 = vpack.c.bf16 %v1946_v28, %v1945_v27 }
 0x45c   : > { %v4372_v30 = vpop.eup %4371 }
 0x45d   : > { %v1226_v31 = vmul.f32 %v4372_v30, %v4364_v18  ;;  %v879_v33 = vpop.permute.xlu0 %878  ;;  %v1939_v18 = vld [vmem:[%s5215_s11 + $0x20] sm:$0xff] }
 0x45e   : > { %3977 = vmatpush3.msra.mxu0 %v879_v33  ;;  %v1947_v30 = vld [vmem:[%s5215_s11 + $0x60] sm:$0xff] }
 0x45f   : > { %3974 = vmatmul.mubr.msk.f32.vlgmr.msra.gmra.mrb[8].mxu1 %vm884_vm3, %v1226_v31  ;;  %3986 = vmatprep.subr.mxu0 %v4468_v6  ;;  %v1948_v31 = vld [vmem:[%s5215_s11 + $0x68] sm:$0xff] }
 0x460   : > { %v4374_v35 = vpop.eup %4373  ;;  %3982 = vmatpush3.msra.mxu1 %v882_v34  ;;  %3983 = vmatprep.mubr.msk.f32.mxu1 %vm4467_vm0, %v4468_v6  ;;  %v4257_v33 = vpack.c.bf16 %v1948_v31, %v1947_v30 }
 0x461   : > { %v1227_v36 = vmul.f32 %v4374_v35, %v4366_v20  ;;  %3991 = vmatprep.subr.mxu1 %v4468_v6  ;;  %v4245_v20 = vpack.c.bf16 %v1940_v19, %v1939_v18  ;;  %v3692_v18 = vld [vmem:[%s5208_s4 + $0x38] sm:$0xff] }
 0x463   : > { %3979 = vmatmul.mubr.msk.f32.vlgmr.msra.gmra.mrb[10].mxu0 %vm884_vm3, %v1227_v36 }
 0x464   : > { %v4376_v37 = vpop.eup %4375  ;;  %3988 = vmatprep.mubr.msk.f32.mxu0 %vm4467_vm0, %v4468_v6  ;;  %3987 = vmatpush3.msra.mxu0 %v1522_v40  ;;  %v3678_v40 = vld [vmem:[%s5212_s8] ss:$0 sm:$0xff] }
 0x465   : > { %v1228_v38 = vmul.f32 %v4376_v37, %v4368_v22  ;;  %3996 = vmatprep.subr.mxu0 %v4468_v6  ;;  %v1942_v22 = vld [vmem:[%s5215_s11 + $0x38] sm:$0xff] }
 0x466   : > { %v4248_v23 = vpack.c.bf16 %v1942_v22, %v1941_v21  ;;  %v3695_v21 = vld [vmem:[%s5209_s5 + $0x28] sm:$0xff] }
 0x467   : > { %3984 = vmatmul.mubr.msk.f32.vlgmr.msra.gmra.mrb[10].mxu1 %vm884_vm3, %v1228_v38  ;;  %v3677_v38 = vld [vmem:[%s5211_s7] ss:$0 sm:$0xff] }
 0x468   : > { %3992 = vmatpush3.msra.mxu1 %v1521_v39  ;;  %3993 = vmatprep.mubr.msk.f32.mxu1 %vm4467_vm0, %v4468_v6 }
 0x469   : > { %4001 = vmatprep.subr.mxu1 %v4468_v6 }
 0x4c9   : > { %v1298_v42 = vpop.f32.mrb[8].mxu0 }
 0x4ca   : > { %v3970_v43 = vpop.f32.mrb[9].mxu0  ;;  %3994 = vmatmul.mubr.msk.f32.vlgmr.msra.gmra.mrb[12].mxu1 %vm884_vm3, %v1298_v42 }
 0x4cb   : > { %4002 = vmatpush3.msra.mxu1 %v1524_v41  ;;  %4003 = vmatprep.mubr.msk.f32.mxu1 %vm4467_vm0, %v4468_v6  ;;  %v1949_v43 = vld [vmem:[%s5215_s11 + $0x70] sm:$0xff] }
 0x4cc   : > { %4238 = vmatprep.subr.bf16.mxu1 %v4466_v3 }
 0x532   : > { %v1371_v45 = vpop.f32.mrb[8].mxu1 }
 0x533   : > { %v3975_v46 = vpop.f32.mrb[9].mxu1  ;;  %3989 = vmatmul.mubr.msk.f32.vlgmr.msra.gmra.mrb[12].mxu0 %vm884_vm3, %v1371_v45 }
 0x534   : > { %3997 = vmatpush3.msra.mxu0 %v1523_v44  ;;  %3998 = vmatprep.mubr.msk.f32.mxu0 %vm4467_vm0, %v4468_v6  ;;  %v1950_v44 = vld [vmem:[%s5215_s11 + $0x78] sm:$0xff]  ;;  %v3679_v46 = vld [vmem:[%s5214_s10] ss:$0 sm:$0xff] }
 0x535   : > { %4232 = vmatprep.subr.bf16.mxu0 %v4466_v3  ;;  %v4260_v45 = vpack.c.bf16 %v1950_v44, %v1949_v43 }
 0x536   : > { %v1444_v47 = vpop.f32.mrb[10].mxu0 }
 0x537   : > { %v3980_v48 = vpop.f32.mrb[11].mxu0  ;;  %3999 = vmatmul.mubr.msk.f32.vlgmr.msra.gmra.mrb[14].mxu0 %vm884_vm3, %v1444_v47 }
 0x538   : > { %4014 = vmatprep.mubr.msk.f32.mxu0 %vm4467_vm0, %v4468_v6  ;;  %4234 = vmatpush3.bf16.msra.mxu0 %v4233_v9 }
 0x539   : > { %4235 = vmatprep.subr.bf16.mxu0 %v4466_v3 }
 0x53a   : > { %v1517_v49 = vpop.f32.mrb[10].mxu1 }
 0x53b   : > { %v3985_v50 = vpop.f32.mrb[11].mxu1  ;;  %4004 = vmatmul.mubr.msk.f32.vlgmr.msra.gmra.mrb[14].mxu1 %vm884_vm3, %v1517_v49 }
 0x53c   : > { %4049 = vmatprep.mubr.msk.f32.mxu1 %vm4467_vm0, %v4468_v6  ;;  %4240 = vmatpush3.bf16.msra.mxu1 %v4239_v15 }
 0x53d   : > { %4241 = vmatprep.subr.bf16.mxu1 %v4466_v3 }
 0x540   : > { %4243 = vmatpush3.bf16.msra.mxu1 %v4242_v17  ;;  %v3691_v17 = vld [vmem:[%s5208_s4 + $0x30] sm:$0xff] }
 0x541   : > { %4244 = vmatprep.subr.bf16.mxu1 %v4466_v3  ;;  %v4272_v19 = vpack.c.bf16 %v3692_v18, %v3691_v17 }
 0x544   : > { %4246 = vmatpush3.bf16.msra.mxu1 %v4245_v20  ;;  %v3694_v20 = vld [vmem:[%s5209_s5 + $0x20] sm:$0xff] }
 0x545   : > { %4247 = vmatprep.subr.bf16.mxu1 %v4466_v3  ;;  %v4275_v22 = vpack.c.bf16 %v3695_v21, %v3694_v20 }
 0x548   : > { %4249 = vmatpush3.bf16.msra.mxu1 %v4248_v23  ;;  %v3696_v23 = vld [vmem:[%s5209_s5 + $0x30] sm:$0xff] }
 0x549   : > { %4250 = vmatprep.subr.bf16.mxu1 %v4466_v3  ;;  %v4278_v25 = vpack.c.bf16 %v3697_v24, %v3696_v23 }
 0x54c   : > { %4252 = vmatpush3.bf16.msra.mxu1 %v4251_v26 }
 0x54d   : > { %4253 = vmatprep.subr.bf16.mxu1 %v4466_v3 }
 0x550   : > { %4255 = vmatpush3.bf16.msra.mxu1 %v4254_v29 }
 0x551   : > { %4256 = vmatprep.subr.bf16.mxu1 %v4466_v3 }
 0x554   : > { %4258 = vmatpush3.bf16.msra.mxu1 %v4257_v33 }
 0x555   : > { %4259 = vmatprep.subr.bf16.mxu1 %v4466_v3 }
 0x558   : > { %4261 = vmatpush3.bf16.msra.mxu1 %v4260_v45 }
 0x559   : > { %4090 = vmatprep.subr.mxu1 %v4468_v6 }
 0x59d   : > { %v1667_v51 = vpop.f32.mrb[12].mxu1 }
 0x59e   : > { %v3995_v52 = vpop.f32.mrb[13].mxu1 }
 0x606   : > { %v1594_v53 = vpop.f32.mrb[12].mxu0 }
 0x607   : > { %v1668_v54 = vadd.f32 %v1667_v51, %v1594_v53  ;;  %v3990_v55 = vpop.f32.mrb[13].mxu0  ;;  %v3681_v51 = vld [vmem:[%s5216_s12] ss:$0 sm:$0xff] }
 0x60a   : > { %v1740_v56 = vpop.f32.mrb[14].mxu0 }
 0x60b   : > { %v1744_v57 = vadd.f32 %v1740_v56, %v1668_v54  ;;  %v4000_v58 = vpop.f32.mrb[15].mxu0 }
 0x60e   : > { %v1814_v59 = vpop.f32.mrb[14].mxu1 }
 0x60f   : > { %v1818_v60 = vadd.f32 %v1814_v59, %v1744_v57  ;;  %v4005_v61 = vpop.f32.mrb[15].mxu1 }
 0x611   : > { %v1819_v62 = vadd.f32 %v1818_v60, %v4693_v32  ;;  %v1852_v32 = vld [vmem:[%s5213_s9 + $0x10] sm:$0xff] }
 0x612   : > { %v4236_v11 = vpack.c.bf16 %v1853_v10, %v1852_v32  ;;  %v3682_v32 = vld [vmem:[%s5217_s13] ss:$0 sm:$0xff] }
 0x613   : > { %v1822_v63 = vsel %vm638_vm2, %v1819_v62, 0.0 }
 0x614   : > { %1823 = vadd.xlane.f32.xlu1 %v1822_v63  ;;  %4237 = vmatpush3.bf16.msra.mxu0 %v4236_v11  ;;  %v3685_v63 = vld [vmem:[%s5207_s3 + $0x28] sm:$0xff]  ;;  %v3689_v11 = vld [vmem:[%s5208_s4 + $0x20] sm:$0xff] }
 0x615   : > { %4262 = vmatprep.subr.bf16.mxu0 %v4466_v3  ;;  %v4269_v15 = vpack.c.bf16 %v3690_v12, %v3689_v11 }
 0x6a1   : > { %v1824_v0 = vpop.xlane.xlu1 %1823 }
 0x6a2   : > { %v1826_v1 = vmul.f32 0.03125, %v1824_v0 }
 0x6a4   : > { %v1827_v2 = vsub.f32 %v1819_v62, %v1826_v1  ;;  %v3684_v62 = vld [vmem:[%s5207_s3 + $0x20] sm:$0xff]  ;;  %v3686_v1 = vld [vmem:[%s5207_s3 + $0x30] sm:$0xff] }
 0x6a5   : > { %v4263_v0 = vpack.c.bf16 %v3685_v63, %v3684_v62 }
 0x6a6   : > { %v1828_v4 = vmul.f32 %v1827_v2, %v1827_v2 }
 0x6a8   : > { %v1829_v5 = vsel %vm638_vm2, %v1828_v4, 0.0 }
 0x6a9   : > { %1830 = vadd.xlane.f32.xlu0 %v1829_v5 }
 0x736   : > { %v1831_v34 = vpop.xlane.xlu0 %1830 }
 0x737   : > { %v1832_v35 = vmul.f32 0.03125, %v1831_v34 }
 0x739   : > { %v1833_v36 = vadd.f32 1e-06, %v1832_v35 }
 0x73b   : > { %4377 = vrsqrt.f32 %v1833_v36 }
 0x745   : > { %v4378_v37 = vpop.eup %4377 }
 0x746   : > { %v1835_v39 = vmul.f32 %v4378_v37, %v1827_v2  ;;  %v3687_v2 = vld [vmem:[%s5207_s3 + $0x38] sm:$0xff] }
 0x747   : > { %v4266_v4 = vpack.c.bf16 %v3687_v2, %v3686_v1 }
 0x748   : > { %v1842_v41 = vmul.f32 %v3677_v38, %v1835_v39 }
 0x74a   : > { %v1849_v42 = vadd.f32 %v3678_v40, %v1842_v41 }
 0x74c   : > { %4015 = vmatmul.mubr.msk.f32.vlgmr.msra.gmra.mrb[16].mxu0 %vm638_vm2, %v1849_v42 }
 0x74d   : > { %4060 = vmatprep.mubr.msk.f32.mxu0 %vm4467_vm0, %v4468_v6  ;;  %4264 = vmatpush3.bf16.msra.mxu0 %v4263_v0 }
 0x74e   : > { %4265 = vmatprep.subr.bf16.mxu0 %v4466_v3 }
 0x751   : > { %4267 = vmatpush3.bf16.msra.mxu0 %v4266_v4 }
 0x752   : > { %4268 = vmatprep.subr.bf16.mxu0 %v4466_v3 }
 0x81f   : > { %v1930_v47 = vpop.f32.mrb[16].mxu0 }
 0x820   : > { %v1931_v48 = vadd.f32 %v3679_v46, %v1930_v47  ;;  %v4016_v49 = vpop.f32.mrb[17].mxu0 }
 0x822   : > { %v1934_v50 = vmax.f32 %v1931_v48, 0.0 }
 0x824   : > { %4050 = vmatmul.mubr.f32.vlgmr.msra.gmra.mrb[16].mxu1 %v1934_v50 }
 0x825   : > { %4092 = vmatprep.mubr.msk.f32.mxu1 %vm4467_vm0, %v4468_v6 }
 0x8f7   : > { %v2024_v52 = vpop.f32.mrb[16].mxu1 }
 0x8f8   : > { %v2025_v53 = vadd.f32 %v3681_v51, %v2024_v52  ;;  %v4051_v54 = vpop.f32.mrb[17].mxu1 }
 0x8fa   : > { %v2028_v55 = vadd.f32 %v2025_v53, %v1849_v42 }
 0x8fc   : > { %v2031_v56 = vsel %vm638_vm2, %v2028_v55, 0.0 }
 0x8fd   : > { %2032 = vadd.xlane.f32.xlu0 %v2031_v56 }
 0x98a   : > { %v2033_v57 = vpop.xlane.xlu0 %2032 }
 0x98b   : > { %v2034_v58 = vmul.f32 0.03125, %v2033_v57 }
 0x98d   : > { %v2035_v59 = vsub.f32 %v2028_v55, %v2034_v58 }
 0x98f   : > { %v2036_v60 = vmul.f32 %v2035_v59, %v2035_v59 }
 0x991   : > { %v2037_v61 = vsel %vm638_vm2, %v2036_v60, 0.0 }
 0x992   : > { %2038 = vadd.xlane.f32.xlu1 %v2037_v61 }
 0xa1f   : > { %v2039_v5 = vpop.xlane.xlu1 %2038 }
 0xa20   : > { %v2040_v7 = vmul.f32 0.03125, %v2039_v5 }
 0xa22   : > { %v2041_v8 = vadd.f32 1e-06, %v2040_v7 }
 0xa24   : > { %4379 = vrsqrt.f32 %v2041_v8 }
 0xa2e   : > { %v4380_v9 = vpop.eup %4379 }
 0xa2f   : > { %v2043_v10 = vmul.f32 %v4380_v9, %v2035_v59 }
 0xa31   : > { %v2050_v14 = vmul.f32 %v3682_v32, %v2043_v10 }
 0xa33   : > { %v4920_v16 = vadd.f32 %v3683_v13, %v2050_v14 }
 0xa35   : > { %4061 = vmatmul.mubr.msk.f32.vlgmr.msra.gmra.mrb[18].mxu0 %vm638_vm2, %v4920_v16 }
 0xa36   : > { %4270 = vmatpush3.bf16.msra.mxu0 %v4269_v15  ;;  %4071 = vmatprep.mubr.msk.f32.mxu0 %vm4467_vm0, %v4468_v6 }
 0xa37   : > { %4271 = vmatprep.subr.bf16.mxu0 %v4466_v3 }
 0xa3a   : > { %4273 = vmatpush3.bf16.msra.mxu0 %v4272_v19 }
 0xa3b   : > { %4274 = vmatprep.subr.bf16.mxu0 %v4466_v3 }
 0xa3d   : > { %4072 = vmatmul.mubr.msk.f32.vlgmr.msra.gmra.mrb[20].mxu0 %vm638_vm2, %v4920_v16 }
 0xa3e   : > { %4276 = vmatpush3.bf16.msra.mxu0 %v4275_v22  ;;  %4082 = vmatprep.mubr.msk.f32.mxu0 %vm4467_vm0, %v4468_v6 }
 0xa3f   : > { %4277 = vmatprep.subr.bf16.mxu0 %v4466_v3 }
 0xa42   : > { %4279 = vmatpush3.bf16.msra.mxu0 %v4278_v25 }
 0xa43   : > { %4085 = vmatprep.subr.mxu0 %v4468_v6 }
 0xa45   : > { %4083 = vmatmul.mubr.msk.f32.vlgmr.msra.gmra.mrb[22].mxu0 %vm638_vm2, %v4920_v16 }
 0xa46   : > { %4087 = vmatprep.mubr.msk.f32.mxu0 %vm4467_vm0, %v4468_v6 }
 0xb08   : > { %v2132_v26 = vpop.f32.mrb[18].mxu0 }
 0xb09   : > { %2287 = vrot.lane.b32.xlu1 %v2132_v26, %s4470_s18  ;;  %v4062_v27 = vpop.f32.mrb[19].mxu0 }
 0xb10   : > { %v2207_v28 = vpop.f32.mrb[20].mxu0 }
 0xb11   : > { %2296 = vrot.lane.b32.xlu1 %v2207_v28, %s5247_s0  ;;  %2294 = vrot.lane.b32.xlu0 %v2207_v28, %s4470_s18  ;;  %v4073_v29 = vpop.f32.mrb[21].mxu0 }
 0xb12   : > { %4086 = vmatpush3.xpose.msk.msra.mxu0 %vm884_vm3, %v2207_v28  ;;  %v3712_v29 = vld [vmem:[%s5210_s6 + $0x28] sm:$0xff] }
 0xb13   : > { %4095 = vmatprep.subr.mxu0 %v4468_v6 }
 0xb15   : > { %4088 = vmatmul.mubr.msk.f32.vlgmr.msra.gmra.mrb[24].mxu0 %vm884_vm3, %v2132_v26  ;;  %2289 = vrot.lane.b32.xlu1 %v2132_v26, %s5247_s0 }
 0xb16   : > { %2298 = vrot.lane.b32.xlu0 %v2207_v28, %s5248_s22  ;;  %4097 = vmatprep.mubr.msk.f32.mxu0 %vm4467_vm0, %v4468_v6  ;;  %v3711_v28 = vld [vmem:[%s5210_s6 + $0x20] sm:$0xff] }
 0xb18   : > { %v4966_v30 = vpop.f32.mrb[22].mxu0 }
 0xb19   : > { %v4084_v31 = vpop.f32.mrb[23].mxu0 }
 0xb1a   : > { %2291 = vrot.lane.b32.xlu0 %v2132_v26, %s5248_s22 }
 0xb7b   : > { %v2288_v33 = vpop.permute.xlu1 %2287 }
 0xb83   : > { %v2297_v34 = vpop.permute.xlu1 %2296  ;;  %v2295_v35 = vpop.permute.xlu0 %2294 }
 0xb84   : > { %4091 = vmatpush3.xpose.msk.msra.mxu1 %vm884_vm3, %v2295_v35  ;;  %4096 = vmatpush3.xpose.msk.msra.mxu0 %vm884_vm3, %v2297_v34  ;;  %v3713_v34 = vld [vmem:[%s5210_s6 + $0x30] sm:$0xff] }
 0xb85   : > { %4100 = vmatprep.subr.mxu1 %v4468_v6  ;;  %4105 = vmatprep.subr.mxu0 %v4468_v6 }
 0xb87   : > { %v2290_v36 = vpop.permute.xlu1 %2289  ;;  %4093 = vmatmul.mubr.msk.f32.vlgmr.msra.gmra.mrb[18].mxu1 %vm884_vm3, %v2288_v33 }
 0xb88   : > { %v2299_v37 = vpop.permute.xlu0 %2298  ;;  %4098 = vmatmul.mubr.msk.f32.vlgmr.msra.gmra.mrb[26].mxu0 %vm884_vm3, %v2290_v36  ;;  %4102 = vmatprep.mubr.msk.f32.mxu1 %vm4467_vm0, %v4468_v6 }
 0xb89   : > { %4101 = vmatpush3.xpose.msk.msra.mxu1 %vm884_vm3, %v2299_v37  ;;  %4106 = vmatpush3.msra.mxu0 %v4966_v30 }
 0xb8a   : > { %4107 = vmatprep.mubr.msk.f32.mxu0 %vm4467_vm0, %v4468_v6  ;;  %4115 = vmatprep.subr.mxu0 %v4468_v6 }
 0xb8b   : > { %4110 = vmatprep.subr.mxu1 %v4468_v6 }
 0xb8c   : > { %v2292_v38 = vpop.permute.xlu0 %2291 }
 0xb8d   : > { %4103 = vmatmul.mubr.msk.f32.vlgmr.msra.gmra.mrb[20].mxu1 %vm884_vm3, %v2292_v38 }
 0xb8e   : > { %4112 = vmatprep.mubr.msk.f32.mxu1 %vm4467_vm0, %v4468_v6 }
 0xbe8   : > { %v2380_v39 = vpop.f32.mrb[24].mxu0 }
 0xbe9   : > { %v2606_v40 = vmul.f32 0.35355338, %v2380_v39  ;;  %v4089_v41 = vpop.f32.mrb[25].mxu0 }
 0xbeb   : > { %v2610_v42 = vsel %vm884_vm3, %v2606_v40, -inf }
 0xbec   : > { %2611 = vmax.xlane.f32.xlu1 %v2610_v42 }
 0xc5a   : > { %v2454_v43 = vpop.f32.mrb[18].mxu1 }
 0xc5b   : > { %v2607_v44 = vmul.f32 0.35355338, %v2454_v43  ;;  %v4094_v45 = vpop.f32.mrb[19].mxu1  ;;  %v2528_v46 = vpop.f32.mrb[26].mxu0 }
 0xc5c   : > { %v4099_v47 = vpop.f32.mrb[27].mxu0  ;;  %v2608_v48 = vmul.f32 0.35355338, %v2528_v46 }
 0xc5d   : > { %v2613_v49 = vsel %vm884_vm3, %v2607_v44, -inf }
 0xc5e   : > { %2614 = vmax.xlane.f32.xlu0 %v2613_v49  ;;  %v2616_v53 = vsel %vm884_vm3, %v2608_v48, -inf }
 0xc60   : > { %v2602_v50 = vpop.f32.mrb[20].mxu1 }
 0xc61   : > { %v2609_v51 = vmul.f32 0.35355338, %v2602_v50  ;;  %v4104_v52 = vpop.f32.mrb[21].mxu1 }
 0xc62   : > { %2617 = vmax.xlane.f32.xlu0 %v2616_v53 }
 0xc63   : > { %v2619_v54 = vsel %vm884_vm3, %v2609_v51, -inf }
 0xc64   : > { %2620 = vmax.xlane.f32.xlu1 %v2619_v54 }
 0xc79   : > { %v2612_v55 = vpop.xlane.xlu1 %2611 }
 0xc7a   : > { %v2622_v56 = vsub.f32 %v2606_v40, %v2612_v55 }
 0xc7c   : > { %v2626_v57 = vmul.f32 1.442695, %v2622_v56 }
 0xc7e   : > { %4381 = vpow2.f32 %v2626_v57 }
 0xc88   : > { %v4382_v58 = vpop.eup %4381 }
 0xc89   : > { %v2634_v59 = vsel %vm884_vm3, %v4382_v58, 0.0 }
 0xc8a   : > { %2635 = vadd.xlane.f32.xlu0 %v2634_v59  ;;  %v3723_v59 = vld [vmem:[%s5213_s9 + $0x20] sm:$0xff] }
 0xceb   : > { %v2615_v60 = vpop.xlane.xlu0 %2614 }
 0xcec   : > { %v2623_v61 = vsub.f32 %v2607_v44, %v2615_v60  ;;  %v3724_v60 = vld [vmem:[%s5213_s9 + $0x28] sm:$0xff] }
 0xcee   : > { %v2628_v62 = vmul.f32 1.442695, %v2623_v61  ;;  %v4281_v61 = vpack.c.bf16 %v3724_v60, %v3723_v59 }
 0xcef   : > { %v2618_v63 = vpop.xlane.xlu0 %2617 }
 0xcf0   : > { %4383 = vpow2.f32 %v2628_v62  ;;  %v2624_v0 = vsub.f32 %v2608_v48, %v2618_v63  ;;  %v3726_v62 = vld [vmem:[%s5213_s9 + $0x38] sm:$0xff] }
 0xcf1   : > { %v2621_v9 = vpop.xlane.xlu1 %2620 }
 0xcf2   : > { %v2630_v1 = vmul.f32 1.442695, %v2624_v0  ;;  %v2625_v32 = vsub.f32 %v2609_v51, %v2621_v9  ;;  %v3730_v0 = vld [vmem:[%s5215_s11 + $0x80] sm:$0xff]  ;;  %v3735_v9 = vld [vmem:[%s5215_s11 + $0xa8] sm:$0xff] }
 0xcf4   : > { %4385 = vpow2.f32 %v2630_v1  ;;  %v2632_v10 = vmul.f32 1.442695, %v2625_v32  ;;  %v3731_v1 = vld [vmem:[%s5215_s11 + $0x88] sm:$0xff] }
 0xcfa   : > { %v4384_v2 = vpop.eup %4383 }
 0xcfb   : > { %v2637_v4 = vsel %vm884_vm3, %v4384_v2, 0.0 }
 0xcfc   : > { %2638 = vadd.xlane.f32.xlu1 %v2637_v4  ;;  %v4287_v4 = vpack.c.bf16 %v3731_v1, %v3730_v0  ;;  %v3752_v0 = vld [vmem:[%s5220_s16] ss:$0 sm:$0xff] }
 0xcfe   : > { %v4386_v5 = vpop.eup %4385 }
 0xcff   : > { %v2640_v7 = vsel %vm884_vm3, %v4386_v5, 0.0 }
 0xd00   : > { %2641 = vadd.xlane.f32.xlu0 %v2640_v7 }
 0xd0d   : > { %2304 = vrot.lane.b32.xlu1 %v4966_v30, %s5247_s0 }
 0xd16   : > { %2301 = vrot.lane.b32.xlu0 %v4966_v30, %s4470_s18  ;;  %s5249_s18 = sld [smem:[#allocation13_spill]] }
 0xd17   : > { %v2636_v8 = vpop.xlane.xlu0 %2635 }
 0xd18   : > { %4387 = vrcp.f32 %v2636_v8  ;;  %v3734_v8 = vld [vmem:[%s5215_s11 + $0xa0] sm:$0xff] }
 0xd19   : > { %4389 = vpow2.f32 %v2632_v10  ;;  %v4293_v32 = vpack.c.bf16 %v3735_v9, %v3734_v8  ;;  %v3736_v10 = vld [vmem:[%s5215_s11 + $0xb0] sm:$0xff] }
 0xd1c   : > { %s5161_s17 = scalar_lea.hbm %s5249_s18, %s3755_s21 }
 0xd22   : > { %v4388_v11 = vpop.eup %4387 }
 0xd23   : > { %v2650_v12 = vmul.f32 %v4388_v11, %v4382_v58  ;;  %v4390_v13 = vpop.eup %4389  ;;  %v3737_v11 = vld [vmem:[%s5215_s11 + $0xb8] sm:$0xff] }
 0xd24   : > { %v2643_v14 = vsel %vm884_vm3, %v4390_v13, 0.0 }
 0xd25   : > { %4108 = vmatmul.mubr.msk.f32.vlgmr.msra.gmra.mrb[28].mxu0 %vm884_vm3, %v2650_v12  ;;  %v4296_v12 = vpack.c.bf16 %v3737_v11, %v3736_v10 }
 0xd26   : > { %4117 = vmatprep.mubr.msk.f32.mxu0 %vm4467_vm0, %v4468_v6 }
 0xd31   : > { %2644 = vadd.xlane.f32.xlu1 %v2643_v14  ;;  %v3739_v14 = vld [vmem:[%s5215_s11 + $0xc8] sm:$0xff] }
 0xd42   : > { %2307 = vrot.lane.b32.xlu1 %v4966_v30, %s5248_s22  ;;  %v3714_v30 = vld [vmem:[%s5210_s6 + $0x38] sm:$0xff] }
 0xd89   : > { %v2639_v15 = vpop.xlane.xlu1 %2638 }
 0xd8a   : > { %4391 = vrcp.f32 %v2639_v15 }
 0xd8d   : > { %v2305_v17 = vpop.permute.xlu1 %2304  ;;  %v2642_v18 = vpop.xlane.xlu0 %2641 }
 0xd8e   : > { %4393 = vrcp.f32 %v2642_v18  ;;  %4116 = vmatpush3.msra.mxu0 %v2305_v17  ;;  %v3740_v17 = vld [vmem:[%s5215_s11 + $0xd0] sm:$0xff]  ;;  %v3741_v18 = vld [vmem:[%s5215_s11 + $0xd8] sm:$0xff] }
 0xd8f   : > { %4125 = vmatprep.subr.mxu0 %v4468_v6 }
 0xd91   : > { %v2302_v19 = vpop.permute.xlu0 %2301 }
 0xd92   : > { %4111 = vmatpush3.msra.mxu1 %v2302_v19  ;;  %v4302_v19 = vpack.c.bf16 %v3741_v18, %v3740_v17 }
 0xd93   : > { %4120 = vmatprep.subr.mxu1 %v4468_v6 }
 0xd94   : > { %v4392_v20 = vpop.eup %4391 }
 0xd95   : > { %v2651_v21 = vmul.f32 %v4392_v20, %v4384_v2  ;;  %v3732_v2 = vld [vmem:[%s5215_s11 + $0x90] sm:$0xff]  ;;  %v3742_v20 = vld [vmem:[%s5215_s11 + $0xe0] sm:$0xff] }
 0xd97   : > { %4113 = vmatmul.mubr.msk.f32.vlgmr.msra.gmra.mrb[22].mxu1 %vm884_vm3, %v2651_v21  ;;  %v3743_v21 = vld [vmem:[%s5215_s11 + $0xe8] sm:$0xff] }
 0xd98   : > { %v4394_v22 = vpop.eup %4393  ;;  %4122 = vmatprep.mubr.msk.f32.mxu1 %vm4467_vm0, %v4468_v6 }
 0xd99   : > { %v2652_v23 = vmul.f32 %v4394_v22, %v4386_v5  ;;  %v3733_v5 = vld [vmem:[%s5215_s11 + $0x98] sm:$0xff]  ;;  %v4305_v22 = vpack.c.bf16 %v3743_v21, %v3742_v20 }
 0xd9a   : > { %v4290_v7 = vpack.c.bf16 %v3733_v5, %v3732_v2  ;;  %v4401_v5 = vld [vmem:[%s4656_s24] sm:$0xff]  ;;  %s4472_s24 = smov [#allocation2]  }
 0xd9b   : > { %4118 = vmatmul.mubr.msk.f32.vlgmr.msra.gmra.mrb[30].mxu0 %vm884_vm3, %v2652_v23  ;;  %s4406_s19 = sshll.u32 %s4472_s24, 4  ;;  %s4407_s19 = int_to_ptr.vmem [resolvable:$false] %s4406_s19 }
 0xd9c   : > { %4127 = vmatprep.mubr.msk.f32.mxu0 %vm4467_vm0, %v4468_v6  ;;  %4126 = vmatpush3.msra.mxu0 %v3712_v29  ;;  %v3722_v29 = vld [vmem:[%s5212_s8 + $0x1] ss:$0 sm:$0xff]  ;;  %s4408_s30 = scalar_lea.vmem %s4407_s19, 256  ;;  %p4409_p0 = scmp.lt.s32.totalorder %s5163_s26, %s4407_s19 }
 0xd9d   : > { %4135 = vmatprep.subr.mxu0 %v4468_v6  ;;  %p4410_p1 = scmp.lt.s32.totalorder %s4408_s30, %s4402_s28 }
 0xd9f   : > { %p4411_p2 = por %p4410_p1, %p4409_p0 }
 0xda1   : > { %p4412_p3 = pnand %p4411_p2, %p4405_p13 }
 0xdbe   : > { %v2645_v24 = vpop.xlane.xlu1 %2644 }
 0xdbf   : > { %4395 = vrcp.f32 %v2645_v24 }
 0xdc2   : > { %v2308_v25 = vpop.permute.xlu1 %2307 }
 0xdc3   : > { %4121 = vmatpush3.msra.mxu1 %v2308_v25 }
 0xdc4   : > { %4130 = vmatprep.subr.mxu1 %v4468_v6 }
 0xdc9   : > { %v4396_v26 = vpop.eup %4395 }
 0xdca   : > { %v2653_v27 = vmul.f32 %v4396_v26, %v4390_v13  ;;  %v3738_v13 = vld [vmem:[%s5215_s11 + $0xc0] sm:$0xff] }
 0xdcb   : > { %v4299_v15 = vpack.c.bf16 %v3739_v14, %v3738_v13 }
 0xdcc   : > { %4123 = vmatmul.mubr.msk.f32.vlgmr.msra.gmra.mrb[24].mxu1 %vm884_vm3, %v2653_v27  ;;  %v3721_v27 = vld [vmem:[%s5211_s7 + $0x1] ss:$0 sm:$0xff] }
 0xdcd   : > { %4131 = vmatpush3.msra.mxu1 %v3711_v28  ;;  %4132 = vmatprep.mubr.msk.f32.mxu1 %vm4467_vm0, %v4468_v6 }
 0xdce   : > { %4140 = vmatprep.subr.mxu1 %v4468_v6 }
 0xdf8   : > { %v2723_v31 = vpop.f32.mrb[28].mxu0 }
 0xdf9   : > { %v4109_v33 = vpop.f32.mrb[29].mxu0  ;;  %4133 = vmatmul.mubr.msk.f32.vlgmr.msra.gmra.mrb[26].mxu1 %vm884_vm3, %v2723_v31 }
 0xdfa   : > { %4141 = vmatpush3.msra.mxu1 %v3714_v30  ;;  %4142 = vmatprep.mubr.msk.f32.mxu1 %vm4467_vm0, %v4468_v6  ;;  %v3744_v33 = vld [vmem:[%s5215_s11 + $0xf0] sm:$0xff] }
 0xdfb   : > { %4286 = vmatprep.subr.bf16.mxu1 %v4466_v3 }
 0xe6a   : > { %v2796_v35 = vpop.f32.mrb[22].mxu1 }
 0xe6b   : > { %v4114_v36 = vpop.f32.mrb[23].mxu1  ;;  %4128 = vmatmul.mubr.msk.f32.vlgmr.msra.gmra.mrb[32].mxu0 %vm884_vm3, %v2796_v35 }
 0xe6c   : > { %4136 = vmatpush3.msra.mxu0 %v3713_v34  ;;  %4137 = vmatprep.mubr.msk.f32.mxu0 %vm4467_vm0, %v4468_v6  ;;  %v3745_v34 = vld [vmem:[%s5215_s11 + $0xf8] sm:$0xff]  ;;  %v3728_v36 = vld [vmem:[%s5214_s10 + $0x1] ss:$0 sm:$0xff] }
 0xe6d   : > { %4280 = vmatprep.subr.bf16.mxu0 %v4466_v3  ;;  %v4308_v35 = vpack.c.bf16 %v3745_v34, %v3744_v33 }
 0xe6e   : > { %v2869_v37 = vpop.f32.mrb[30].mxu0 }
 0xe6f   : > { %v4119_v38 = vpop.f32.mrb[31].mxu0  ;;  %4138 = vmatmul.mubr.msk.f32.vlgmr.msra.gmra.mrb[34].mxu0 %vm884_vm3, %v2869_v37 }
 0xe70   : > { %4153 = vmatprep.mubr.msk.f32.mxu0 %vm4467_vm0, %v4468_v6  ;;  %4282 = vmatpush3.bf16.msra.mxu0 %v4281_v61 }
 0xe71   : > { %4283 = vmatprep.subr.bf16.mxu0 %v4466_v3 }
 0xe9f   : > { %v2942_v39 = vpop.f32.mrb[24].mxu1 }
 0xea0   : > { %v4124_v40 = vpop.f32.mrb[25].mxu1  ;;  %4143 = vmatmul.mubr.msk.f32.vlgmr.msra.gmra.mrb[28].mxu1 %vm884_vm3, %v2942_v39 }
 0xea1   : > { %4188 = vmatprep.mubr.msk.f32.mxu1 %vm4467_vm0, %v4468_v6  ;;  %4288 = vmatpush3.bf16.msra.mxu1 %v4287_v4 }
 0xea2   : > { %4289 = vmatprep.subr.bf16.mxu1 %v4466_v3 }
 0xea5   : > { %4291 = vmatpush3.bf16.msra.mxu1 %v4290_v7 }
 0xea6   : > { %4292 = vmatprep.subr.bf16.mxu1 %v4466_v3 }
 0xea9   : > { %4294 = vmatpush3.bf16.msra.mxu1 %v4293_v32 }
 0xeaa   : > { %4295 = vmatprep.subr.bf16.mxu1 %v4466_v3 }
 0xead   : > { %4297 = vmatpush3.bf16.msra.mxu1 %v4296_v12 }
 0xeae   : > { %4298 = vmatprep.subr.bf16.mxu1 %v4466_v3 }
 0xeb1   : > { %4300 = vmatpush3.bf16.msra.mxu1 %v4299_v15 }
 0xeb2   : > { %4301 = vmatprep.subr.bf16.mxu1 %v4466_v3 }
 0xeb5   : > { %4303 = vmatpush3.bf16.msra.mxu1 %v4302_v19 }
 0xeb6   : > { %4304 = vmatprep.subr.bf16.mxu1 %v4466_v3 }
 0xeb9   : > { %4306 = vmatpush3.bf16.msra.mxu1 %v4305_v22 }
 0xeba   : > { %4307 = vmatprep.subr.bf16.mxu1 %v4466_v3 }
 0xebd   : > { %4309 = vmatpush3.bf16.msra.mxu1 %v4308_v35 }
 0xecc   : > { %v3093_v41 = vpop.f32.mrb[26].mxu1 }
 0xecd   : > { %v4134_v42 = vpop.f32.mrb[27].mxu1 }
 0xf3e   : > { %v3020_v43 = vpop.f32.mrb[32].mxu0 }
 0xf3f   : > { %v3094_v44 = vadd.f32 %v3093_v41, %v3020_v43  ;;  %v4129_v45 = vpop.f32.mrb[33].mxu0 }
 0xf42   : > { %v3166_v46 = vpop.f32.mrb[34].mxu0 }
 0xf43   : > { %v3170_v47 = vadd.f32 %v3166_v46, %v3094_v44  ;;  %v4139_v48 = vpop.f32.mrb[35].mxu0 }
 0xf73   : > { %v3240_v49 = vpop.f32.mrb[28].mxu1 }
 0xf74   : > { %v3244_v50 = vadd.f32 %v3240_v49, %v3170_v47  ;;  %v4144_v51 = vpop.f32.mrb[29].mxu1 }
 0xf75   : > { %v3491_v51 = vld [vmem:[%s5219_s15] sm:$0xff] }
 0xf76   : > { %v3245_v52 = vadd.f32 %v3244_v50, %v4920_v16  ;;  %v3725_v16 = vld [vmem:[%s5213_s9 + $0x30] sm:$0xff] }
 0xf77   : > { %v4284_v63 = vpack.c.bf16 %v3726_v62, %v3725_v16  ;;  %v3751_v16 = vld [vmem:[%s5218_s14 + $0x1] ss:$0 sm:$0xff] }
 0xf78   : > { %v3250_v53 = vsel %vm638_vm2, %v3245_v52, 0.0 }
 0xf79   : > { %3251 = vadd.xlane.f32.xlu0 %v3250_v53  ;;  %4285 = vmatpush3.bf16.msra.mxu0 %v4284_v63 }
 0xf7a   : > { %4310 = vmatprep.subr.bf16.mxu0 %v4466_v3 }
0x1006   : > { %v3252_v54 = vpop.xlane.xlu0 %3251 }
0x1007   : > { %v3253_v55 = vmul.f32 0.03125, %v3252_v54  ;;  %v3493_v54 = vld [vmem:[%s5219_s15 + $0x10] sm:$0xff] }
0x1009   : > { %v3254_v56 = vsub.f32 %v3245_v52, %v3253_v55  ;;  %v3492_v52 = vld [vmem:[%s5219_s15 + $0x8] sm:$0xff]  ;;  %v3494_v55 = vld [vmem:[%s5219_s15 + $0x18] sm:$0xff] }
0x100a   : > { %v4311_v53 = vpack.c.bf16 %v3492_v52, %v3491_v51 }
0x100b   : > { %v3255_v57 = vmul.f32 %v3254_v56, %v3254_v56 }
0x100d   : > { %v3256_v58 = vsel %vm638_vm2, %v3255_v57, 0.0 }
0x100e   : > { %3257 = vadd.xlane.f32.xlu1 %v3256_v58 }
0x109b   : > { %v3258_v23 = vpop.xlane.xlu1 %3257 }
0x109c   : > { %v3259_v24 = vmul.f32 0.03125, %v3258_v23 }
0x109e   : > { %v3260_v25 = vadd.f32 1e-06, %v3259_v24 }
0x10a0   : > { %4397 = vrsqrt.f32 %v3260_v25 }
0x10aa   : > { %v4398_v26 = vpop.eup %4397 }
0x10ab   : > { %v3262_v28 = vmul.f32 %v4398_v26, %v3254_v56  ;;  %v4314_v56 = vpack.c.bf16 %v3494_v55, %v3493_v54 }
0x10ad   : > { %v3269_v30 = vmul.f32 %v3721_v27, %v3262_v28 }
0x10af   : > { %v3276_v31 = vadd.f32 %v3722_v29, %v3269_v30 }
0x10b1   : > { %4154 = vmatmul.mubr.msk.f32.vlgmr.msra.gmra.mrb[36].mxu0 %vm638_vm2, %v3276_v31 }
0x10b2   : > { %4199 = vmatprep.mubr.msk.f32.mxu0 %vm4467_vm0, %v4468_v6  ;;  %v3747_v6 = vld [vmem:[%s5216_s12 + $0x1] ss:$0 sm:$0xff]  ;;  %4312 = vmatpush3.bf16.msra.mxu0 %v4311_v53 }
0x10b3   : > { %4313 = vmatprep.subr.bf16.mxu0 %v4466_v3  ;;  %v3750_v3 = vld [vmem:[%s5217_s13 + $0x1] ss:$0 sm:$0xff] }
0x10b6   : > { %4315 = vmatpush3.bf16.msra.mxu0 %v4314_v56 }
0x1184   : > { %v3359_v37 = vpop.f32.mrb[36].mxu0 }
0x1185   : > { %v3360_v38 = vadd.f32 %v3728_v36, %v3359_v37  ;;  %v4155_v39 = vpop.f32.mrb[37].mxu0 }
0x1187   : > { %v3363_v40 = vmax.f32 %v3360_v38, 0.0 }
0x1189   : > { %4189 = vmatmul.mubr.f32.vlgmr.msra.gmra.mrb[30].mxu1 %v3363_v40 }
0x125c   : > { %v3455_v41 = vpop.f32.mrb[30].mxu1 }
0x125d   : > { %v3456_v42 = vadd.f32 %v3747_v6, %v3455_v41  ;;  %v4190_v43 = vpop.f32.mrb[31].mxu1 }
0x125f   : > { %v3459_v44 = vadd.f32 %v3456_v42, %v3276_v31 }
0x1261   : > { %v3464_v45 = vsel %vm638_vm2, %v3459_v44, 0.0 }
0x1262   : > { %3465 = vadd.xlane.f32.xlu0 %v3464_v45 }
0x12ef   : > { %v3466_v46 = vpop.xlane.xlu0 %3465 }
0x12f0   : > { %v3467_v47 = vmul.f32 0.03125, %v3466_v46 }
0x12f2   : > { %v3468_v48 = vsub.f32 %v3459_v44, %v3467_v47 }
0x12f4   : > { %v3469_v49 = vmul.f32 %v3468_v48, %v3468_v48 }
0x12f6   : > { %v3470_v50 = vsel %vm638_vm2, %v3469_v49, 0.0 }
0x12f7   : > { %3471 = vadd.xlane.f32.xlu0 %v3470_v50 }
0x1384   : > { %v3472_v57 = vpop.xlane.xlu0 %3471 }
0x1385   : > { %v3473_v58 = vmul.f32 0.03125, %v3472_v57 }
0x1387   : > { %v3474_v59 = vadd.f32 1e-06, %v3473_v58 }
0x1389   : > { %4399 = vrsqrt.f32 %v3474_v59 }
0x1393   : > { %v4400_v60 = vpop.eup %4399 }
0x1394   : > { %v3476_v61 = vmul.f32 %v4400_v60, %v3468_v48 }
0x1396   : > { %v3483_v62 = vmul.f32 %v3750_v3, %v3476_v61 }
0x1398   : > { %v3490_v63 = vadd.f32 %v3751_v16, %v3483_v62 }
0x139a   : > { %4200 = vmatmul.mubr.msk.f32.vlgmr.msra.gmra.mrb[38].mxu0 %vm638_vm2, %v3490_v63 }
0x146d   : > { %v3571_v1 = vpop.f32.mrb[38].mxu0 }
0x146e   : > { %v3572_v2 = vadd.f32 %v3752_v0, %v3571_v1  ;;  %v4201_v4 = vpop.f32.mrb[39].mxu0 }
0x1470   : > { %v3575_v7 = vadd.f32 %v4401_v5, %v3572_v2 }
0x1472   : > { %3576 = vst.msk [vmem:[%s539_s20] sm:$0xff] %vm560_vm1, %v3575_v7 }
0x1473   : > { %4415 = shalt.err (!%p4412_p3)
}
0x1474   : > { %s4416_s27 = scalar_lea.hbm %s5161_s17, 128  ;;  %s4420_s0 = scalar_lea.hbm %s5249_s18, 256 }
0x1475   : > { %p4417_p4 = scmp.ne.s32.totalorder %s5161_s17, %s4416_s27  ;;  %p4421_p9 = scmp.lt.u32.totalorder %s5161_s17, %s5249_s18 }
0x1476   : > { %p4422_p10 = scmp.lt.u32.totalorder %s4420_s0, %s4416_s27  ;;  %p4424_p12 = scmp.lt.u32.totalorder %s4416_s27, %s5161_s17 }
0x1477   : > { %p4418_p7 = pnand %p4417_p4, %p4601_p5 }
0x1478   : > { %p4423_p11 = por %p4422_p10, %p4421_p9 }
0x1479   : > { %p4419_p8 = pneg %p4418_p7 }
0x147a   : > { %p4425_p13 = por %p4424_p12, %p4423_p11 }
0x147c   : > { %p4426_p0 = pnand %p4425_p13, %p4419_p8 }
0x147e   : > { %4429 = shalt.err (!%p4426_p0)
}
0x147f   : > { %4316 = dma.vmem_to_hbm [thread:$0]  (%p4601_p5), %s5163_s26, 128, %s5161_s17, %s3578_s29  }
0x1480 PF: > { %s5250_s28 = sld [smem:[#allocation7_spill]]  ;;  %s5251_s19 = sld [smem:[#allocation5_spill]] }
0x1486   : > { %p4322_p1 = scmp.ge.s32.totalorder %s5250_s28, 2  ;;  %s3603_s21 = sand.u32 1, %s5251_s19  }
0x1487   : > { %s3604_s20 = scalar_lea.sflag [#allocation3], %s3603_s21 }
0x1488   : > { %p4319_p2 = pnand %p4322_p1, %p4605_p6 }
0x148a   : > { %4447 = dma.done.wait (!%p4319_p2), %s3604_s20, 128  }
0x148b   : > { %4449 = vsyncadd (!%p4319_p2), %s3604_s20, 4294967168  ;;  %s5253_s27 = sld [smem:[#allocation8_spill]]  ;;  %s5254_s0 = sld [smem:[#allocation6_spill]] }
0x148c   : > { %s5255_s26 = sld [smem:[#allocation9_spill]]  ;;  %s5256_s24 = smov %s4456_s25 }
0x1491   : > { %p27_p3 = scmp.ge.s32.totalorder %s5253_s27, 4   ;;  %s5257_s25 = smov %s5254_s0 }
0x1493   :  { %29 = sbr.rel (!%p27_p3) target bundleno = 7 (0x7), region = 135 }
0x149a   :  { %3609 = vsyncpa [#allocation3], 1 }
0x149b   :  { %3611 = vsyncpa [#allocation3 + $0x1], 1 }

</bundles_post_ra>
